<compile_context>
chip_gen: v7x
topology: tpu7x:2x2x1
jax: 0.10.0
libtpu: 0.0.40
codegen_flags: <defaults>
</compile_context>

<pallas_src>
import jax
import jax.numpy as jnp
from jax import lax
from jax.experimental import pallas as pl
from jax.experimental.pallas import tpu as pltpu

HIDDEN = 64        # hidden_dim fixed to 64 in the PyTorch module
LN_EPS = 1e-5      # nn.LayerNorm default eps
MIX_EPS = 1e-6
HALO = 3           # max padding needed (7x7 conv)
HS = 4             # conv strip height (rows per accumulator strip; small -> v5e-friendly)


def _gelu(x):
    # exact (erf-based) GELU, matching torch.nn.GELU() default
    return 0.5 * x * (1.0 + lax.erf(x * jnp.float32(0.7071067811865476)))


def _make_nova_kernel(P, C, H, W):
    HW = H * W
    PC = P * C
    PHD = P * HIDDEN
    W_AL = ((W + 2 * HALO + 7) // 8) * 8      # sublane-aligned padded width
    n_strips = H // HS

    def kernel(x_ref, wd_ref, weff_ref, wr1_ref, wr2_ref, wp_ref, wu_ref,
               bias_ref, bu_ref, o_ref, pad_ref, conv_ref):
        # bias rows: 0=down_proj, 1=combined 7x7 conv, 2=res 1x1, 3=res dw3, 4=projector
        b_all = bias_ref[...]                                     # (5, PHD)
        bd_row, beff_row = b_all[0:1], b_all[1:2]
        br1_row, br2_row, bp_row = b_all[2:3], b_all[3:4], b_all[4:5]

        # ---- stage 1: LayerNorm (affine folded into wd) + down_proj (token-major) ----
        x = x_ref[...].astype(jnp.float32)                        # (P, C, HW)
        mean = jnp.mean(x, axis=1, keepdims=True)
        var = jnp.mean((x - mean) ** 2, axis=1, keepdims=True)    # biased var (LayerNorm)
        xn = ((x - mean) * lax.rsqrt(var + LN_EPS)).reshape(PC, HW)
        down = jnp.dot(xn.T, wd_ref[...],
                       preferred_element_type=jnp.float32) + bd_row      # (HW, PHD)

        # ---- stage 2: NovaOp (combined 7x7 dw conv + residual branch) ----------------
        # zero only the halo ring (kept per-step: safe under v7x megacore grid sharding)
        zrow = jnp.zeros((HALO, W_AL, PHD), jnp.float32)
        pad_ref[pl.ds(0, HALO), :, :] = zrow
        pad_ref[pl.ds(H + HALO, HALO), :, :] = zrow
        pad_ref[pl.ds(HALO, H), pl.ds(0, HALO), :] = jnp.zeros((H, HALO, PHD), jnp.float32)
        pad_ref[pl.ds(HALO, H), pl.ds(W + HALO, W_AL - W - HALO), :] = (
            jnp.zeros((H, W_AL - W - HALO, PHD), jnp.float32))
        pad_ref[pl.ds(HALO, H), pl.ds(HALO, W), :] = down.reshape(H, W, PHD)

        w7 = weff_ref[...]                                        # (7, 7, PHD)
        w3 = wr2_ref[...]                                         # (3, 3, PHD)

        # combined 7x7 depthwise conv (+ bias + identity), strip-mined over rows so the
        # accumulator stays ~HS*ceil(W/8) vregs (rolled loop -> no cross-strip spills)
        @pl.loop(0, n_strips)
        def _(s):
            row0 = pl.multiple_of(s * HS, HS)
            acc = jnp.zeros((HS, W, PHD), jnp.float32)
            for dy in range(7):
                for dx in range(7):
                    tap = pad_ref[pl.ds(row0 + dy, HS), pl.ds(dx, W), :]
                    acc = acc + tap * w7[dy:dy + 1, dx:dx + 1, :]
            ident = pad_ref[pl.ds(row0 + HALO, HS), pl.ds(HALO, W), :]
            conv_ref[pl.ds(row0, HS), :, :] = acc + beff_row + ident

        # residual branch: 1x1 conv -> GELU, written back over the pad interior
        out_tok = conv_ref[...].reshape(HW, PHD)
        t = _gelu(jnp.dot(out_tok, wr1_ref[...],
                          preferred_element_type=jnp.float32) + br1_row)
        pad_ref[pl.ds(HALO, H), pl.ds(HALO, W), :] = t.reshape(H, W, PHD)

        # residual branch: depthwise 3x3, accumulated into the conv result buffer
        @pl.loop(0, n_strips)
        def _(s):
            row0 = pl.multiple_of(s * HS, HS)
            acc = jnp.zeros((HS, W, PHD), jnp.float32)
            for dy in range(3):
                for dx in range(3):
                    tap = pad_ref[pl.ds(row0 + 2 + dy, HS), pl.ds(2 + dx, W), :]
                    acc = acc + tap * w3[dy:dy + 1, dx:dx + 1, :]
            conv_ref[pl.ds(row0, HS), :, :] = (
                conv_ref[pl.ds(row0, HS), :, :] + acc + br2_row)

        # ---- stage 3: projector (1x1) + GELU + up_proj + residual ---------------------
        out_tok = conv_ref[...].reshape(HW, PHD)
        proj = jnp.dot(out_tok, wp_ref[...],
                       preferred_element_type=jnp.float32) + bp_row       # (HW, PHD)
        y = _gelu(proj)
        # TODO(synk): nn.Dropout(0.1) is identity in inference/eval; not modeled here.
        up = jnp.dot(y, wu_ref[...],
                     preferred_element_type=jnp.float32) + bu_ref[...]    # (HW, PC)
        up_cf = up.T.reshape(P, C, HW)                            # small transpose (PC, HW)
        o_ref[...] = (x_ref[...].astype(jnp.float32) + up_cf).astype(o_ref.dtype)

    return kernel, W_AL


def _block_diag(w, P):
    """Tile a 2-D weight into a (P*a, P*b) block-diagonal matrix (P small)."""
    if P == 1:
        return w
    a, b = w.shape
    out = jnp.zeros((P, a, P, b), w.dtype)
    for i in range(P):
        out = out.at[i, :, i, :].set(w)
    return out.reshape(P * a, P * b)


# ---------------- wrapper ----------------
@jax.jit
def nova_forward(x, p):
    B, C, H, W = x.shape
    HW = H * W
    # Pack 2 images per step only when the grid stays >= 2 (keeps both v7x TCs busy while
    # filling all 128 lanes in the conv stage); otherwise fall back to 1 image / step.
    P = 2 if (B % 2 == 0 and B >= 4) else 1
    assert B % P == 0 and H % HS == 0, "unsupported test shape"

    x_cf = x.reshape(B, C, HW)                                    # free reshape (no transpose)
    f32 = jnp.float32
    scale = p["scale_input"][0, 0]
    shift = p["shift_input"][0, 0]

    # fold LayerNorm affine + scale/shift into down_proj (exact; linear)
    g = scale * p["ln_w"][:, 0]                                   # (C,)
    v = scale * p["ln_b"][:, 0] + shift                           # (C,)
    wd_tok = (p["wd"] * g[None, :]).T                             # (C, HIDDEN) token-major
    bd_eff = p["wd"] @ v + p["bd"][:, 0]                          # (HIDDEN,)

    # fold the three depthwise convs + mix blend into one 7x7 conv (exact; linear in taps)
    m3, m5, m7 = p["mix"][0, 0], p["mix"][0, 1], p["mix"][0, 2]
    denom = m3 + m5 + m7 + MIX_EPS
    w_eff = (m3 * jnp.pad(p["w3"], ((2, 2), (2, 2), (0, 0)))
             + m5 * jnp.pad(p["w5"], ((1, 1), (1, 1), (0, 0)))
             + m7 * p["w7"]) / denom
    b_eff = (m3 * p["b3"][0] + m5 * p["b5"][0] + m7 * p["b7"][0]) / denom  # (HIDDEN,)

    # lane-pack P images: block-diag the dense weights, channel-tile the depthwise convs
    wd_bd = _block_diag(wd_tok, P).astype(f32)                    # (P*C,  P*HD)
    wr1_bd = _block_diag(p["wr1"], P).astype(f32)                 # (P*HD, P*HD)
    wp_bd = _block_diag(p["wp"].T, P).astype(f32)                 # (P*HD, P*HD)
    wu_bd = _block_diag(p["wu"].T, P).astype(f32)                 # (P*HD, P*C)
    weff_t = jnp.tile(w_eff, (1, 1, P)).astype(f32)               # (7, 7, P*HD)
    wr2_t = jnp.tile(p["wr2"], (1, 1, P)).astype(f32)             # (3, 3, P*HD)

    biases = jnp.stack([jnp.tile(bd_eff, P), jnp.tile(b_eff, P),
                        jnp.tile(p["br1"][0], P), jnp.tile(p["br2"][0], P),
                        jnp.tile(p["bp"][:, 0], P)], axis=0).astype(f32)   # (5, P*HD)
    bu_t = jnp.tile(p["bu"][:, 0], P).reshape(1, P * C).astype(f32)        # (1, P*C)

    kernel, W_AL = _make_nova_kernel(P, C, H, W)
    PHD = P * HIDDEN

    def _rep(shape):
        return pl.BlockSpec(shape, lambda b, _n=len(shape): (0,) * _n)

    out_cf = pl.pallas_call(
        kernel,
        out_shape=jax.ShapeDtypeStruct((B, C, HW), jnp.float32),
        grid=(B // P,),
        in_specs=[pl.BlockSpec((P, C, HW), lambda b: (b, 0, 0)),
                  _rep((P * C, PHD)),
                  _rep((7, 7, PHD)),
                  _rep((PHD, PHD)),
                  _rep((3, 3, PHD)),
                  _rep((PHD, PHD)),
                  _rep((PHD, P * C)),
                  _rep((5, PHD)),
                  _rep((1, P * C))],
        out_specs=pl.BlockSpec((P, C, HW), lambda b: (b, 0, 0)),
        scratch_shapes=[pltpu.VMEM((H + 2 * HALO, W_AL, PHD), jnp.float32),
                        pltpu.VMEM((H, W, PHD), jnp.float32)],
        compiler_params=pltpu.CompilerParams(dimension_semantics=("parallel",)),
    )(x_cf, wd_bd, weff_t, wr1_bd, wr2_t, wp_bd, wu_bd, biases, bu_t)

    return out_cf.reshape(B, C, H, W)


# ---------------- pure-JAX reference (mirrors the PyTorch forward) ----------------
def nova_reference(x, p):
    B, C, H, W = x.shape
    x_tok = jnp.transpose(x.reshape(B, C, H * W), (0, 2, 1))      # (B, HW, C)
    identity = x_tok
    mean = jnp.mean(x_tok, axis=-1, keepdims=True)
    var = jnp.mean((x_tok - mean) ** 2, axis=-1, keepdims=True)
    xn = (x_tok - mean) / jnp.sqrt(var + LN_EPS)
    xn = xn * p["ln_w"][:, 0] + p["ln_b"][:, 0]
    xn = p["scale_input"][0, 0] * xn + p["shift_input"][0, 0]
    h = xn @ p["wd"].T + p["bd"][:, 0]
    h = h.reshape(B, H, W, HIDDEN)                                # NHWC

    def dw(z, w, b):                                              # depthwise conv, SAME pad
        k = w.shape[0]
        o = lax.conv_general_dilated(
            z, w.reshape(k, k, 1, HIDDEN), window_strides=(1, 1), padding="SAME",
            dimension_numbers=("NHWC", "HWIO", "NHWC"), feature_group_count=HIDDEN)
        return o + b[0]

    m3, m5, m7 = p["mix"][0, 0], p["mix"][0, 1], p["mix"][0, 2]
    o3, o5, o7 = dw(h, p["w3"], p["b3"]), dw(h, p["w5"], p["b5"]), dw(h, p["w7"], p["b7"])
    out = (m3 * o3 + m5 * o5 + m7 * o7) / (m3 + m5 + m7 + MIX_EPS)
    out = out + h
    t = jax.nn.gelu(out.reshape(B, H * W, HIDDEN) @ p["wr1"] + p["br1"][0], approximate=False)
    out = out + dw(t.reshape(B, H, W, HIDDEN), p["wr2"], p["br2"])
    proj = out.reshape(B, H * W, HIDDEN) @ p["wp"].T + p["bp"][:, 0]
    y = jax.nn.gelu(proj, approximate=False)
    up = y @ p["wu"].T + p["bu"][:, 0]
    out_tok = identity + up
    return jnp.transpose(out_tok, (0, 2, 1)).reshape(B, C, H, W)


def init_params(key, in_dim):
    ks = jax.random.split(key, 16)

    def nrm(k, shape, scale=0.1):
        return (scale * jax.random.normal(k, shape)).astype(jnp.float32)

    return {
        "ln_w": jnp.ones((in_dim, 1), jnp.float32),
        "ln_b": jnp.zeros((in_dim, 1), jnp.float32),
        "scale_input": jnp.ones((1, 1), jnp.float32),
        "shift_input": jnp.zeros((1, 1), jnp.float32),
        "wd": nrm(ks[0], (HIDDEN, in_dim)),
        "bd": nrm(ks[1], (HIDDEN, 1), 0.01),
        "w3": nrm(ks[2], (3, 3, HIDDEN)), "b3": nrm(ks[3], (1, HIDDEN), 0.01),
        "w5": nrm(ks[4], (5, 5, HIDDEN)), "b5": nrm(ks[5], (1, HIDDEN), 0.01),
        "w7": nrm(ks[6], (7, 7, HIDDEN)), "b7": nrm(ks[7], (1, HIDDEN), 0.01),
        "mix": jnp.ones((1, 3), jnp.float32),
        "wr1": nrm(ks[8], (HIDDEN, HIDDEN)), "br1": nrm(ks[9], (1, HIDDEN), 0.01),
        "wr2": nrm(ks[10], (3, 3, HIDDEN)), "br2": nrm(ks[11], (1, HIDDEN), 0.01),
        "wp": nrm(ks[12], (HIDDEN, HIDDEN)), "bp": nrm(ks[13], (HIDDEN, 1), 0.01),
        "wu": nrm(ks[14], (in_dim, HIDDEN)), "bu": nrm(ks[15], (in_dim, 1), 0.01),
    }


if __name__ == "__main__":
    key = jax.random.PRNGKey(0)
    kx, kp = jax.random.split(key)
    B, C, H, W = 4, 32, 16, 16
    x = jax.random.normal(kx, (B, C, H, W), jnp.float32)
    params = init_params(kp, C)

    # packed path (P=2, grid=(2,))
    out = jax.block_until_ready(nova_forward(x, params))
    assert out.shape == (B, C, H, W)
    assert bool(jnp.all(jnp.isfinite(out)))
    ref = jax.block_until_ready(nova_reference(x, params))
    max_err = float(jnp.max(jnp.abs(out - ref)))
    assert max_err < 5e-3, f"mismatch vs reference (packed path): {max_err}"

    # fallback path (P=1, grid=(2,)) for small/odd batches
    x2 = x[:2]
    out2 = jax.block_until_ready(nova_forward(x2, params))
    max_err2 = float(jnp.max(jnp.abs(out2 - ref[:2])))
    assert max_err2 < 5e-3, f"mismatch vs reference (fallback path): {max_err2}"

    print("KERNEL_OK")
</pallas_src>

<mosaic_0001>
module attributes {stable_mosaic.version = 11 : i64} {
  func.func @kernel(%arg0: i32, %arg1: memref<2x32x256xf32, #tpu.memory_space<vmem>>, %arg2: memref<64x128xf32, #tpu.memory_space<vmem>>, %arg3: memref<7x7x128xf32, #tpu.memory_space<vmem>>, %arg4: memref<128x128xf32, #tpu.memory_space<vmem>>, %arg5: memref<3x3x128xf32, #tpu.memory_space<vmem>>, %arg6: memref<128x128xf32, #tpu.memory_space<vmem>>, %arg7: memref<128x64xf32, #tpu.memory_space<vmem>>, %arg8: memref<5x128xf32, #tpu.memory_space<vmem>>, %arg9: memref<1x64xf32, #tpu.memory_space<vmem>>, %arg10: memref<2x32x256xf32, #tpu.memory_space<vmem>>, %arg11: memref<22x24x128xf32, #tpu.memory_space<vmem>>, %arg12: memref<16x16x128xf32, #tpu.memory_space<vmem>>) attributes {dimension_semantics = [#tpu.dimension_semantics<parallel>], iteration_bounds = array<i64: 2>, scalar_prefetch = 0 : i64, scratch_operands = 2 : i64, tpu.core_type = #tpu.core_type<tc>, window_params = [{transform_indices = @transform_0, window_bounds = array<i64: 2, 32, 256>}, {pipeline_mode = #tpu.pipeline_mode<synchronous>, transform_indices = @transform_1, window_bounds = array<i64: 64, 128>}, {pipeline_mode = #tpu.pipeline_mode<synchronous>, transform_indices = @transform_2, window_bounds = array<i64: 7, 7, 128>}, {pipeline_mode = #tpu.pipeline_mode<synchronous>, transform_indices = @transform_3, window_bounds = array<i64: 128, 128>}, {pipeline_mode = #tpu.pipeline_mode<synchronous>, transform_indices = @transform_4, window_bounds = array<i64: 3, 3, 128>}, {pipeline_mode = #tpu.pipeline_mode<synchronous>, transform_indices = @transform_5, window_bounds = array<i64: 128, 128>}, {pipeline_mode = #tpu.pipeline_mode<synchronous>, transform_indices = @transform_6, window_bounds = array<i64: 128, 64>}, {pipeline_mode = #tpu.pipeline_mode<synchronous>, transform_indices = @transform_7, window_bounds = array<i64: 5, 128>}, {pipeline_mode = #tpu.pipeline_mode<synchronous>, transform_indices = @transform_8, window_bounds = array<i64: 1, 64>}, {transform_indices = @transform_9, window_bounds = array<i64: 2, 32, 256>}]} {
    %c0 = arith.constant 0 : index
    %c0_0 = arith.constant 0 : index
    %0 = vector.load %arg8[%c0, %c0_0] : memref<5x128xf32, #tpu.memory_space<vmem>>, vector<5x128xf32>
    %1 = vector.extract_strided_slice %0 {offsets = [0, 0], sizes = [1, 128], strides = [1, 1]} : vector<5x128xf32> to vector<1x128xf32>
    %2 = vector.extract_strided_slice %0 {offsets = [1, 0], sizes = [1, 128], strides = [1, 1]} : vector<5x128xf32> to vector<1x128xf32>
    %3 = vector.extract_strided_slice %0 {offsets = [2, 0], sizes = [1, 128], strides = [1, 1]} : vector<5x128xf32> to vector<1x128xf32>
    %4 = vector.extract_strided_slice %0 {offsets = [3, 0], sizes = [1, 128], strides = [1, 1]} : vector<5x128xf32> to vector<1x128xf32>
    %5 = vector.extract_strided_slice %0 {offsets = [4, 0], sizes = [1, 128], strides = [1, 1]} : vector<5x128xf32> to vector<1x128xf32>
    %c0_1 = arith.constant 0 : index
    %c0_2 = arith.constant 0 : index
    %c0_3 = arith.constant 0 : index
    %6 = vector.load %arg1[%c0_1, %c0_2, %c0_3] : memref<2x32x256xf32, #tpu.memory_space<vmem>>, vector<2x32x256xf32>
    %cst = arith.constant dense<0.000000e+00> : vector<2x256xf32>
    %7 = vector.multi_reduction <add>, %6, %cst [1] : vector<2x32x256xf32> to vector<2x256xf32>
    %8 = vector.shape_cast %7 : vector<2x256xf32> to vector<2x1x256xf32>
    %cst_4 = arith.constant 3.200000e+01 : f32
    %9 = vector.broadcast %cst_4 : f32 to vector<2x1x256xf32>
    %10 = arith.divf %8, %9 : vector<2x1x256xf32>
    %11 = vector.broadcast %10 : vector<2x1x256xf32> to vector<2x32x256xf32>
    %12 = arith.subf %6, %11 : vector<2x32x256xf32>
    %13 = arith.mulf %12, %12 : vector<2x32x256xf32>
    %cst_5 = arith.constant dense<0.000000e+00> : vector<2x256xf32>
    %14 = vector.multi_reduction <add>, %13, %cst_5 [1] : vector<2x32x256xf32> to vector<2x256xf32>
    %15 = vector.shape_cast %14 : vector<2x256xf32> to vector<2x1x256xf32>
    %cst_6 = arith.constant 3.200000e+01 : f32
    %16 = vector.broadcast %cst_6 : f32 to vector<2x1x256xf32>
    %17 = arith.divf %15, %16 : vector<2x1x256xf32>
    %18 = vector.broadcast %10 : vector<2x1x256xf32> to vector<2x32x256xf32>
    %19 = arith.subf %6, %18 : vector<2x32x256xf32>
    %cst_7 = arith.constant 9.99999974E-6 : f32
    %20 = vector.broadcast %cst_7 : f32 to vector<2x1x256xf32>
    %21 = arith.addf %17, %20 : vector<2x1x256xf32>
    %22 = math.rsqrt %21 : vector<2x1x256xf32>
    %23 = vector.broadcast %22 : vector<2x1x256xf32> to vector<2x32x256xf32>
    %24 = arith.mulf %19, %23 : vector<2x32x256xf32>
    %25 = vector.shape_cast %24 : vector<2x32x256xf32> to vector<64x256xf32>
    %26 = tpu.transpose %25, [1, 0] : vector<64x256xf32> -> vector<256x64xf32>
    %c0_8 = arith.constant 0 : index
    %c0_9 = arith.constant 0 : index
    %27 = vector.load %arg2[%c0_8, %c0_9] : memref<64x128xf32, #tpu.memory_space<vmem>>, vector<64x128xf32>
    %cst_10 = arith.constant dense<0.000000e+00> : vector<256x128xf32>
    %28 = tpu.matmul %26, %27, %cst_10 {dimension_numbers = #tpu.dot_dimension_numbers<[1], [0], [0], [1], [0, 0, 1, 1], [], []>} : vector<256x64xf32>, vector<64x128xf32>, vector<256x128xf32> -> vector<256x128xf32>
    %29 = vector.broadcast %1 : vector<1x128xf32> to vector<256x128xf32>
    %30 = arith.addf %28, %29 : vector<256x128xf32>
    %cst_11 = arith.constant 0.000000e+00 : f32
    %31 = vector.broadcast %cst_11 : f32 to vector<3x24x128xf32>
    %c0_12 = arith.constant 0 : index
    %c0_13 = arith.constant 0 : index
    %c0_14 = arith.constant 0 : index
    %32 = vector.load %arg11[%c0_12, %c0_13, %c0_14] : memref<22x24x128xf32, #tpu.memory_space<vmem>>, vector<3x24x128xf32>
    tpu.vector_store %arg11[%c0_12, %c0_13, %c0_14], %31 {strides = array<i32>} : memref<22x24x128xf32, #tpu.memory_space<vmem>>, vector<3x24x128xf32>,
    %c19 = arith.constant 19 : index
    %c0_15 = arith.constant 0 : index
    %c0_16 = arith.constant 0 : index
    %33 = vector.load %arg11[%c19, %c0_15, %c0_16] : memref<22x24x128xf32, #tpu.memory_space<vmem>>, vector<3x24x128xf32>
    tpu.vector_store %arg11[%c19, %c0_15, %c0_16], %31 {strides = array<i32>} : memref<22x24x128xf32, #tpu.memory_space<vmem>>, vector<3x24x128xf32>,
    %cst_17 = arith.constant 0.000000e+00 : f32
    %34 = vector.broadcast %cst_17 : f32 to vector<16x3x128xf32>
    %c3 = arith.constant 3 : index
    %c0_18 = arith.constant 0 : index
    %c0_19 = arith.constant 0 : index
    %35 = vector.load %arg11[%c3, %c0_18, %c0_19] : memref<22x24x128xf32, #tpu.memory_space<vmem>>, vector<16x3x128xf32>
    tpu.vector_store %arg11[%c3, %c0_18, %c0_19], %34 {strides = array<i32>} : memref<22x24x128xf32, #tpu.memory_space<vmem>>, vector<16x3x128xf32>,
    %cst_20 = arith.constant 0.000000e+00 : f32
    %36 = vector.broadcast %cst_20 : f32 to vector<16x5x128xf32>
    %c3_21 = arith.constant 3 : index
    %c19_22 = arith.constant 19 : index
    %c0_23 = arith.constant 0 : index
    %37 = vector.load %arg11[%c3_21, %c19_22, %c0_23] : memref<22x24x128xf32, #tpu.memory_space<vmem>>, vector<16x5x128xf32>
    tpu.vector_store %arg11[%c3_21, %c19_22, %c0_23], %36 {strides = array<i32>} : memref<22x24x128xf32, #tpu.memory_space<vmem>>, vector<16x5x128xf32>,
    %38 = vector.shape_cast %30 : vector<256x128xf32> to vector<16x16x128xf32>
    %c3_24 = arith.constant 3 : index
    %c3_25 = arith.constant 3 : index
    %c0_26 = arith.constant 0 : index
    %39 = vector.load %arg11[%c3_24, %c3_25, %c0_26] : memref<22x24x128xf32, #tpu.memory_space<vmem>>, vector<16x16x128xf32>
    tpu.vector_store %arg11[%c3_24, %c3_25, %c0_26], %38 {strides = array<i32>} : memref<22x24x128xf32, #tpu.memory_space<vmem>>, vector<16x16x128xf32>,
    %c0_27 = arith.constant 0 : index
    %c0_28 = arith.constant 0 : index
    %c0_29 = arith.constant 0 : index
    %40 = vector.load %arg3[%c0_27, %c0_28, %c0_29] : memref<7x7x128xf32, #tpu.memory_space<vmem>>, vector<7x7x128xf32>
    %c0_30 = arith.constant 0 : index
    %c0_31 = arith.constant 0 : index
    %c0_32 = arith.constant 0 : index
    %41 = vector.load %arg5[%c0_30, %c0_31, %c0_32] : memref<3x3x128xf32, #tpu.memory_space<vmem>>, vector<3x3x128xf32>
    %c0_i32 = arith.constant 0 : i32
    %c4_i32 = arith.constant 4 : i32
    %42 = arith.addi %c0_i32, %c4_i32 : i32
    %c1_i32 = arith.constant 1 : i32
    scf.for %arg13 = %c0_i32 to %42 step %c1_i32  : i32 {
      %c1_i32_70 = arith.constant 1 : i32
      %84 = arith.muli %arg13, %c1_i32_70 : i32
      %c0_i32_71 = arith.constant 0 : i32
      %85 = arith.addi %c0_i32_71, %84 : i32
      %c4_i32_72 = arith.constant 4 : i32
      %86 = arith.muli %85, %c4_i32_72 : i32
      %87 = tpu.assume_multiple %86, 4 : i32
      %cst_73 = arith.constant 0.000000e+00 : f32
      %88 = vector.broadcast %cst_73 : f32 to vector<4x16x128xf32>
      %c0_i32_74 = arith.constant 0 : i32
      %89 = arith.addi %87, %c0_i32_74 : i32
      %90 = arith.index_cast %89 : i32 to index
      %c0_75 = arith.constant 0 : index
      %c0_76 = arith.constant 0 : index
      %91 = vector.load %arg11[%90, %c0_75, %c0_76] : memref<22x24x128xf32, #tpu.memory_space<vmem>>, vector<4x16x128xf32>
      %92 = vector.extract_strided_slice %40 {offsets = [0, 0, 0], sizes = [1, 1, 128], strides = [1, 1, 1]} : vector<7x7x128xf32> to vector<1x1x128xf32>
      %93 = vector.broadcast %92 : vector<1x1x128xf32> to vector<4x16x128xf32>
      %94 = arith.mulf %91, %93 : vector<4x16x128xf32>
      %95 = arith.addf %88, %94 : vector<4x16x128xf32>
      %c0_i32_77 = arith.constant 0 : i32
      %96 = arith.addi %87, %c0_i32_77 : i32
      %97 = arith.index_cast %96 : i32 to index
      %c1 = arith.constant 1 : index
      %c0_78 = arith.constant 0 : index
      %98 = vector.load %arg11[%97, %c1, %c0_78] : memref<22x24x128xf32, #tpu.memory_space<vmem>>, vector<4x16x128xf32>
      %99 = vector.extract_strided_slice %40 {offsets = [0, 1, 0], sizes = [1, 1, 128], strides = [1, 1, 1]} : vector<7x7x128xf32> to vector<1x1x128xf32>
      %100 = vector.broadcast %99 : vector<1x1x128xf32> to vector<4x16x128xf32>
      %101 = arith.mulf %98, %100 : vector<4x16x128xf32>
      %102 = arith.addf %95, %101 : vector<4x16x128xf32>
      %c0_i32_79 = arith.constant 0 : i32
      %103 = arith.addi %87, %c0_i32_79 : i32
      %104 = arith.index_cast %103 : i32 to index
      %c2 = arith.constant 2 : index
      %c0_80 = arith.constant 0 : index
      %105 = vector.load %arg11[%104, %c2, %c0_80] : memref<22x24x128xf32, #tpu.memory_space<vmem>>, vector<4x16x128xf32>
      %106 = vector.extract_strided_slice %40 {offsets = [0, 2, 0], sizes = [1, 1, 128], strides = [1, 1, 1]} : vector<7x7x128xf32> to vector<1x1x128xf32>
      %107 = vector.broadcast %106 : vector<1x1x128xf32> to vector<4x16x128xf32>
      %108 = arith.mulf %105, %107 : vector<4x16x128xf32>
      %109 = arith.addf %102, %108 : vector<4x16x128xf32>
      %c0_i32_81 = arith.constant 0 : i32
      %110 = arith.addi %87, %c0_i32_81 : i32
      %111 = arith.index_cast %110 : i32 to index
      %c3_82 = arith.constant 3 : index
      %c0_83 = arith.constant 0 : index
      %112 = vector.load %arg11[%111, %c3_82, %c0_83] : memref<22x24x128xf32, #tpu.memory_space<vmem>>, vector<4x16x128xf32>
      %113 = vector.extract_strided_slice %40 {offsets = [0, 3, 0], sizes = [1, 1, 128], strides = [1, 1, 1]} : vector<7x7x128xf32> to vector<1x1x128xf32>
      %114 = vector.broadcast %113 : vector<1x1x128xf32> to vector<4x16x128xf32>
      %115 = arith.mulf %112, %114 : vector<4x16x128xf32>
      %116 = arith.addf %109, %115 : vector<4x16x128xf32>
      %c0_i32_84 = arith.constant 0 : i32
      %117 = arith.addi %87, %c0_i32_84 : i32
      %118 = arith.index_cast %117 : i32 to index
      %c4 = arith.constant 4 : index
      %c0_85 = arith.constant 0 : index
      %119 = vector.load %arg11[%118, %c4, %c0_85] : memref<22x24x128xf32, #tpu.memory_space<vmem>>, vector<4x16x128xf32>
      %120 = vector.extract_strided_slice %40 {offsets = [0, 4, 0], sizes = [1, 1, 128], strides = [1, 1, 1]} : vector<7x7x128xf32> to vector<1x1x128xf32>
      %121 = vector.broadcast %120 : vector<1x1x128xf32> to vector<4x16x128xf32>
      %122 = arith.mulf %119, %121 : vector<4x16x128xf32>
      %123 = arith.addf %116, %122 : vector<4x16x128xf32>
      %c0_i32_86 = arith.constant 0 : i32
      %124 = arith.addi %87, %c0_i32_86 : i32
      %125 = arith.index_cast %124 : i32 to index
      %c5 = arith.constant 5 : index
      %c0_87 = arith.constant 0 : index
      %126 = vector.load %arg11[%125, %c5, %c0_87] : memref<22x24x128xf32, #tpu.memory_space<vmem>>, vector<4x16x128xf32>
      %127 = vector.extract_strided_slice %40 {offsets = [0, 5, 0], sizes = [1, 1, 128], strides = [1, 1, 1]} : vector<7x7x128xf32> to vector<1x1x128xf32>
      %128 = vector.broadcast %127 : vector<1x1x128xf32> to vector<4x16x128xf32>
      %129 = arith.mulf %126, %128 : vector<4x16x128xf32>
      %130 = arith.addf %123, %129 : vector<4x16x128xf32>
      %c0_i32_88 = arith.constant 0 : i32
      %131 = arith.addi %87, %c0_i32_88 : i32
      %132 = arith.index_cast %131 : i32 to index
      %c6 = arith.constant 6 : index
      %c0_89 = arith.constant 0 : index
      %133 = vector.load %arg11[%132, %c6, %c0_89] : memref<22x24x128xf32, #tpu.memory_space<vmem>>, vector<4x16x128xf32>
      %134 = vector.extract_strided_slice %40 {offsets = [0, 6, 0], sizes = [1, 1, 128], strides = [1, 1, 1]} : vector<7x7x128xf32> to vector<1x1x128xf32>
      %135 = vector.broadcast %134 : vector<1x1x128xf32> to vector<4x16x128xf32>
      %136 = arith.mulf %133, %135 : vector<4x16x128xf32>
      %137 = arith.addf %130, %136 : vector<4x16x128xf32>
      %c1_i32_90 = arith.constant 1 : i32
      %138 = arith.addi %87, %c1_i32_90 : i32
      %139 = arith.index_cast %138 : i32 to index
      %c0_91 = arith.constant 0 : index
      %c0_92 = arith.constant 0 : index
      %140 = vector.load %arg11[%139, %c0_91, %c0_92] : memref<22x24x128xf32, #tpu.memory_space<vmem>>, vector<4x16x128xf32>
      %141 = vector.extract_strided_slice %40 {offsets = [1, 0, 0], sizes = [1, 1, 128], strides = [1, 1, 1]} : vector<7x7x128xf32> to vector<1x1x128xf32>
      %142 = vector.broadcast %141 : vector<1x1x128xf32> to vector<4x16x128xf32>
      %143 = arith.mulf %140, %142 : vector<4x16x128xf32>
      %144 = arith.addf %137, %143 : vector<4x16x128xf32>
      %c1_i32_93 = arith.constant 1 : i32
      %145 = arith.addi %87, %c1_i32_93 : i32
      %146 = arith.index_cast %145 : i32 to index
      %c1_94 = arith.constant 1 : index
      %c0_95 = arith.constant 0 : index
      %147 = vector.load %arg11[%146, %c1_94, %c0_95] : memref<22x24x128xf32, #tpu.memory_space<vmem>>, vector<4x16x128xf32>
      %148 = vector.extract_strided_slice %40 {offsets = [1, 1, 0], sizes = [1, 1, 128], strides = [1, 1, 1]} : vector<7x7x128xf32> to vector<1x1x128xf32>
      %149 = vector.broadcast %148 : vector<1x1x128xf32> to vector<4x16x128xf32>
      %150 = arith.mulf %147, %149 : vector<4x16x128xf32>
      %151 = arith.addf %144, %150 : vector<4x16x128xf32>
      %c1_i32_96 = arith.constant 1 : i32
      %152 = arith.addi %87, %c1_i32_96 : i32
      %153 = arith.index_cast %152 : i32 to index
      %c2_97 = arith.constant 2 : index
      %c0_98 = arith.constant 0 : index
      %154 = vector.load %arg11[%153, %c2_97, %c0_98] : memref<22x24x128xf32, #tpu.memory_space<vmem>>, vector<4x16x128xf32>
      %155 = vector.extract_strided_slice %40 {offsets = [1, 2, 0], sizes = [1, 1, 128], strides = [1, 1, 1]} : vector<7x7x128xf32> to vector<1x1x128xf32>
      %156 = vector.broadcast %155 : vector<1x1x128xf32> to vector<4x16x128xf32>
      %157 = arith.mulf %154, %156 : vector<4x16x128xf32>
      %158 = arith.addf %151, %157 : vector<4x16x128xf32>
      %c1_i32_99 = arith.constant 1 : i32
      %159 = arith.addi %87, %c1_i32_99 : i32
      %160 = arith.index_cast %159 : i32 to index
      %c3_100 = arith.constant 3 : index
      %c0_101 = arith.constant 0 : index
      %161 = vector.load %arg11[%160, %c3_100, %c0_101] : memref<22x24x128xf32, #tpu.memory_space<vmem>>, vector<4x16x128xf32>
      %162 = vector.extract_strided_slice %40 {offsets = [1, 3, 0], sizes = [1, 1, 128], strides = [1, 1, 1]} : vector<7x7x128xf32> to vector<1x1x128xf32>
      %163 = vector.broadcast %162 : vector<1x1x128xf32> to vector<4x16x128xf32>
      %164 = arith.mulf %161, %163 : vector<4x16x128xf32>
      %165 = arith.addf %158, %164 : vector<4x16x128xf32>
      %c1_i32_102 = arith.constant 1 : i32
      %166 = arith.addi %87, %c1_i32_102 : i32
      %167 = arith.index_cast %166 : i32 to index
      %c4_103 = arith.constant 4 : index
      %c0_104 = arith.constant 0 : index
      %168 = vector.load %arg11[%167, %c4_103, %c0_104] : memref<22x24x128xf32, #tpu.memory_space<vmem>>, vector<4x16x128xf32>
      %169 = vector.extract_strided_slice %40 {offsets = [1, 4, 0], sizes = [1, 1, 128], strides = [1, 1, 1]} : vector<7x7x128xf32> to vector<1x1x128xf32>
      %170 = vector.broadcast %169 : vector<1x1x128xf32> to vector<4x16x128xf32>
      %171 = arith.mulf %168, %170 : vector<4x16x128xf32>
      %172 = arith.addf %165, %171 : vector<4x16x128xf32>
      %c1_i32_105 = arith.constant 1 : i32
      %173 = arith.addi %87, %c1_i32_105 : i32
      %174 = arith.index_cast %173 : i32 to index
      %c5_106 = arith.constant 5 : index
      %c0_107 = arith.constant 0 : index
      %175 = vector.load %arg11[%174, %c5_106, %c0_107] : memref<22x24x128xf32, #tpu.memory_space<vmem>>, vector<4x16x128xf32>
      %176 = vector.extract_strided_slice %40 {offsets = [1, 5, 0], sizes = [1, 1, 128], strides = [1, 1, 1]} : vector<7x7x128xf32> to vector<1x1x128xf32>
      %177 = vector.broadcast %176 : vector<1x1x128xf32> to vector<4x16x128xf32>
      %178 = arith.mulf %175, %177 : vector<4x16x128xf32>
      %179 = arith.addf %172, %178 : vector<4x16x128xf32>
      %c1_i32_108 = arith.constant 1 : i32
      %180 = arith.addi %87, %c1_i32_108 : i32
      %181 = arith.index_cast %180 : i32 to index
      %c6_109 = arith.constant 6 : index
      %c0_110 = arith.constant 0 : index
      %182 = vector.load %arg11[%181, %c6_109, %c0_110] : memref<22x24x128xf32, #tpu.memory_space<vmem>>, vector<4x16x128xf32>
      %183 = vector.extract_strided_slice %40 {offsets = [1, 6, 0], sizes = [1, 1, 128], strides = [1, 1, 1]} : vector<7x7x128xf32> to vector<1x1x128xf32>
      %184 = vector.broadcast %183 : vector<1x1x128xf32> to vector<4x16x128xf32>
      %185 = arith.mulf %182, %184 : vector<4x16x128xf32>
      %186 = arith.addf %179, %185 : vector<4x16x128xf32>
      %c2_i32 = arith.constant 2 : i32
      %187 = arith.addi %87, %c2_i32 : i32
      %188 = arith.index_cast %187 : i32 to index
      %c0_111 = arith.constant 0 : index
      %c0_112 = arith.constant 0 : index
      %189 = vector.load %arg11[%188, %c0_111, %c0_112] : memref<22x24x128xf32, #tpu.memory_space<vmem>>, vector<4x16x128xf32>
      %190 = vector.extract_strided_slice %40 {offsets = [2, 0, 0], sizes = [1, 1, 128], strides = [1, 1, 1]} : vector<7x7x128xf32> to vector<1x1x128xf32>
      %191 = vector.broadcast %190 : vector<1x1x128xf32> to vector<4x16x128xf32>
      %192 = arith.mulf %189, %191 : vector<4x16x128xf32>
      %193 = arith.addf %186, %192 : vector<4x16x128xf32>
      %c2_i32_113 = arith.constant 2 : i32
      %194 = arith.addi %87, %c2_i32_113 : i32
      %195 = arith.index_cast %194 : i32 to index
      %c1_114 = arith.constant 1 : index
      %c0_115 = arith.constant 0 : index
      %196 = vector.load %arg11[%195, %c1_114, %c0_115] : memref<22x24x128xf32, #tpu.memory_space<vmem>>, vector<4x16x128xf32>
      %197 = vector.extract_strided_slice %40 {offsets = [2, 1, 0], sizes = [1, 1, 128], strides = [1, 1, 1]} : vector<7x7x128xf32> to vector<1x1x128xf32>
      %198 = vector.broadcast %197 : vector<1x1x128xf32> to vector<4x16x128xf32>
      %199 = arith.mulf %196, %198 : vector<4x16x128xf32>
      %200 = arith.addf %193, %199 : vector<4x16x128xf32>
      %c2_i32_116 = arith.constant 2 : i32
      %201 = arith.addi %87, %c2_i32_116 : i32
      %202 = arith.index_cast %201 : i32 to index
      %c2_117 = arith.constant 2 : index
      %c0_118 = arith.constant 0 : index
      %203 = vector.load %arg11[%202, %c2_117, %c0_118] : memref<22x24x128xf32, #tpu.memory_space<vmem>>, vector<4x16x128xf32>
      %204 = vector.extract_strided_slice %40 {offsets = [2, 2, 0], sizes = [1, 1, 128], strides = [1, 1, 1]} : vector<7x7x128xf32> to vector<1x1x128xf32>
      %205 = vector.broadcast %204 : vector<1x1x128xf32> to vector<4x16x128xf32>
      %206 = arith.mulf %203, %205 : vector<4x16x128xf32>
      %207 = arith.addf %200, %206 : vector<4x16x128xf32>
      %c2_i32_119 = arith.constant 2 : i32
      %208 = arith.addi %87, %c2_i32_119 : i32
      %209 = arith.index_cast %208 : i32 to index
      %c3_120 = arith.constant 3 : index
      %c0_121 = arith.constant 0 : index
      %210 = vector.load %arg11[%209, %c3_120, %c0_121] : memref<22x24x128xf32, #tpu.memory_space<vmem>>, vector<4x16x128xf32>
      %211 = vector.extract_strided_slice %40 {offsets = [2, 3, 0], sizes = [1, 1, 128], strides = [1, 1, 1]} : vector<7x7x128xf32> to vector<1x1x128xf32>
      %212 = vector.broadcast %211 : vector<1x1x128xf32> to vector<4x16x128xf32>
      %213 = arith.mulf %210, %212 : vector<4x16x128xf32>
      %214 = arith.addf %207, %213 : vector<4x16x128xf32>
      %c2_i32_122 = arith.constant 2 : i32
      %215 = arith.addi %87, %c2_i32_122 : i32
      %216 = arith.index_cast %215 : i32 to index
      %c4_123 = arith.constant 4 : index
      %c0_124 = arith.constant 0 : index
      %217 = vector.load %arg11[%216, %c4_123, %c0_124] : memref<22x24x128xf32, #tpu.memory_space<vmem>>, vector<4x16x128xf32>
      %218 = vector.extract_strided_slice %40 {offsets = [2, 4, 0], sizes = [1, 1, 128], strides = [1, 1, 1]} : vector<7x7x128xf32> to vector<1x1x128xf32>
      %219 = vector.broadcast %218 : vector<1x1x128xf32> to vector<4x16x128xf32>
      %220 = arith.mulf %217, %219 : vector<4x16x128xf32>
      %221 = arith.addf %214, %220 : vector<4x16x128xf32>
      %c2_i32_125 = arith.constant 2 : i32
      %222 = arith.addi %87, %c2_i32_125 : i32
      %223 = arith.index_cast %222 : i32 to index
      %c5_126 = arith.constant 5 : index
      %c0_127 = arith.constant 0 : index
      %224 = vector.load %arg11[%223, %c5_126, %c0_127] : memref<22x24x128xf32, #tpu.memory_space<vmem>>, vector<4x16x128xf32>
      %225 = vector.extract_strided_slice %40 {offsets = [2, 5, 0], sizes = [1, 1, 128], strides = [1, 1, 1]} : vector<7x7x128xf32> to vector<1x1x128xf32>
      %226 = vector.broadcast %225 : vector<1x1x128xf32> to vector<4x16x128xf32>
      %227 = arith.mulf %224, %226 : vector<4x16x128xf32>
      %228 = arith.addf %221, %227 : vector<4x16x128xf32>
      %c2_i32_128 = arith.constant 2 : i32
      %229 = arith.addi %87, %c2_i32_128 : i32
      %230 = arith.index_cast %229 : i32 to index
      %c6_129 = arith.constant 6 : index
      %c0_130 = arith.constant 0 : index
      %231 = vector.load %arg11[%230, %c6_129, %c0_130] : memref<22x24x128xf32, #tpu.memory_space<vmem>>, vector<4x16x128xf32>
      %232 = vector.extract_strided_slice %40 {offsets = [2, 6, 0], sizes = [1, 1, 128], strides = [1, 1, 1]} : vector<7x7x128xf32> to vector<1x1x128xf32>
      %233 = vector.broadcast %232 : vector<1x1x128xf32> to vector<4x16x128xf32>
      %234 = arith.mulf %231, %233 : vector<4x16x128xf32>
      %235 = arith.addf %228, %234 : vector<4x16x128xf32>
      %c3_i32 = arith.constant 3 : i32
      %236 = arith.addi %87, %c3_i32 : i32
      %237 = arith.index_cast %236 : i32 to index
      %c0_131 = arith.constant 0 : index
      %c0_132 = arith.constant 0 : index
      %238 = vector.load %arg11[%237, %c0_131, %c0_132] : memref<22x24x128xf32, #tpu.memory_space<vmem>>, vector<4x16x128xf32>
      %239 = vector.extract_strided_slice %40 {offsets = [3, 0, 0], sizes = [1, 1, 128], strides = [1, 1, 1]} : vector<7x7x128xf32> to vector<1x1x128xf32>
      %240 = vector.broadcast %239 : vector<1x1x128xf32> to vector<4x16x128xf32>
      %241 = arith.mulf %238, %240 : vector<4x16x128xf32>
      %242 = arith.addf %235, %241 : vector<4x16x128xf32>
      %c3_i32_133 = arith.constant 3 : i32
      %243 = arith.addi %87, %c3_i32_133 : i32
      %244 = arith.index_cast %243 : i32 to index
      %c1_134 = arith.constant 1 : index
      %c0_135 = arith.constant 0 : index
      %245 = vector.load %arg11[%244, %c1_134, %c0_135] : memref<22x24x128xf32, #tpu.memory_space<vmem>>, vector<4x16x128xf32>
      %246 = vector.extract_strided_slice %40 {offsets = [3, 1, 0], sizes = [1, 1, 128], strides = [1, 1, 1]} : vector<7x7x128xf32> to vector<1x1x128xf32>
      %247 = vector.broadcast %246 : vector<1x1x128xf32> to vector<4x16x128xf32>
      %248 = arith.mulf %245, %247 : vector<4x16x128xf32>
      %249 = arith.addf %242, %248 : vector<4x16x128xf32>
      %c3_i32_136 = arith.constant 3 : i32
      %250 = arith.addi %87, %c3_i32_136 : i32
      %251 = arith.index_cast %250 : i32 to index
      %c2_137 = arith.constant 2 : index
      %c0_138 = arith.constant 0 : index
      %252 = vector.load %arg11[%251, %c2_137, %c0_138] : memref<22x24x128xf32, #tpu.memory_space<vmem>>, vector<4x16x128xf32>
      %253 = vector.extract_strided_slice %40 {offsets = [3, 2, 0], sizes = [1, 1, 128], strides = [1, 1, 1]} : vector<7x7x128xf32> to vector<1x1x128xf32>
      %254 = vector.broadcast %253 : vector<1x1x128xf32> to vector<4x16x128xf32>
      %255 = arith.mulf %252, %254 : vector<4x16x128xf32>
      %256 = arith.addf %249, %255 : vector<4x16x128xf32>
      %c3_i32_139 = arith.constant 3 : i32
      %257 = arith.addi %87, %c3_i32_139 : i32
      %258 = arith.index_cast %257 : i32 to index
      %c3_140 = arith.constant 3 : index
      %c0_141 = arith.constant 0 : index
      %259 = vector.load %arg11[%258, %c3_140, %c0_141] : memref<22x24x128xf32, #tpu.memory_space<vmem>>, vector<4x16x128xf32>
      %260 = vector.extract_strided_slice %40 {offsets = [3, 3, 0], sizes = [1, 1, 128], strides = [1, 1, 1]} : vector<7x7x128xf32> to vector<1x1x128xf32>
      %261 = vector.broadcast %260 : vector<1x1x128xf32> to vector<4x16x128xf32>
      %262 = arith.mulf %259, %261 : vector<4x16x128xf32>
      %263 = arith.addf %256, %262 : vector<4x16x128xf32>
      %c3_i32_142 = arith.constant 3 : i32
      %264 = arith.addi %87, %c3_i32_142 : i32
      %265 = arith.index_cast %264 : i32 to index
      %c4_143 = arith.constant 4 : index
      %c0_144 = arith.constant 0 : index
      %266 = vector.load %arg11[%265, %c4_143, %c0_144] : memref<22x24x128xf32, #tpu.memory_space<vmem>>, vector<4x16x128xf32>
      %267 = vector.extract_strided_slice %40 {offsets = [3, 4, 0], sizes = [1, 1, 128], strides = [1, 1, 1]} : vector<7x7x128xf32> to vector<1x1x128xf32>
      %268 = vector.broadcast %267 : vector<1x1x128xf32> to vector<4x16x128xf32>
      %269 = arith.mulf %266, %268 : vector<4x16x128xf32>
      %270 = arith.addf %263, %269 : vector<4x16x128xf32>
      %c3_i32_145 = arith.constant 3 : i32
      %271 = arith.addi %87, %c3_i32_145 : i32
      %272 = arith.index_cast %271 : i32 to index
      %c5_146 = arith.constant 5 : index
      %c0_147 = arith.constant 0 : index
      %273 = vector.load %arg11[%272, %c5_146, %c0_147] : memref<22x24x128xf32, #tpu.memory_space<vmem>>, vector<4x16x128xf32>
      %274 = vector.extract_strided_slice %40 {offsets = [3, 5, 0], sizes = [1, 1, 128], strides = [1, 1, 1]} : vector<7x7x128xf32> to vector<1x1x128xf32>
      %275 = vector.broadcast %274 : vector<1x1x128xf32> to vector<4x16x128xf32>
      %276 = arith.mulf %273, %275 : vector<4x16x128xf32>
      %277 = arith.addf %270, %276 : vector<4x16x128xf32>
      %c3_i32_148 = arith.constant 3 : i32
      %278 = arith.addi %87, %c3_i32_148 : i32
      %279 = arith.index_cast %278 : i32 to index
      %c6_149 = arith.constant 6 : index
      %c0_150 = arith.constant 0 : index
      %280 = vector.load %arg11[%279, %c6_149, %c0_150] : memref<22x24x128xf32, #tpu.memory_space<vmem>>, vector<4x16x128xf32>
      %281 = vector.extract_strided_slice %40 {offsets = [3, 6, 0], sizes = [1, 1, 128], strides = [1, 1, 1]} : vector<7x7x128xf32> to vector<1x1x128xf32>
      %282 = vector.broadcast %281 : vector<1x1x128xf32> to vector<4x16x128xf32>
      %283 = arith.mulf %280, %282 : vector<4x16x128xf32>
      %284 = arith.addf %277, %283 : vector<4x16x128xf32>
      %c4_i32_151 = arith.constant 4 : i32
      %285 = arith.addi %87, %c4_i32_151 : i32
      %286 = arith.index_cast %285 : i32 to index
      %c0_152 = arith.constant 0 : index
      %c0_153 = arith.constant 0 : index
      %287 = vector.load %arg11[%286, %c0_152, %c0_153] : memref<22x24x128xf32, #tpu.memory_space<vmem>>, vector<4x16x128xf32>
      %288 = vector.extract_strided_slice %40 {offsets = [4, 0, 0], sizes = [1, 1, 128], strides = [1, 1, 1]} : vector<7x7x128xf32> to vector<1x1x128xf32>
      %289 = vector.broadcast %288 : vector<1x1x128xf32> to vector<4x16x128xf32>
      %290 = arith.mulf %287, %289 : vector<4x16x128xf32>
      %291 = arith.addf %284, %290 : vector<4x16x128xf32>
      %c4_i32_154 = arith.constant 4 : i32
      %292 = arith.addi %87, %c4_i32_154 : i32
      %293 = arith.index_cast %292 : i32 to index
      %c1_155 = arith.constant 1 : index
      %c0_156 = arith.constant 0 : index
      %294 = vector.load %arg11[%293, %c1_155, %c0_156] : memref<22x24x128xf32, #tpu.memory_space<vmem>>, vector<4x16x128xf32>
      %295 = vector.extract_strided_slice %40 {offsets = [4, 1, 0], sizes = [1, 1, 128], strides = [1, 1, 1]} : vector<7x7x128xf32> to vector<1x1x128xf32>
      %296 = vector.broadcast %295 : vector<1x1x128xf32> to vector<4x16x128xf32>
      %297 = arith.mulf %294, %296 : vector<4x16x128xf32>
      %298 = arith.addf %291, %297 : vector<4x16x128xf32>
      %c4_i32_157 = arith.constant 4 : i32
      %299 = arith.addi %87, %c4_i32_157 : i32
      %300 = arith.index_cast %299 : i32 to index
      %c2_158 = arith.constant 2 : index
      %c0_159 = arith.constant 0 : index
      %301 = vector.load %arg11[%300, %c2_158, %c0_159] : memref<22x24x128xf32, #tpu.memory_space<vmem>>, vector<4x16x128xf32>
      %302 = vector.extract_strided_slice %40 {offsets = [4, 2, 0], sizes = [1, 1, 128], strides = [1, 1, 1]} : vector<7x7x128xf32> to vector<1x1x128xf32>
      %303 = vector.broadcast %302 : vector<1x1x128xf32> to vector<4x16x128xf32>
      %304 = arith.mulf %301, %303 : vector<4x16x128xf32>
      %305 = arith.addf %298, %304 : vector<4x16x128xf32>
      %c4_i32_160 = arith.constant 4 : i32
      %306 = arith.addi %87, %c4_i32_160 : i32
      %307 = arith.index_cast %306 : i32 to index
      %c3_161 = arith.constant 3 : index
      %c0_162 = arith.constant 0 : index
      %308 = vector.load %arg11[%307, %c3_161, %c0_162] : memref<22x24x128xf32, #tpu.memory_space<vmem>>, vector<4x16x128xf32>
      %309 = vector.extract_strided_slice %40 {offsets = [4, 3, 0], sizes = [1, 1, 128], strides = [1, 1, 1]} : vector<7x7x128xf32> to vector<1x1x128xf32>
      %310 = vector.broadcast %309 : vector<1x1x128xf32> to vector<4x16x128xf32>
      %311 = arith.mulf %308, %310 : vector<4x16x128xf32>
      %312 = arith.addf %305, %311 : vector<4x16x128xf32>
      %c4_i32_163 = arith.constant 4 : i32
      %313 = arith.addi %87, %c4_i32_163 : i32
      %314 = arith.index_cast %313 : i32 to index
      %c4_164 = arith.constant 4 : index
      %c0_165 = arith.constant 0 : index
      %315 = vector.load %arg11[%314, %c4_164, %c0_165] : memref<22x24x128xf32, #tpu.memory_space<vmem>>, vector<4x16x128xf32>
      %316 = vector.extract_strided_slice %40 {offsets = [4, 4, 0], sizes = [1, 1, 128], strides = [1, 1, 1]} : vector<7x7x128xf32> to vector<1x1x128xf32>
      %317 = vector.broadcast %316 : vector<1x1x128xf32> to vector<4x16x128xf32>
      %318 = arith.mulf %315, %317 : vector<4x16x128xf32>
      %319 = arith.addf %312, %318 : vector<4x16x128xf32>
      %c4_i32_166 = arith.constant 4 : i32
      %320 = arith.addi %87, %c4_i32_166 : i32
      %321 = arith.index_cast %320 : i32 to index
      %c5_167 = arith.constant 5 : index
      %c0_168 = arith.constant 0 : index
      %322 = vector.load %arg11[%321, %c5_167, %c0_168] : memref<22x24x128xf32, #tpu.memory_space<vmem>>, vector<4x16x128xf32>
      %323 = vector.extract_strided_slice %40 {offsets = [4, 5, 0], sizes = [1, 1, 128], strides = [1, 1, 1]} : vector<7x7x128xf32> to vector<1x1x128xf32>
      %324 = vector.broadcast %323 : vector<1x1x128xf32> to vector<4x16x128xf32>
      %325 = arith.mulf %322, %324 : vector<4x16x128xf32>
      %326 = arith.addf %319, %325 : vector<4x16x128xf32>
      %c4_i32_169 = arith.constant 4 : i32
      %327 = arith.addi %87, %c4_i32_169 : i32
      %328 = arith.index_cast %327 : i32 to index
      %c6_170 = arith.constant 6 : index
      %c0_171 = arith.constant 0 : index
      %329 = vector.load %arg11[%328, %c6_170, %c0_171] : memref<22x24x128xf32, #tpu.memory_space<vmem>>, vector<4x16x128xf32>
      %330 = vector.extract_strided_slice %40 {offsets = [4, 6, 0], sizes = [1, 1, 128], strides = [1, 1, 1]} : vector<7x7x128xf32> to vector<1x1x128xf32>
      %331 = vector.broadcast %330 : vector<1x1x128xf32> to vector<4x16x128xf32>
      %332 = arith.mulf %329, %331 : vector<4x16x128xf32>
      %333 = arith.addf %326, %332 : vector<4x16x128xf32>
      %c5_i32 = arith.constant 5 : i32
      %334 = arith.addi %87, %c5_i32 : i32
      %335 = arith.index_cast %334 : i32 to index
      %c0_172 = arith.constant 0 : index
      %c0_173 = arith.constant 0 : index
      %336 = vector.load %arg11[%335, %c0_172, %c0_173] : memref<22x24x128xf32, #tpu.memory_space<vmem>>, vector<4x16x128xf32>
      %337 = vector.extract_strided_slice %40 {offsets = [5, 0, 0], sizes = [1, 1, 128], strides = [1, 1, 1]} : vector<7x7x128xf32> to vector<1x1x128xf32>
      %338 = vector.broadcast %337 : vector<1x1x128xf32> to vector<4x16x128xf32>
      %339 = arith.mulf %336, %338 : vector<4x16x128xf32>
      %340 = arith.addf %333, %339 : vector<4x16x128xf32>
      %c5_i32_174 = arith.constant 5 : i32
      %341 = arith.addi %87, %c5_i32_174 : i32
      %342 = arith.index_cast %341 : i32 to index
      %c1_175 = arith.constant 1 : index
      %c0_176 = arith.constant 0 : index
      %343 = vector.load %arg11[%342, %c1_175, %c0_176] : memref<22x24x128xf32, #tpu.memory_space<vmem>>, vector<4x16x128xf32>
      %344 = vector.extract_strided_slice %40 {offsets = [5, 1, 0], sizes = [1, 1, 128], strides = [1, 1, 1]} : vector<7x7x128xf32> to vector<1x1x128xf32>
      %345 = vector.broadcast %344 : vector<1x1x128xf32> to vector<4x16x128xf32>
      %346 = arith.mulf %343, %345 : vector<4x16x128xf32>
      %347 = arith.addf %340, %346 : vector<4x16x128xf32>
      %c5_i32_177 = arith.constant 5 : i32
      %348 = arith.addi %87, %c5_i32_177 : i32
      %349 = arith.index_cast %348 : i32 to index
      %c2_178 = arith.constant 2 : index
      %c0_179 = arith.constant 0 : index
      %350 = vector.load %arg11[%349, %c2_178, %c0_179] : memref<22x24x128xf32, #tpu.memory_space<vmem>>, vector<4x16x128xf32>
      %351 = vector.extract_strided_slice %40 {offsets = [5, 2, 0], sizes = [1, 1, 128], strides = [1, 1, 1]} : vector<7x7x128xf32> to vector<1x1x128xf32>
      %352 = vector.broadcast %351 : vector<1x1x128xf32> to vector<4x16x128xf32>
      %353 = arith.mulf %350, %352 : vector<4x16x128xf32>
      %354 = arith.addf %347, %353 : vector<4x16x128xf32>
      %c5_i32_180 = arith.constant 5 : i32
      %355 = arith.addi %87, %c5_i32_180 : i32
      %356 = arith.index_cast %355 : i32 to index
      %c3_181 = arith.constant 3 : index
      %c0_182 = arith.constant 0 : index
      %357 = vector.load %arg11[%356, %c3_181, %c0_182] : memref<22x24x128xf32, #tpu.memory_space<vmem>>, vector<4x16x128xf32>
      %358 = vector.extract_strided_slice %40 {offsets = [5, 3, 0], sizes = [1, 1, 128], strides = [1, 1, 1]} : vector<7x7x128xf32> to vector<1x1x128xf32>
      %359 = vector.broadcast %358 : vector<1x1x128xf32> to vector<4x16x128xf32>
      %360 = arith.mulf %357, %359 : vector<4x16x128xf32>
      %361 = arith.addf %354, %360 : vector<4x16x128xf32>
      %c5_i32_183 = arith.constant 5 : i32
      %362 = arith.addi %87, %c5_i32_183 : i32
      %363 = arith.index_cast %362 : i32 to index
      %c4_184 = arith.constant 4 : index
      %c0_185 = arith.constant 0 : index
      %364 = vector.load %arg11[%363, %c4_184, %c0_185] : memref<22x24x128xf32, #tpu.memory_space<vmem>>, vector<4x16x128xf32>
      %365 = vector.extract_strided_slice %40 {offsets = [5, 4, 0], sizes = [1, 1, 128], strides = [1, 1, 1]} : vector<7x7x128xf32> to vector<1x1x128xf32>
      %366 = vector.broadcast %365 : vector<1x1x128xf32> to vector<4x16x128xf32>
      %367 = arith.mulf %364, %366 : vector<4x16x128xf32>
      %368 = arith.addf %361, %367 : vector<4x16x128xf32>
      %c5_i32_186 = arith.constant 5 : i32
      %369 = arith.addi %87, %c5_i32_186 : i32
      %370 = arith.index_cast %369 : i32 to index
      %c5_187 = arith.constant 5 : index
      %c0_188 = arith.constant 0 : index
      %371 = vector.load %arg11[%370, %c5_187, %c0_188] : memref<22x24x128xf32, #tpu.memory_space<vmem>>, vector<4x16x128xf32>
      %372 = vector.extract_strided_slice %40 {offsets = [5, 5, 0], sizes = [1, 1, 128], strides = [1, 1, 1]} : vector<7x7x128xf32> to vector<1x1x128xf32>
      %373 = vector.broadcast %372 : vector<1x1x128xf32> to vector<4x16x128xf32>
      %374 = arith.mulf %371, %373 : vector<4x16x128xf32>
      %375 = arith.addf %368, %374 : vector<4x16x128xf32>
      %c5_i32_189 = arith.constant 5 : i32
      %376 = arith.addi %87, %c5_i32_189 : i32
      %377 = arith.index_cast %376 : i32 to index
      %c6_190 = arith.constant 6 : index
      %c0_191 = arith.constant 0 : index
      %378 = vector.load %arg11[%377, %c6_190, %c0_191] : memref<22x24x128xf32, #tpu.memory_space<vmem>>, vector<4x16x128xf32>
      %379 = vector.extract_strided_slice %40 {offsets = [5, 6, 0], sizes = [1, 1, 128], strides = [1, 1, 1]} : vector<7x7x128xf32> to vector<1x1x128xf32>
      %380 = vector.broadcast %379 : vector<1x1x128xf32> to vector<4x16x128xf32>
      %381 = arith.mulf %378, %380 : vector<4x16x128xf32>
      %382 = arith.addf %375, %381 : vector<4x16x128xf32>
      %c6_i32 = arith.constant 6 : i32
      %383 = arith.addi %87, %c6_i32 : i32
      %384 = arith.index_cast %383 : i32 to index
      %c0_192 = arith.constant 0 : index
      %c0_193 = arith.constant 0 : index
      %385 = vector.load %arg11[%384, %c0_192, %c0_193] : memref<22x24x128xf32, #tpu.memory_space<vmem>>, vector<4x16x128xf32>
      %386 = vector.extract_strided_slice %40 {offsets = [6, 0, 0], sizes = [1, 1, 128], strides = [1, 1, 1]} : vector<7x7x128xf32> to vector<1x1x128xf32>
      %387 = vector.broadcast %386 : vector<1x1x128xf32> to vector<4x16x128xf32>
      %388 = arith.mulf %385, %387 : vector<4x16x128xf32>
      %389 = arith.addf %382, %388 : vector<4x16x128xf32>
      %c6_i32_194 = arith.constant 6 : i32
      %390 = arith.addi %87, %c6_i32_194 : i32
      %391 = arith.index_cast %390 : i32 to index
      %c1_195 = arith.constant 1 : index
      %c0_196 = arith.constant 0 : index
      %392 = vector.load %arg11[%391, %c1_195, %c0_196] : memref<22x24x128xf32, #tpu.memory_space<vmem>>, vector<4x16x128xf32>
      %393 = vector.extract_strided_slice %40 {offsets = [6, 1, 0], sizes = [1, 1, 128], strides = [1, 1, 1]} : vector<7x7x128xf32> to vector<1x1x128xf32>
      %394 = vector.broadcast %393 : vector<1x1x128xf32> to vector<4x16x128xf32>
      %395 = arith.mulf %392, %394 : vector<4x16x128xf32>
      %396 = arith.addf %389, %395 : vector<4x16x128xf32>
      %c6_i32_197 = arith.constant 6 : i32
      %397 = arith.addi %87, %c6_i32_197 : i32
      %398 = arith.index_cast %397 : i32 to index
      %c2_198 = arith.constant 2 : index
      %c0_199 = arith.constant 0 : index
      %399 = vector.load %arg11[%398, %c2_198, %c0_199] : memref<22x24x128xf32, #tpu.memory_space<vmem>>, vector<4x16x128xf32>
      %400 = vector.extract_strided_slice %40 {offsets = [6, 2, 0], sizes = [1, 1, 128], strides = [1, 1, 1]} : vector<7x7x128xf32> to vector<1x1x128xf32>
      %401 = vector.broadcast %400 : vector<1x1x128xf32> to vector<4x16x128xf32>
      %402 = arith.mulf %399, %401 : vector<4x16x128xf32>
      %403 = arith.addf %396, %402 : vector<4x16x128xf32>
      %c6_i32_200 = arith.constant 6 : i32
      %404 = arith.addi %87, %c6_i32_200 : i32
      %405 = arith.index_cast %404 : i32 to index
      %c3_201 = arith.constant 3 : index
      %c0_202 = arith.constant 0 : index
      %406 = vector.load %arg11[%405, %c3_201, %c0_202] : memref<22x24x128xf32, #tpu.memory_space<vmem>>, vector<4x16x128xf32>
      %407 = vector.extract_strided_slice %40 {offsets = [6, 3, 0], sizes = [1, 1, 128], strides = [1, 1, 1]} : vector<7x7x128xf32> to vector<1x1x128xf32>
      %408 = vector.broadcast %407 : vector<1x1x128xf32> to vector<4x16x128xf32>
      %409 = arith.mulf %406, %408 : vector<4x16x128xf32>
      %410 = arith.addf %403, %409 : vector<4x16x128xf32>
      %c6_i32_203 = arith.constant 6 : i32
      %411 = arith.addi %87, %c6_i32_203 : i32
      %412 = arith.index_cast %411 : i32 to index
      %c4_204 = arith.constant 4 : index
      %c0_205 = arith.constant 0 : index
      %413 = vector.load %arg11[%412, %c4_204, %c0_205] : memref<22x24x128xf32, #tpu.memory_space<vmem>>, vector<4x16x128xf32>
      %414 = vector.extract_strided_slice %40 {offsets = [6, 4, 0], sizes = [1, 1, 128], strides = [1, 1, 1]} : vector<7x7x128xf32> to vector<1x1x128xf32>
      %415 = vector.broadcast %414 : vector<1x1x128xf32> to vector<4x16x128xf32>
      %416 = arith.mulf %413, %415 : vector<4x16x128xf32>
      %417 = arith.addf %410, %416 : vector<4x16x128xf32>
      %c6_i32_206 = arith.constant 6 : i32
      %418 = arith.addi %87, %c6_i32_206 : i32
      %419 = arith.index_cast %418 : i32 to index
      %c5_207 = arith.constant 5 : index
      %c0_208 = arith.constant 0 : index
      %420 = vector.load %arg11[%419, %c5_207, %c0_208] : memref<22x24x128xf32, #tpu.memory_space<vmem>>, vector<4x16x128xf32>
      %421 = vector.extract_strided_slice %40 {offsets = [6, 5, 0], sizes = [1, 1, 128], strides = [1, 1, 1]} : vector<7x7x128xf32> to vector<1x1x128xf32>
      %422 = vector.broadcast %421 : vector<1x1x128xf32> to vector<4x16x128xf32>
      %423 = arith.mulf %420, %422 : vector<4x16x128xf32>
      %424 = arith.addf %417, %423 : vector<4x16x128xf32>
      %c6_i32_209 = arith.constant 6 : i32
      %425 = arith.addi %87, %c6_i32_209 : i32
      %426 = arith.index_cast %425 : i32 to index
      %c6_210 = arith.constant 6 : index
      %c0_211 = arith.constant 0 : index
      %427 = vector.load %arg11[%426, %c6_210, %c0_211] : memref<22x24x128xf32, #tpu.memory_space<vmem>>, vector<4x16x128xf32>
      %428 = vector.extract_strided_slice %40 {offsets = [6, 6, 0], sizes = [1, 1, 128], strides = [1, 1, 1]} : vector<7x7x128xf32> to vector<1x1x128xf32>
      %429 = vector.broadcast %428 : vector<1x1x128xf32> to vector<4x16x128xf32>
      %430 = arith.mulf %427, %429 : vector<4x16x128xf32>
      %431 = arith.addf %424, %430 : vector<4x16x128xf32>
      %c3_i32_212 = arith.constant 3 : i32
      %432 = arith.addi %87, %c3_i32_212 : i32
      %433 = arith.index_cast %432 : i32 to index
      %c3_213 = arith.constant 3 : index
      %c0_214 = arith.constant 0 : index
      %434 = vector.load %arg11[%433, %c3_213, %c0_214] : memref<22x24x128xf32, #tpu.memory_space<vmem>>, vector<4x16x128xf32>
      %435 = vector.shape_cast %2 : vector<1x128xf32> to vector<1x1x128xf32>
      %436 = vector.broadcast %435 : vector<1x1x128xf32> to vector<4x16x128xf32>
      %437 = arith.addf %431, %436 : vector<4x16x128xf32>
      %438 = arith.addf %437, %434 : vector<4x16x128xf32>
      %439 = arith.index_cast %87 : i32 to index
      %c0_215 = arith.constant 0 : index
      %c0_216 = arith.constant 0 : index
      %440 = vector.load %arg12[%439, %c0_215, %c0_216] : memref<16x16x128xf32, #tpu.memory_space<vmem>>, vector<4x16x128xf32>
      tpu.vector_store %arg12[%439, %c0_215, %c0_216], %438 {strides = array<i32>} : memref<16x16x128xf32, #tpu.memory_space<vmem>>, vector<4x16x128xf32>,
    }
    %c4_i32_33 = arith.constant 4 : i32
    %c0_34 = arith.constant 0 : index
    %c0_35 = arith.constant 0 : index
    %c0_36 = arith.constant 0 : index
    %43 = vector.load %arg12[%c0_34, %c0_35, %c0_36] : memref<16x16x128xf32, #tpu.memory_space<vmem>>, vector<16x16x128xf32>
    %44 = vector.shape_cast %43 : vector<16x16x128xf32> to vector<256x128xf32>
    %c0_37 = arith.constant 0 : index
    %c0_38 = arith.constant 0 : index
    %45 = vector.load %arg4[%c0_37, %c0_38] : memref<128x128xf32, #tpu.memory_space<vmem>>, vector<128x128xf32>
    %cst_39 = arith.constant dense<0.000000e+00> : vector<256x128xf32>
    %46 = tpu.matmul %44, %45, %cst_39 {dimension_numbers = #tpu.dot_dimension_numbers<[1], [0], [0], [1], [0, 0, 1, 1], [], []>} : vector<256x128xf32>, vector<128x128xf32>, vector<256x128xf32> -> vector<256x128xf32>
    %47 = vector.broadcast %3 : vector<1x128xf32> to vector<256x128xf32>
    %48 = arith.addf %46, %47 : vector<256x128xf32>
    %cst_40 = arith.constant 5.000000e-01 : f32
    %49 = vector.broadcast %cst_40 : f32 to vector<256x128xf32>
    %50 = arith.mulf %49, %48 : vector<256x128xf32>
    %cst_41 = arith.constant 0.707106769 : f32
    %51 = vector.broadcast %cst_41 : f32 to vector<256x128xf32>
    %52 = arith.mulf %48, %51 : vector<256x128xf32>
    %53 = math.erf %52 : vector<256x128xf32>
    %cst_42 = arith.constant 1.000000e+00 : f32
    %54 = vector.broadcast %cst_42 : f32 to vector<256x128xf32>
    %55 = arith.addf %54, %53 : vector<256x128xf32>
    %56 = arith.mulf %50, %55 : vector<256x128xf32>
    %57 = vector.shape_cast %56 : vector<256x128xf32> to vector<16x16x128xf32>
    %c3_43 = arith.constant 3 : index
    %c3_44 = arith.constant 3 : index
    %c0_45 = arith.constant 0 : index
    %58 = vector.load %arg11[%c3_43, %c3_44, %c0_45] : memref<22x24x128xf32, #tpu.memory_space<vmem>>, vector<16x16x128xf32>
    tpu.vector_store %arg11[%c3_43, %c3_44, %c0_45], %57 {strides = array<i32>} : memref<22x24x128xf32, #tpu.memory_space<vmem>>, vector<16x16x128xf32>,
    %c0_i32_46 = arith.constant 0 : i32
    %c4_i32_47 = arith.constant 4 : i32
    %59 = arith.addi %c0_i32_46, %c4_i32_47 : i32
    %c1_i32_48 = arith.constant 1 : i32
    scf.for %arg13 = %c0_i32_46 to %59 step %c1_i32_48  : i32 {
      %c1_i32_70 = arith.constant 1 : i32
      %84 = arith.muli %arg13, %c1_i32_70 : i32
      %c0_i32_71 = arith.constant 0 : i32
      %85 = arith.addi %c0_i32_71, %84 : i32
      %c4_i32_72 = arith.constant 4 : i32
      %86 = arith.muli %85, %c4_i32_72 : i32
      %87 = tpu.assume_multiple %86, 4 : i32
      %cst_73 = arith.constant 0.000000e+00 : f32
      %88 = vector.broadcast %cst_73 : f32 to vector<4x16x128xf32>
      %c2_i32 = arith.constant 2 : i32
      %89 = arith.addi %87, %c2_i32 : i32
      %c0_i32_74 = arith.constant 0 : i32
      %90 = arith.addi %89, %c0_i32_74 : i32
      %91 = arith.index_cast %90 : i32 to index
      %c2 = arith.constant 2 : index
      %c0_75 = arith.constant 0 : index
      %92 = vector.load %arg11[%91, %c2, %c0_75] : memref<22x24x128xf32, #tpu.memory_space<vmem>>, vector<4x16x128xf32>
      %93 = vector.extract_strided_slice %41 {offsets = [0, 0, 0], sizes = [1, 1, 128], strides = [1, 1, 1]} : vector<3x3x128xf32> to vector<1x1x128xf32>
      %94 = vector.broadcast %93 : vector<1x1x128xf32> to vector<4x16x128xf32>
      %95 = arith.mulf %92, %94 : vector<4x16x128xf32>
      %96 = arith.addf %88, %95 : vector<4x16x128xf32>
      %c2_i32_76 = arith.constant 2 : i32
      %97 = arith.addi %87, %c2_i32_76 : i32
      %c0_i32_77 = arith.constant 0 : i32
      %98 = arith.addi %97, %c0_i32_77 : i32
      %99 = arith.index_cast %98 : i32 to index
      %c3_78 = arith.constant 3 : index
      %c0_79 = arith.constant 0 : index
      %100 = vector.load %arg11[%99, %c3_78, %c0_79] : memref<22x24x128xf32, #tpu.memory_space<vmem>>, vector<4x16x128xf32>
      %101 = vector.extract_strided_slice %41 {offsets = [0, 1, 0], sizes = [1, 1, 128], strides = [1, 1, 1]} : vector<3x3x128xf32> to vector<1x1x128xf32>
      %102 = vector.broadcast %101 : vector<1x1x128xf32> to vector<4x16x128xf32>
      %103 = arith.mulf %100, %102 : vector<4x16x128xf32>
      %104 = arith.addf %96, %103 : vector<4x16x128xf32>
      %c2_i32_80 = arith.constant 2 : i32
      %105 = arith.addi %87, %c2_i32_80 : i32
      %c0_i32_81 = arith.constant 0 : i32
      %106 = arith.addi %105, %c0_i32_81 : i32
      %107 = arith.index_cast %106 : i32 to index
      %c4 = arith.constant 4 : index
      %c0_82 = arith.constant 0 : index
      %108 = vector.load %arg11[%107, %c4, %c0_82] : memref<22x24x128xf32, #tpu.memory_space<vmem>>, vector<4x16x128xf32>
      %109 = vector.extract_strided_slice %41 {offsets = [0, 2, 0], sizes = [1, 1, 128], strides = [1, 1, 1]} : vector<3x3x128xf32> to vector<1x1x128xf32>
      %110 = vector.broadcast %109 : vector<1x1x128xf32> to vector<4x16x128xf32>
      %111 = arith.mulf %108, %110 : vector<4x16x128xf32>
      %112 = arith.addf %104, %111 : vector<4x16x128xf32>
      %c2_i32_83 = arith.constant 2 : i32
      %113 = arith.addi %87, %c2_i32_83 : i32
      %c1_i32_84 = arith.constant 1 : i32
      %114 = arith.addi %113, %c1_i32_84 : i32
      %115 = arith.index_cast %114 : i32 to index
      %c2_85 = arith.constant 2 : index
      %c0_86 = arith.constant 0 : index
      %116 = vector.load %arg11[%115, %c2_85, %c0_86] : memref<22x24x128xf32, #tpu.memory_space<vmem>>, vector<4x16x128xf32>
      %117 = vector.extract_strided_slice %41 {offsets = [1, 0, 0], sizes = [1, 1, 128], strides = [1, 1, 1]} : vector<3x3x128xf32> to vector<1x1x128xf32>
      %118 = vector.broadcast %117 : vector<1x1x128xf32> to vector<4x16x128xf32>
      %119 = arith.mulf %116, %118 : vector<4x16x128xf32>
      %120 = arith.addf %112, %119 : vector<4x16x128xf32>
      %c2_i32_87 = arith.constant 2 : i32
      %121 = arith.addi %87, %c2_i32_87 : i32
      %c1_i32_88 = arith.constant 1 : i32
      %122 = arith.addi %121, %c1_i32_88 : i32
      %123 = arith.index_cast %122 : i32 to index
      %c3_89 = arith.constant 3 : index
      %c0_90 = arith.constant 0 : index
      %124 = vector.load %arg11[%123, %c3_89, %c0_90] : memref<22x24x128xf32, #tpu.memory_space<vmem>>, vector<4x16x128xf32>
      %125 = vector.extract_strided_slice %41 {offsets = [1, 1, 0], sizes = [1, 1, 128], strides = [1, 1, 1]} : vector<3x3x128xf32> to vector<1x1x128xf32>
      %126 = vector.broadcast %125 : vector<1x1x128xf32> to vector<4x16x128xf32>
      %127 = arith.mulf %124, %126 : vector<4x16x128xf32>
      %128 = arith.addf %120, %127 : vector<4x16x128xf32>
      %c2_i32_91 = arith.constant 2 : i32
      %129 = arith.addi %87, %c2_i32_91 : i32
      %c1_i32_92 = arith.constant 1 : i32
      %130 = arith.addi %129, %c1_i32_92 : i32
      %131 = arith.index_cast %130 : i32 to index
      %c4_93 = arith.constant 4 : index
      %c0_94 = arith.constant 0 : index
      %132 = vector.load %arg11[%131, %c4_93, %c0_94] : memref<22x24x128xf32, #tpu.memory_space<vmem>>, vector<4x16x128xf32>
      %133 = vector.extract_strided_slice %41 {offsets = [1, 2, 0], sizes = [1, 1, 128], strides = [1, 1, 1]} : vector<3x3x128xf32> to vector<1x1x128xf32>
      %134 = vector.broadcast %133 : vector<1x1x128xf32> to vector<4x16x128xf32>
      %135 = arith.mulf %132, %134 : vector<4x16x128xf32>
      %136 = arith.addf %128, %135 : vector<4x16x128xf32>
      %c2_i32_95 = arith.constant 2 : i32
      %137 = arith.addi %87, %c2_i32_95 : i32
      %c2_i32_96 = arith.constant 2 : i32
      %138 = arith.addi %137, %c2_i32_96 : i32
      %139 = arith.index_cast %138 : i32 to index
      %c2_97 = arith.constant 2 : index
      %c0_98 = arith.constant 0 : index
      %140 = vector.load %arg11[%139, %c2_97, %c0_98] : memref<22x24x128xf32, #tpu.memory_space<vmem>>, vector<4x16x128xf32>
      %141 = vector.extract_strided_slice %41 {offsets = [2, 0, 0], sizes = [1, 1, 128], strides = [1, 1, 1]} : vector<3x3x128xf32> to vector<1x1x128xf32>
      %142 = vector.broadcast %141 : vector<1x1x128xf32> to vector<4x16x128xf32>
      %143 = arith.mulf %140, %142 : vector<4x16x128xf32>
      %144 = arith.addf %136, %143 : vector<4x16x128xf32>
      %c2_i32_99 = arith.constant 2 : i32
      %145 = arith.addi %87, %c2_i32_99 : i32
      %c2_i32_100 = arith.constant 2 : i32
      %146 = arith.addi %145, %c2_i32_100 : i32
      %147 = arith.index_cast %146 : i32 to index
      %c3_101 = arith.constant 3 : index
      %c0_102 = arith.constant 0 : index
      %148 = vector.load %arg11[%147, %c3_101, %c0_102] : memref<22x24x128xf32, #tpu.memory_space<vmem>>, vector<4x16x128xf32>
      %149 = vector.extract_strided_slice %41 {offsets = [2, 1, 0], sizes = [1, 1, 128], strides = [1, 1, 1]} : vector<3x3x128xf32> to vector<1x1x128xf32>
      %150 = vector.broadcast %149 : vector<1x1x128xf32> to vector<4x16x128xf32>
      %151 = arith.mulf %148, %150 : vector<4x16x128xf32>
      %152 = arith.addf %144, %151 : vector<4x16x128xf32>
      %c2_i32_103 = arith.constant 2 : i32
      %153 = arith.addi %87, %c2_i32_103 : i32
      %c2_i32_104 = arith.constant 2 : i32
      %154 = arith.addi %153, %c2_i32_104 : i32
      %155 = arith.index_cast %154 : i32 to index
      %c4_105 = arith.constant 4 : index
      %c0_106 = arith.constant 0 : index
      %156 = vector.load %arg11[%155, %c4_105, %c0_106] : memref<22x24x128xf32, #tpu.memory_space<vmem>>, vector<4x16x128xf32>
      %157 = vector.extract_strided_slice %41 {offsets = [2, 2, 0], sizes = [1, 1, 128], strides = [1, 1, 1]} : vector<3x3x128xf32> to vector<1x1x128xf32>
      %158 = vector.broadcast %157 : vector<1x1x128xf32> to vector<4x16x128xf32>
      %159 = arith.mulf %156, %158 : vector<4x16x128xf32>
      %160 = arith.addf %152, %159 : vector<4x16x128xf32>
      %161 = arith.index_cast %87 : i32 to index
      %c0_107 = arith.constant 0 : index
      %c0_108 = arith.constant 0 : index
      %162 = vector.load %arg12[%161, %c0_107, %c0_108] : memref<16x16x128xf32, #tpu.memory_space<vmem>>, vector<4x16x128xf32>
      %163 = arith.addf %162, %160 : vector<4x16x128xf32>
      %164 = vector.shape_cast %4 : vector<1x128xf32> to vector<1x1x128xf32>
      %165 = vector.broadcast %164 : vector<1x1x128xf32> to vector<4x16x128xf32>
      %166 = arith.addf %163, %165 : vector<4x16x128xf32>
      %167 = arith.index_cast %87 : i32 to index
      %c0_109 = arith.constant 0 : index
      %c0_110 = arith.constant 0 : index
      %168 = vector.load %arg12[%167, %c0_109, %c0_110] : memref<16x16x128xf32, #tpu.memory_space<vmem>>, vector<4x16x128xf32>
      tpu.vector_store %arg12[%167, %c0_109, %c0_110], %166 {strides = array<i32>} : memref<16x16x128xf32, #tpu.memory_space<vmem>>, vector<4x16x128xf32>,
    }
    %c4_i32_49 = arith.constant 4 : i32
    %c0_50 = arith.constant 0 : index
    %c0_51 = arith.constant 0 : index
    %c0_52 = arith.constant 0 : index
    %60 = vector.load %arg12[%c0_50, %c0_51, %c0_52] : memref<16x16x128xf32, #tpu.memory_space<vmem>>, vector<16x16x128xf32>
    %61 = vector.shape_cast %60 : vector<16x16x128xf32> to vector<256x128xf32>
    %c0_53 = arith.constant 0 : index
    %c0_54 = arith.constant 0 : index
    %62 = vector.load %arg6[%c0_53, %c0_54] : memref<128x128xf32, #tpu.memory_space<vmem>>, vector<128x128xf32>
    %cst_55 = arith.constant dense<0.000000e+00> : vector<256x128xf32>
    %63 = tpu.matmul %61, %62, %cst_55 {dimension_numbers = #tpu.dot_dimension_numbers<[1], [0], [0], [1], [0, 0, 1, 1], [], []>} : vector<256x128xf32>, vector<128x128xf32>, vector<256x128xf32> -> vector<256x128xf32>
    %64 = vector.broadcast %5 : vector<1x128xf32> to vector<256x128xf32>
    %65 = arith.addf %63, %64 : vector<256x128xf32>
    %cst_56 = arith.constant 5.000000e-01 : f32
    %66 = vector.broadcast %cst_56 : f32 to vector<256x128xf32>
    %67 = arith.mulf %66, %65 : vector<256x128xf32>
    %cst_57 = arith.constant 0.707106769 : f32
    %68 = vector.broadcast %cst_57 : f32 to vector<256x128xf32>
    %69 = arith.mulf %65, %68 : vector<256x128xf32>
    %70 = math.erf %69 : vector<256x128xf32>
    %cst_58 = arith.constant 1.000000e+00 : f32
    %71 = vector.broadcast %cst_58 : f32 to vector<256x128xf32>
    %72 = arith.addf %71, %70 : vector<256x128xf32>
    %73 = arith.mulf %67, %72 : vector<256x128xf32>
    %c0_59 = arith.constant 0 : index
    %c0_60 = arith.constant 0 : index
    %74 = vector.load %arg7[%c0_59, %c0_60] : memref<128x64xf32, #tpu.memory_space<vmem>>, vector<128x64xf32>
    %cst_61 = arith.constant dense<0.000000e+00> : vector<256x64xf32>
    %75 = tpu.matmul %73, %74, %cst_61 {dimension_numbers = #tpu.dot_dimension_numbers<[1], [0], [0], [1], [0, 0, 1, 1], [], []>} : vector<256x128xf32>, vector<128x64xf32>, vector<256x64xf32> -> vector<256x64xf32>
    %c0_62 = arith.constant 0 : index
    %c0_63 = arith.constant 0 : index
    %76 = vector.load %arg9[%c0_62, %c0_63] : memref<1x64xf32, #tpu.memory_space<vmem>>, vector<1x64xf32>
    %77 = vector.broadcast %76 : vector<1x64xf32> to vector<256x64xf32>
    %78 = arith.addf %75, %77 : vector<256x64xf32>
    %79 = tpu.transpose %78, [1, 0] : vector<256x64xf32> -> vector<64x256xf32>
    %80 = vector.shape_cast %79 : vector<64x256xf32> to vector<2x32x256xf32>
    %c0_64 = arith.constant 0 : index
    %c0_65 = arith.constant 0 : index
    %c0_66 = arith.constant 0 : index
    %81 = vector.load %arg1[%c0_64, %c0_65, %c0_66] : memref<2x32x256xf32, #tpu.memory_space<vmem>>, vector<2x32x256xf32>
    %82 = arith.addf %81, %80 : vector<2x32x256xf32>
    %c0_67 = arith.constant 0 : index
    %c0_68 = arith.constant 0 : index
    %c0_69 = arith.constant 0 : index
    %83 = vector.load %arg10[%c0_67, %c0_68, %c0_69] : memref<2x32x256xf32, #tpu.memory_space<vmem>>, vector<2x32x256xf32>
    tpu.vector_store %arg10[%c0_67, %c0_68, %c0_69], %82 {strides = array<i32>} : memref<2x32x256xf32, #tpu.memory_space<vmem>>, vector<2x32x256xf32>,
    return
  }
  func.func @transform_0(%arg0: i32) -> (i32, i32, i32) {
    %c0_i32 = arith.constant 0 : i32
    %c0_i32_0 = arith.constant 0 : i32
    %c0_i32_1 = arith.constant 0 : i32
    return %arg0, %c0_i32, %c0_i32_0 : i32, i32, i32
  }
  func.func @transform_1(%arg0: i32) -> (i32, i32) {
    %c0_i32 = arith.constant 0 : i32
    %c0_i32_0 = arith.constant 0 : i32
    %c0_i32_1 = arith.constant 0 : i32
    return %c0_i32, %c0_i32_0 : i32, i32
  }
  func.func @transform_2(%arg0: i32) -> (i32, i32, i32) {
    %c0_i32 = arith.constant 0 : i32
    %c0_i32_0 = arith.constant 0 : i32
    %c0_i32_1 = arith.constant 0 : i32
    %c0_i32_2 = arith.constant 0 : i32
    return %c0_i32, %c0_i32_0, %c0_i32_1 : i32, i32, i32
  }
  func.func @transform_3(%arg0: i32) -> (i32, i32) {
    %c0_i32 = arith.constant 0 : i32
    %c0_i32_0 = arith.constant 0 : i32
    %c0_i32_1 = arith.constant 0 : i32
    return %c0_i32, %c0_i32_0 : i32, i32
  }
  func.func @transform_4(%arg0: i32) -> (i32, i32, i32) {
    %c0_i32 = arith.constant 0 : i32
    %c0_i32_0 = arith.constant 0 : i32
    %c0_i32_1 = arith.constant 0 : i32
    %c0_i32_2 = arith.constant 0 : i32
    return %c0_i32, %c0_i32_0, %c0_i32_1 : i32, i32, i32
  }
  func.func @transform_5(%arg0: i32) -> (i32, i32) {
    %c0_i32 = arith.constant 0 : i32
    %c0_i32_0 = arith.constant 0 : i32
    %c0_i32_1 = arith.constant 0 : i32
    return %c0_i32, %c0_i32_0 : i32, i32
  }
  func.func @transform_6(%arg0: i32) -> (i32, i32) {
    %c0_i32 = arith.constant 0 : i32
    %c0_i32_0 = arith.constant 0 : i32
    %c0_i32_1 = arith.constant 0 : i32
    return %c0_i32, %c0_i32_0 : i32, i32
  }
  func.func @transform_7(%arg0: i32) -> (i32, i32) {
    %c0_i32 = arith.constant 0 : i32
    %c0_i32_0 = arith.constant 0 : i32
    %c0_i32_1 = arith.constant 0 : i32
    return %c0_i32, %c0_i32_0 : i32, i32
  }
  func.func @transform_8(%arg0: i32) -> (i32, i32) {
    %c0_i32 = arith.constant 0 : i32
    %c0_i32_0 = arith.constant 0 : i32
    %c0_i32_1 = arith.constant 0 : i32
    return %c0_i32, %c0_i32_0 : i32, i32
  }
  func.func @transform_9(%arg0: i32) -> (i32, i32, i32) {
    %c0_i32 = arith.constant 0 : i32
    %c0_i32_0 = arith.constant 0 : i32
    %c0_i32_1 = arith.constant 0 : i32
    return %arg0, %c0_i32, %c0_i32_0 : i32, i32, i32
  }
}

</mosaic_0001>

<bundles_post_ra>
// kernel: tile.62
= control target key start
LH: loop header
LB: loop body
LE: loop exit
PB: predicated region body
PF: predicated region fallthrough
CT: control target
= control target key end

     0   :  { %s22_s0 = inlined_call_operand.vmem [shape: f32[64], index: 0, kind: input, shape index: {}]   ;;  %s23_s1 = inlined_call_operand.vmem [shape: f32[2,64], index: 1, kind: output, shape index: {}]  }
   0x1   :  { %v4_v0 = vld [vmem:[%s22_s0] ss:$0 sm:$0xff] }
   0x2   :  { %5 = vst [vmem:[%s23_s1] sm:$0x3] %v4_v0 }

// kernel: tile.70
= control target key start
LH: loop header
LB: loop body
LE: loop exit
PB: predicated region body
PF: predicated region fallthrough
CT: control target
= control target key end

     0   :  { %s22_s0 = inlined_call_operand.vmem [shape: f32[32], index: 0, kind: input, shape index: {}]   ;;  %s23_s1 = inlined_call_operand.vmem [shape: f32[2,32], index: 1, kind: output, shape index: {}]  }
   0x1   :  { %v4_v0 = vld [vmem:[%s22_s0] ss:$0 sm:$0xff] }
   0x2   :  { %5 = vst [vmem:[%s23_s1] sm:$0x3] %v4_v0 }

// kernel: tile.67
= control target key start
LH: loop header
LB: loop body
LE: loop exit
PB: predicated region body
PF: predicated region fallthrough
CT: control target
= control target key end

     0   :  { %vm7_vm0 = vcmask 523264   ;;  %vm13_vm1 = vcmask 1048064   ;;  %s39_s0 = inlined_call_operand.vmem [shape: f32[2,64], index: 0, kind: input, shape index: {}]   ;;  %s40_s1 = inlined_call_operand.vmem [shape: f32[1,128], index: 1, kind: output, shape index: {}]  }
   0x1   :  { %v4_v0 = vld [vmem:[%s39_s0] sm:$0x3]  ;;  %s22_s0 = smov 64  }
   0x2   :  { %5 = vst [vmem:[#allocation1] sm:$0x3] %v4_v0 }
   0x9   :  { %v10_v1 = vld [vmem:[#allocation1 + $0x1] sm:$0x1]   ;;  %v6_v2 = vld [vmem:[#allocation1] sm:$0x1]  }
   0xa   :  { %11 = vrot.lane.b32.xlu0 %v10_v1, %s22_s0  ;;  %8 = vst.msk [vmem:[#allocation0] sm:$0x1] %vm7_vm0, %v6_v2  }
  0x7c   :  { %v12_v3 = vpop.permute.xlu0 %11  }
  0x7d   :  { %14 = vst.msk [vmem:[#allocation0] sm:$0x1] %vm13_vm1, %v12_v3  }
  0x84   :  { %v18_v4 = vld [vmem:[#allocation0] sm:$0x1] }
  0x85   :  { %20 = vst [vmem:[%s40_s1] sm:$0x1] %v18_v4 }

// kernel: tile.71
= control target key start
LH: loop header
LB: loop body
LE: loop exit
PB: predicated region body
PF: predicated region fallthrough
CT: control target
= control target key end

     0   :  { %vm7_vm0 = vcmask 261120   ;;  %vm13_vm1 = vcmask 523520   ;;  %s39_s0 = inlined_call_operand.vmem [shape: f32[2,32], index: 0, kind: input, shape index: {}]   ;;  %s40_s1 = inlined_call_operand.vmem [shape: f32[1,64], index: 1, kind: output, shape index: {}]  }
   0x1   :  { %v4_v0 = vld [vmem:[%s39_s0] sm:$0x3]  ;;  %s22_s0 = smov 32  }
   0x2   :  { %5 = vst [vmem:[#allocation1] sm:$0x3] %v4_v0 }
   0x9   :  { %v10_v1 = vld [vmem:[#allocation1 + $0x1] sm:$0x1]   ;;  %v6_v2 = vld [vmem:[#allocation1] sm:$0x1]  }
   0xa   :  { %11 = vrot.lane.b32.xlu0 %v10_v1, %s22_s0  ;;  %8 = vst.msk [vmem:[#allocation0] sm:$0x1] %vm7_vm0, %v6_v2  }
  0x7c   :  { %v12_v3 = vpop.permute.xlu0 %11  }
  0x7d   :  { %14 = vst.msk [vmem:[#allocation0] sm:$0x1] %vm13_vm1, %v12_v3  }
  0x84   :  { %v18_v4 = vld [vmem:[#allocation0] sm:$0x1] }
  0x85   :  { %20 = vst [vmem:[%s40_s1] sm:$0x1] %v18_v4 }

// kernel: tile.45
= control target key start
LH: loop header
LB: loop body
LE: loop exit
PB: predicated region body
PF: predicated region fallthrough
CT: control target
= control target key end

     0   :  { %vm47_vm0 = vcmask 1047556   ;;  %vm49_vm1 = vcmask 523264   ;;  %vm68_vm2 = vcmask 1048064   ;;  %s164_s0 = inlined_call_operand.vmem [shape: f32[3,3,2,64], index: 0, kind: input, shape index: {}]   ;;  %s165_s1 = inlined_call_operand.vmem [shape: f32[3,3,128], index: 1, kind: output, shape index: {}]  }
   0x1   :  { %v107_v0 = vld [vmem:[%s164_s0 + $0xe] sm:$0x3]  ;;  %v108_v1 = vld [vmem:[%s164_s0 + $0xc] sm:$0x3]  ;;  %v109_v2 = vld [vmem:[%s164_s0 + $0xa] sm:$0x3] }
   0x2   :  { %13 = vst [vmem:[#allocation1 + $0x38] sm:$0x3] %v107_v0  ;;  %18 = vst [vmem:[#allocation1 + $0x30] sm:$0x3] %v108_v1  ;;  %v110_v3 = vld [vmem:[%s164_s0 + $0x8] sm:$0x3] }
   0x3   :  { %23 = vst [vmem:[#allocation1 + $0x28] sm:$0x3] %v109_v2  ;;  %v111_v4 = vld [vmem:[%s164_s0 + $0x6] sm:$0x3]  ;;  %v112_v5 = vld [vmem:[%s164_s0 + $0x4] sm:$0x3] }
   0x4   :  { %28 = vst [vmem:[#allocation1 + $0x20] sm:$0x3] %v110_v3  ;;  %33 = vst [vmem:[#allocation1 + $0x18] sm:$0x3] %v111_v4  ;;  %v113_v6 = vld [vmem:[%s164_s0 + $0x2] sm:$0x3] }
   0x5   :  { %38 = vst [vmem:[#allocation1 + $0x10] sm:$0x3] %v112_v5  ;;  %v43_v7 = vld [vmem:[%s164_s0] sm:$0x3]  ;;  %42 = vst [vmem:[#allocation1 + $0x8] sm:$0x3] %v113_v6 }
   0x6   :  { %44 = vst [vmem:[#allocation1] sm:$0x3] %v43_v7  ;;  %v106_v8 = vld [vmem:[%s164_s0 + $0x10] sm:$0x3]  ;;  %s117_s0 = smov 64  }
   0x7   :  { %8 = vst [vmem:[#allocation1 + $0x40] sm:$0x3] %v106_v8 }
   0xb   :  { %v63_v9 = vld [vmem:[#allocation1 + $0x1] ss:$8 sm:$0xf0]   ;;  %v46_v10 = vld [vmem:[#allocation1] ss:$8 sm:$0xf0]  }
   0xd   :  { %v45_v11 = vld [vmem:[#allocation1] ss:$8 sm:$0xf]   ;;  %v61_v12 = vld [vmem:[#allocation1 + $0x1] ss:$8 sm:$0xf]  }
   0xe   :  { %v65_v13 = vsel %vm47_vm0, %v63_v9, %v61_v12  ;;  %v48_v14 = vsel %vm47_vm0, %v46_v10, %v45_v11  ;;  %v56_v15 = vld [vmem:[#allocation1 + $0x40] sm:$0x1]   ;;  %v75_v16 = vld [vmem:[#allocation1 + $0x41] sm:$0x1]  }
   0xf   :  { %66 = vrot.lane.b32.xlu0 %v65_v13, %s117_s0  ;;  %50 = vst.msk [vmem:[#allocation0] sm:$0x7] %vm49_vm1, %v48_v14   ;;  %52 = vst.msk [vmem:[#allocation0 + $0x5] sm:$0x38] %vm49_vm1, %v48_v14  }
  0x10   :  { %54 = vst.msk [vmem:[#allocation0 + $0xa] sm:$0xc0] %vm49_vm1, %v48_v14   ;;  %59 = vst.msk [vmem:[#allocation0 + $0x12] sm:$0x1] %vm49_vm1, %v56_v15  }
  0x13   :  { %76 = vrot.lane.b32.xlu0 %v75_v16, %s117_s0 }
  0x81   :  { %v67_v17 = vpop.permute.xlu0 %66  }
  0x82   :  { %69 = vst.msk [vmem:[#allocation0] sm:$0x7] %vm68_vm2, %v67_v17   ;;  %71 = vst.msk [vmem:[#allocation0 + $0x5] sm:$0x38] %vm68_vm2, %v67_v17  }
  0x83   :  { %73 = vst.msk [vmem:[#allocation0 + $0xa] sm:$0xc0] %vm68_vm2, %v67_v17  }
  0x85   :  { %v77_v18 = vpop.permute.xlu0 %76  }
  0x86   :  { %80 = vst.msk [vmem:[#allocation0 + $0x12] sm:$0x1] %vm68_vm2, %v77_v18  }
  0x89   :  { %v84_v19 = vld [vmem:[#allocation0] sm:$0xf]  ;;  %v88_v20 = vld [vmem:[#allocation0 + $0x8] sm:$0xf] }
  0x8a   :  { %86 = vst [vmem:[%s165_s1] sm:$0xf] %v84_v19  ;;  %114 = vst [vmem:[%s165_s1 + $0x4] sm:$0xf] %v88_v20 }
  0x8d   :  { %v93_v21 = vld [vmem:[#allocation0 + $0x10] sm:$0xf] }
  0x8e   :  { %115 = vst [vmem:[%s165_s1 + $0x8] sm:$0xf] %v93_v21 }

// kernel: tile.40
= control target key start
LH: loop header
LB: loop body
LE: loop exit
PB: predicated region body
PF: predicated region fallthrough
CT: control target
= control target key end

     0   :  { %vm247_vm0 = vcmask 1047556   ;;  %s521_s10 = smov 64   ;;  %vm249_vm1 = vcmask 523264   ;;  %vm381_vm2 = vcmask 1044484   ;;  %vm385_vm3 = vcmask 1047557   ;;  %s803_s0 = inlined_call_operand.vmem [shape: f32[7,7,2,64], index: 0, kind: input, shape index: {}]   ;;  %s804_s1 = inlined_call_operand.vmem [shape: f32[7,7,128], index: 1, kind: output, shape index: {}]  }
   0x1   :  { %v489_v0 = vld [vmem:[%s803_s0 + $0xe] sm:$0x3]  ;;  %v490_v1 = vld [vmem:[%s803_s0 + $0xc] sm:$0x3]  ;;  %v491_v2 = vld [vmem:[%s803_s0 + $0xa] sm:$0x3] }
   0x2   :  { %213 = vst [vmem:[#allocation0 + $0x38] sm:$0x3] %v489_v0  ;;  %218 = vst [vmem:[#allocation0 + $0x30] sm:$0x3] %v490_v1  ;;  %v492_v3 = vld [vmem:[%s803_s0 + $0x8] sm:$0x3] }
   0x3   :  { %223 = vst [vmem:[#allocation0 + $0x28] sm:$0x3] %v491_v2  ;;  %v493_v4 = vld [vmem:[%s803_s0 + $0x6] sm:$0x3]  ;;  %v494_v5 = vld [vmem:[%s803_s0 + $0x4] sm:$0x3] }
   0x4   :  { %228 = vst [vmem:[#allocation0 + $0x20] sm:$0x3] %v492_v3  ;;  %233 = vst [vmem:[#allocation0 + $0x18] sm:$0x3] %v493_v4  ;;  %v495_v6 = vld [vmem:[%s803_s0 + $0x2] sm:$0x3] }
   0x5   :  { %238 = vst [vmem:[#allocation0 + $0x10] sm:$0x3] %v494_v5  ;;  %v243_v7 = vld [vmem:[%s803_s0] sm:$0x3]  ;;  %242 = vst [vmem:[#allocation0 + $0x8] sm:$0x3] %v495_v6 }
   0x6   :  { %244 = vst [vmem:[#allocation0] sm:$0x3] %v243_v7  ;;  %v481_v8 = vld [vmem:[%s803_s0 + $0x1e] sm:$0x3]  ;;  %v482_v9 = vld [vmem:[%s803_s0 + $0x1c] sm:$0x3] }
   0x7   :  { %v483_v10 = vld [vmem:[%s803_s0 + $0x1a] sm:$0x3]  ;;  %173 = vst [vmem:[#allocation0 + $0x78] sm:$0x3] %v481_v8  ;;  %178 = vst [vmem:[#allocation0 + $0x70] sm:$0x3] %v482_v9 }
   0x8   :  { %183 = vst [vmem:[#allocation0 + $0x68] sm:$0x3] %v483_v10  ;;  %v484_v11 = vld [vmem:[%s803_s0 + $0x18] sm:$0x3]  ;;  %v485_v12 = vld [vmem:[%s803_s0 + $0x16] sm:$0x3] }
   0x9   :  { %v486_v13 = vld [vmem:[%s803_s0 + $0x14] sm:$0x3]  ;;  %188 = vst [vmem:[#allocation0 + $0x60] sm:$0x3] %v484_v11  ;;  %193 = vst [vmem:[#allocation0 + $0x58] sm:$0x3] %v485_v12 }
   0xa   :  { %198 = vst [vmem:[#allocation0 + $0x50] sm:$0x3] %v486_v13  ;;  %v487_v14 = vld [vmem:[%s803_s0 + $0x12] sm:$0x3]  ;;  %v488_v15 = vld [vmem:[%s803_s0 + $0x10] sm:$0x3] }
   0xb   :  { %v461_v16 = vld [vmem:[%s803_s0 + $0x46] sm:$0x3]  ;;  %203 = vst [vmem:[#allocation0 + $0x48] sm:$0x3] %v487_v14  ;;  %208 = vst [vmem:[#allocation0 + $0x40] sm:$0x3] %v488_v15 }
   0xc   :  { %73 = vst [vmem:[#allocation0 + $0x118] sm:$0x3] %v461_v16  ;;  %v462_v17 = vld [vmem:[%s803_s0 + $0x44] sm:$0x3]  ;;  %v463_v18 = vld [vmem:[%s803_s0 + $0x42] sm:$0x3] }
   0xd   :  { %v464_v19 = vld [vmem:[%s803_s0 + $0x40] sm:$0x3]  ;;  %78 = vst [vmem:[#allocation0 + $0x110] sm:$0x3] %v462_v17  ;;  %83 = vst [vmem:[#allocation0 + $0x108] sm:$0x3] %v463_v18 }
   0xe   :  { %88 = vst [vmem:[#allocation0 + $0x100] sm:$0x3] %v464_v19  ;;  %v465_v20 = vld [vmem:[%s803_s0 + $0x3e] sm:$0x3]  ;;  %v466_v21 = vld [vmem:[%s803_s0 + $0x3c] sm:$0x3] }
   0xf   :  { %v467_v22 = vld [vmem:[%s803_s0 + $0x3a] sm:$0x3]  ;;  %93 = vst [vmem:[#allocation0 + $0xf8] sm:$0x3] %v465_v20  ;;  %98 = vst [vmem:[#allocation0 + $0xf0] sm:$0x3] %v466_v21 }
  0x10   :  { %103 = vst [vmem:[#allocation0 + $0xe8] sm:$0x3] %v467_v22  ;;  %v468_v23 = vld [vmem:[%s803_s0 + $0x38] sm:$0x3]  ;;  %v473_v24 = vld [vmem:[%s803_s0 + $0x2e] sm:$0x3] }
  0x11   :  { %v474_v25 = vld [vmem:[%s803_s0 + $0x2c] sm:$0x3]  ;;  %v316_v26 = vld [vmem:[#allocation0 + $0x1] ss:$8 sm:$0xf0]   ;;  %vm321_vm4 = vcmask 1048064  }
  0x12   :  { %108 = vst [vmem:[#allocation0 + $0xe0] sm:$0x3] %v468_v23  ;;  %133 = vst [vmem:[#allocation0 + $0xb8] sm:$0x3] %v473_v24  ;;  %v475_v27 = vld [vmem:[%s803_s0 + $0x2a] sm:$0x3] }
  0x13   :  { %138 = vst [vmem:[#allocation0 + $0xb0] sm:$0x3] %v474_v25  ;;  %v314_v28 = vld [vmem:[#allocation0 + $0x1] ss:$8 sm:$0xf]  }
  0x14   :  { %143 = vst [vmem:[#allocation0 + $0xa8] sm:$0x3] %v475_v27  ;;  %v476_v29 = vld [vmem:[%s803_s0 + $0x28] sm:$0x3]  ;;  %v318_v30 = vsel %vm247_vm0, %v316_v26, %v314_v28  ;;  %v477_v31 = vld [vmem:[%s803_s0 + $0x26] sm:$0x3] }
  0x15   :  { %148 = vst [vmem:[#allocation0 + $0xa0] sm:$0x3] %v476_v29  ;;  %v478_v32 = vld [vmem:[%s803_s0 + $0x24] sm:$0x3]  ;;  %v479_v33 = vld [vmem:[%s803_s0 + $0x22] sm:$0x3]  ;;  %319 = vrot.lane.b32.xlu0 %v318_v30, %s521_s10 }
  0x16   :  { %v341_v34 = vld [vmem:[#allocation0 + $0x41] ss:$8 sm:$0xf0]   ;;  %153 = vst [vmem:[#allocation0 + $0x98] sm:$0x3] %v477_v31 }
  0x17   :  { %158 = vst [vmem:[#allocation0 + $0x90] sm:$0x3] %v478_v32  ;;  %163 = vst [vmem:[#allocation0 + $0x88] sm:$0x3] %v479_v33  ;;  %v480_v35 = vld [vmem:[%s803_s0 + $0x20] sm:$0x3] }
  0x18   :  { %v339_v36 = vld [vmem:[#allocation0 + $0x41] ss:$8 sm:$0xf]   ;;  %168 = vst [vmem:[#allocation0 + $0x80] sm:$0x3] %v480_v35 }
  0x19   :  { %v453_v37 = vld [vmem:[%s803_s0 + $0x56] sm:$0x3]  ;;  %v343_v38 = vsel %vm247_vm0, %v341_v34, %v339_v36  ;;  %v328_v39 = vld [vmem:[#allocation0 + $0xe1] ss:$8 sm:$0xf0]  }
  0x1a   :  { %33 = vst [vmem:[#allocation0 + $0x158] sm:$0x3] %v453_v37  ;;  %v454_v40 = vld [vmem:[%s803_s0 + $0x54] sm:$0x3]  ;;  %344 = vrot.lane.b32.xlu1 %v343_v38, %s521_s10  ;;  %v455_v41 = vld [vmem:[%s803_s0 + $0x52] sm:$0x3] }
  0x1b   :  { %38 = vst [vmem:[#allocation0 + $0x150] sm:$0x3] %v454_v40  ;;  %v456_v42 = vld [vmem:[%s803_s0 + $0x50] sm:$0x3]  ;;  %v457_v43 = vld [vmem:[%s803_s0 + $0x4e] sm:$0x3] }
  0x1c   :  { %v326_v44 = vld [vmem:[#allocation0 + $0xe1] ss:$8 sm:$0xf]   ;;  %43 = vst [vmem:[#allocation0 + $0x148] sm:$0x3] %v455_v41 }
  0x1d   :  { %48 = vst [vmem:[#allocation0 + $0x140] sm:$0x3] %v456_v42  ;;  %53 = vst [vmem:[#allocation0 + $0x138] sm:$0x3] %v457_v43  ;;  %v458_v45 = vld [vmem:[%s803_s0 + $0x4c] sm:$0x3]  ;;  %v330_v46 = vsel %vm247_vm0, %v328_v39, %v326_v44 }
  0x1e   :  { %58 = vst [vmem:[#allocation0 + $0x130] sm:$0x3] %v458_v45  ;;  %v459_v47 = vld [vmem:[%s803_s0 + $0x4a] sm:$0x3]  ;;  %v460_v48 = vld [vmem:[%s803_s0 + $0x48] sm:$0x3]  ;;  %331 = vrot.lane.b32.xlu0 %v330_v46, %s521_s10 }
  0x1f   :  { %v469_v49 = vld [vmem:[%s803_s0 + $0x36] sm:$0x3]  ;;  %v367_v50 = vld [vmem:[#allocation0 + $0x81] ss:$8 sm:$0xf0]  }
  0x20   :  { %63 = vst [vmem:[#allocation0 + $0x128] sm:$0x3] %v459_v47  ;;  %68 = vst [vmem:[#allocation0 + $0x120] sm:$0x3] %v460_v48  ;;  %v448_v51 = vld [vmem:[%s803_s0 + $0x60] sm:$0x3] }
  0x21   :  { %113 = vst [vmem:[#allocation0 + $0xd8] sm:$0x3] %v469_v49  ;;  %8 = vst [vmem:[#allocation0 + $0x180] sm:$0x3] %v448_v51  ;;  %v449_v52 = vld [vmem:[%s803_s0 + $0x5e] sm:$0x3] }
  0x22   :  { %v450_v53 = vld [vmem:[%s803_s0 + $0x5c] sm:$0x3]  ;;  %v451_v54 = vld [vmem:[%s803_s0 + $0x5a] sm:$0x3]  ;;  %13 = vst [vmem:[#allocation0 + $0x178] sm:$0x3] %v449_v52 }
  0x23   :  { %v365_v55 = vld [vmem:[#allocation0 + $0x81] ss:$8 sm:$0xf]   ;;  %18 = vst [vmem:[#allocation0 + $0x170] sm:$0x3] %v450_v53 }
  0x24   :  { %23 = vst [vmem:[#allocation0 + $0x168] sm:$0x3] %v451_v54  ;;  %v452_v56 = vld [vmem:[%s803_s0 + $0x58] sm:$0x3]  ;;  %v369_v57 = vsel %vm247_vm0, %v367_v50, %v365_v55  ;;  %v470_v58 = vld [vmem:[%s803_s0 + $0x34] sm:$0x3] }
  0x25   :  { %28 = vst [vmem:[#allocation0 + $0x160] sm:$0x3] %v452_v56  ;;  %v471_v59 = vld [vmem:[%s803_s0 + $0x32] sm:$0x3]  ;;  %v472_v60 = vld [vmem:[%s803_s0 + $0x30] sm:$0x3]  ;;  %370 = vrot.lane.b32.xlu0 %v369_v57, %s521_s10 }
  0x26   :  { %118 = vst [vmem:[#allocation0 + $0xd0] sm:$0x3] %v470_v58  ;;  %123 = vst [vmem:[#allocation0 + $0xc8] sm:$0x3] %v471_v59 }
  0x27   :  { %128 = vst [vmem:[#allocation0 + $0xc0] sm:$0x3] %v472_v60  ;;  %v245_v61 = vld [vmem:[#allocation0] ss:$8 sm:$0xf]  }
  0x28   :  { %v246_v62 = vld [vmem:[#allocation0] ss:$8 sm:$0xf0]   ;;  %v354_v63 = vld [vmem:[#allocation0 + $0x121] ss:$8 sm:$0xf0]  }
  0x29   :  { %v248_v0 = vsel %vm247_vm0, %v246_v62, %v245_v61  ;;  %v254_v1 = vld [vmem:[#allocation0 + $0x40] ss:$8 sm:$0xf]   ;;  %v352_v3 = vld [vmem:[#allocation0 + $0x121] ss:$8 sm:$0xf]  }
  0x2a   :  { %250 = vst.msk [vmem:[%s804_s1] sm:$0x7f] %vm249_vm1, %v248_v0   ;;  %496 = vst.msk [vmem:[%s804_s1 + $0x1] sm:$0x80] %vm249_vm1, %v248_v0   ;;  %v395_v4 = vld [vmem:[#allocation0 + $0xd9] sm:$0x1]   ;;  %v356_v7 = vsel %vm247_vm0, %v354_v63, %v352_v3 }
  0x2b   :  { %v256_v2 = vld [vmem:[#allocation0 + $0x40] ss:$8 sm:$0xf0]   ;;  %396 = vrot.lane.b32.xlu0 %v395_v4, %s521_s10  ;;  %v380_v8 = vld [vmem:[#allocation0 + $0x17d] sm:$0x10]   ;;  %357 = vrot.lane.b32.xlu1 %v356_v7, %s521_s10 }
  0x2c   :  { %v258_v5 = vsel %vm247_vm0, %v256_v2, %v254_v1  ;;  %v278_v6 = vld [vmem:[#allocation0 + $0xc0] ss:$8 sm:$0xf0]   ;;  %v378_v12 = vld [vmem:[#allocation0 + $0x161] ss:$8 sm:$0xf]  }
  0x2d   :  { %497 = vst.msk [vmem:[%s804_s1 + $0x9] sm:$0x3f] %vm249_vm1, %v258_v5   ;;  %498 = vst.msk [vmem:[%s804_s1 + $0xa] sm:$0xc0] %vm249_vm1, %v258_v5   ;;  %v382_v15 = vsel %vm381_vm2, %v380_v8, %v378_v12  ;;  %v309_v24 = vld [vmem:[#allocation0 + $0x180] sm:$0x1]  }
  0x2e   :  { %v287_v9 = vld [vmem:[#allocation0 + $0x100] ss:$8 sm:$0xf]   ;;  %v384_v16 = vld [vmem:[#allocation0 + $0x99] ss:$8 sm:$0xe0]  }
  0x2f   :  { %v289_v10 = vld [vmem:[#allocation0 + $0x100] ss:$8 sm:$0xf0]   ;;  %v386_v19 = vsel %vm385_vm3, %v384_v16, %v382_v15  ;;  %507 = vst.msk [vmem:[%s804_s1 + $0x36] sm:$0x1] %vm249_vm1, %v309_v24  }
  0x30   :  { %v265_v11 = vld [vmem:[#allocation0 + $0x80] ss:$8 sm:$0xf]   ;;  %v291_v13 = vsel %vm247_vm0, %v289_v10, %v287_v9  ;;  %387 = vrot.lane.b32.xlu1 %v386_v19, %s521_s10 }
  0x31   :  { %v267_v14 = vld [vmem:[#allocation0 + $0x80] ss:$8 sm:$0xf0]   ;;  %503 = vst.msk [vmem:[%s804_s1 + $0x24] sm:$0x7] %vm249_vm1, %v291_v13  }
  0x32   :  { %v276_v17 = vld [vmem:[#allocation0 + $0xc0] ss:$8 sm:$0xf]   ;;  %504 = vst.msk [vmem:[%s804_s1 + $0x25] sm:$0xf8] %vm249_vm1, %v291_v13   ;;  %v269_v18 = vsel %vm247_vm0, %v267_v14, %v265_v11 }
  0x33   :  { %v280_v20 = vsel %vm247_vm0, %v278_v6, %v276_v17  ;;  %499 = vst.msk [vmem:[%s804_s1 + $0x12] sm:$0x1f] %vm249_vm1, %v269_v18   ;;  %500 = vst.msk [vmem:[%s804_s1 + $0x13] sm:$0xe0] %vm249_vm1, %v269_v18  }
  0x34   :  { %v298_v21 = vld [vmem:[#allocation0 + $0x140] ss:$8 sm:$0xf]   ;;  %502 = vst.msk [vmem:[%s804_s1 + $0x1c] sm:$0xf0] %vm249_vm1, %v280_v20  }
  0x35   :  { %v300_v22 = vld [vmem:[#allocation0 + $0x140] ss:$8 sm:$0xf0]   ;;  %501 = vst.msk [vmem:[%s804_s1 + $0x1b] sm:$0xf] %vm249_vm1, %v280_v20  }
  0x36   :  { %v302_v23 = vsel %vm247_vm0, %v300_v22, %v298_v21 }
  0x37   :  { %505 = vst.msk [vmem:[%s804_s1 + $0x2d] sm:$0x3] %vm249_vm1, %v302_v23   ;;  %506 = vst.msk [vmem:[%s804_s1 + $0x2e] sm:$0xfc] %vm249_vm1, %v302_v23  }
  0x87   :  { %v320_v25 = vpop.permute.xlu0 %319  }
  0x88   :  { %322 = vst.msk [vmem:[%s804_s1] sm:$0x7f] %vm321_vm4, %v320_v25   ;;  %508 = vst.msk [vmem:[%s804_s1 + $0x1] sm:$0x80] %vm321_vm4, %v320_v25  }
  0x8c   :  { %v345_v26 = vpop.permute.xlu1 %344  }
  0x8d   :  { %511 = vst.msk [vmem:[%s804_s1 + $0x9] sm:$0x3f] %vm321_vm4, %v345_v26   ;;  %512 = vst.msk [vmem:[%s804_s1 + $0xa] sm:$0xc0] %vm321_vm4, %v345_v26  }
  0x90   :  { %v332_v27 = vpop.permute.xlu0 %331  }
  0x91   :  { %509 = vst.msk [vmem:[%s804_s1 + $0x20] sm:$0x7f] %vm321_vm4, %v332_v27   ;;  %510 = vst.msk [vmem:[%s804_s1 + $0x21] sm:$0x80] %vm321_vm4, %v332_v27  }
  0x97   :  { %v371_v28 = vpop.permute.xlu0 %370  }
  0x98   :  { %515 = vst.msk [vmem:[%s804_s1 + $0x12] sm:$0x1f] %vm321_vm4, %v371_v28   ;;  %516 = vst.msk [vmem:[%s804_s1 + $0x13] sm:$0xe0] %vm321_vm4, %v371_v28  }
  0x9d   :  { %v397_v29 = vpop.permute.xlu0 %396   ;;  %v358_v30 = vpop.permute.xlu1 %357  }
  0x9e   :  { %519 = vst.msk [vmem:[%s804_s1 + $0x1e] sm:$0x1] %vm321_vm4, %v397_v29   ;;  %513 = vst.msk [vmem:[%s804_s1 + $0x29] sm:$0x3f] %vm321_vm4, %v358_v30  }
  0x9f   :  { %514 = vst.msk [vmem:[%s804_s1 + $0x2a] sm:$0xc0] %vm321_vm4, %v358_v30  }
  0xa2   :  { %v388_v31 = vpop.permute.xlu1 %387  }
  0xa3   :  { %517 = vst.msk [vmem:[%s804_s1 + $0x32] sm:$0x1f] %vm321_vm4, %v388_v31   ;;  %518 = vst.msk [vmem:[%s804_s1 + $0x16] sm:$0xe0] %vm321_vm4, %v388_v31  }

// kernel: nova_forward.1
= control target key start
LH: loop header
LB: loop body
LE: loop exit
PB: predicated region body
PF: predicated region fallthrough
CT: control target
= control target key end

     0   :  { %s5439_s30 = smov 0   ;;  %s7633_s0 = inlined_call_operand.vmem [shape: f32[4,32,256], index: 0, kind: input, shape index: {}]   ;;  %s7634_s1 = inlined_call_operand.vmem [shape: f32[64,128], index: 1, kind: input, shape index: {}]   ;;  %s7635_s2 = inlined_call_operand.vmem [shape: f32[7,7,128], index: 2, kind: input, shape index: {}]   ;;  %s7636_s3 = inlined_call_operand.vmem [shape: f32[128,128], index: 3, kind: input, shape index: {}]   ;;  %s7637_s4 = inlined_call_operand.vmem [shape: f32[3,3,128], index: 4, kind: input, shape index: {}]   ;;  %s7638_s5 = inlined_call_operand.vmem [shape: f32[128,128], index: 5, kind: input, shape index: {}]   ;;  %s7639_s6 = inlined_call_operand.vmem [shape: f32[128,64], index: 6, kind: input, shape index: {}]   ;;  %s7640_s7 = inlined_call_operand.vmem [shape: f32[5,128], index: 7, kind: input, shape index: {}]   ;;  %s7641_s8 = inlined_call_operand.vmem [shape: f32[1,64], index: 8, kind: input, shape index: {}]   ;;  %s7642_s9 = inlined_call_operand.vmem [shape: f32[4,32,256], index: 9, kind: output, shape index: {}]  }
   0x1 LB: > { %s4098_s10 = sadd.s32 4294967295, %s5378_s30   ;;  %p4102_p0 = scmp.ge.s32.totalorder %s5378_s30, 1  ;;  %s5378_s30 = sphi %s5439_s30, %s19_s30  }
   0x2   : > { %p289_p1 = scmp.lt.s32.totalorder %s5378_s30, 3 }
   0x4   : > { %p290_p2 = pnand %p4102_p0, %p289_p1 }
   0x6   : > { %293 = sbr.rel (%p290_p2) target bundleno = 1787 (0x6fb), region = 56 }
   0xd   : > { %s5447_s11 = sshll.u32 %s4098_s10, 1  ;;  %v559_v0 = vld [vmem:[%s7634_s1] sm:$0xff]  ;;  %v560_v1 = vld [vmem:[%s7634_s1 + $0x8] sm:$0xff]  ;;  %v561_v2 = vld [vmem:[%s7634_s1 + $0x10] sm:$0xff]  ;;  %v5388_v4 = vmov 0.0   ;;  %vm571_vm0 = vcmask 523264  }
   0xe   : > { %p328_p3 = scmp.lt.s32.totalorder %s5447_s11, 3  ;;  %v5067_v3 = vpack.c.bf16 %v560_v1, %v559_v0  ;;  %893 = vst [vmem:[#allocation2] sm:$0xff] %v5388_v4  ;;  %894 = vst [vmem:[#allocation2 + $0x8] sm:$0xff] %v5388_v4  ;;  %v562_v5 = vld [vmem:[%s7634_s1 + $0x18] sm:$0xff]  ;;  %v563_v7 = vld [vmem:[%s7634_s1 + $0x20] sm:$0xff]  ;;  %s5739_s19 = smov 0  }
   0xf   : > { %895 = vst [vmem:[#allocation2 + $0x10] sm:$0xff] %v5388_v4  ;;  %896 = vst [vmem:[#allocation2 + $0x18] sm:$0xff] %v5388_v4  ;;  %v5071_v6 = vpack.c.bf16 %v562_v5, %v561_v2  ;;  %v564_v8 = vld [vmem:[%s7634_s1 + $0x28] sm:$0xff] }
  0x10   : > { %897 = vst [vmem:[#allocation2 + $0x20] sm:$0xff] %v5388_v4  ;;  %898 = vst [vmem:[#allocation2 + $0x28] sm:$0xff] %v5388_v4  ;;  %s7858_s11 = smov (!%p328_p3, %s5447_s11), 3  ;;  %5068 = vmatprep.subr.bf16.mxu0 %v5067_v3  ;;  %v5075_v9 = vpack.c.bf16 %v564_v8, %v563_v7 }
  0x11   : > { %899 = vst [vmem:[#allocation2 + $0x30] sm:$0xff] %v5388_v4  ;;  %900 = vst [vmem:[#allocation2 + $0x38] sm:$0xff] %v5388_v4  ;;  %5070 = vmatpush3.bf16.msra.mxu0 %v5067_v3  ;;  %s4575_s24 = sshll.u32 %s7858_s11, 6 }
  0x12   : > { %901 = vst [vmem:[#allocation2 + $0x40] sm:$0xff] %v5388_v4  ;;  %903 = vst [vmem:[#allocation2 + $0x1c8] sm:$0xff] %v5388_v4  ;;  %5072 = vmatprep.subr.bf16.mxu0 %v5071_v6  ;;  %s5474_s27 = scalar_lea.vmem %s7633_s0, %s4575_s24  ;;  %s5479_s10 = scalar_lea.vmem %s7642_s9, %s4575_s24 }
  0x13   : > { %904 = vst [vmem:[#allocation2 + $0x1d0] sm:$0xff] %v5388_v4  ;;  %905 = vst [vmem:[#allocation2 + $0x1d8] sm:$0xff] %v5388_v4  ;;  %v342_v10 = vld [vmem:[%s5474_s27] sm:$0xff]  ;;  %v344_v11 = vld [vmem:[%s5474_s27 + $0x10] sm:$0xff] }
  0x14   : > { %906 = vst [vmem:[#allocation2 + $0x1e0] sm:$0xff] %v5388_v4  ;;  %907 = vst [vmem:[#allocation2 + $0x1e8] sm:$0xff] %v5388_v4  ;;  %v346_v12 = vld [vmem:[%s5474_s27 + $0x20] sm:$0xff]  ;;  %v358_v13 = vadd.f32 %v344_v11, %v342_v10  ;;  %v352_v15 = vld [vmem:[%s5474_s27 + $0x50] sm:$0xff] }
  0x15   : > { %908 = vst [vmem:[#allocation2 + $0x1f0] sm:$0xff] %v5388_v4  ;;  %909 = vst [vmem:[#allocation2 + $0x1f8] sm:$0xff] %v5388_v4  ;;  %v350_v14 = vld [vmem:[%s5474_s27 + $0x40] sm:$0xff]  ;;  %5074 = vmatpush3.bf16.msra.mxu0 %v5071_v6  ;;  %v348_v16 = vld [vmem:[%s5474_s27 + $0x30] sm:$0xff] }
  0x16   : > { %910 = vst [vmem:[#allocation2 + $0x200] sm:$0xff] %v5388_v4  ;;  %911 = vst [vmem:[#allocation2 + $0x208] sm:$0xff] %v5388_v4  ;;  %v354_v17 = vld [vmem:[%s5474_s27 + $0x60] sm:$0xff]  ;;  %v376_v18 = vadd.f32 %v352_v15, %v350_v14  ;;  %v5489_v19 = vld [vmem:[%s5474_s27 + $0x8] sm:$0xff]  ;;  %5076 = vmatprep.subr.bf16.mxu0 %v5075_v9  ;;  %v359_v20 = vadd.f32 %v358_v13, %v346_v12 }
  0x17   : > { %913 = vst [vmem:[#allocation2 + $0x48] sm:$0x7] %v5388_v4  ;;  %914 = vst [vmem:[#allocation2 + $0x60] sm:$0x7] %v5388_v4  ;;  %v356_v21 = vld [vmem:[%s5474_s27 + $0x70] sm:$0xff]  ;;  %v5493_v22 = vld [vmem:[%s5474_s27 + $0x18] sm:$0xff] }
  0x18   : > { %915 = vst [vmem:[#allocation2 + $0x78] sm:$0x7] %v5388_v4  ;;  %916 = vst [vmem:[#allocation2 + $0x90] sm:$0x7] %v5388_v4  ;;  %v5496_v23 = vld [vmem:[%s5474_s27 + $0x28] sm:$0xff]  ;;  %v377_v24 = vadd.f32 %v376_v18, %v354_v17  ;;  %v367_v25 = vadd.f32 %v5493_v22, %v5489_v19  ;;  %v5504_v27 = vld [vmem:[%s5474_s27 + $0x58] sm:$0xff]  ;;  %v360_v29 = vadd.f32 %v359_v20, %v348_v16 }
  0x19   : > { %917 = vst [vmem:[#allocation2 + $0xa8] sm:$0x7] %v5388_v4  ;;  %918 = vst [vmem:[#allocation2 + $0xc0] sm:$0x7] %v5388_v4  ;;  %v5501_v26 = vld [vmem:[%s5474_s27 + $0x48] sm:$0xff]  ;;  %v349_v30 = vld [vmem:[%s5474_s27 + $0x38] sm:$0xff]  ;;  %5078 = vmatpush3.bf16.msra.mxu0 %v5075_v9 }
  0x1a   : > { %919 = vst [vmem:[#allocation2 + $0xd8] sm:$0x7] %v5388_v4  ;;  %920 = vst [vmem:[#allocation2 + $0xf0] sm:$0x7] %v5388_v4  ;;  %v5507_v28 = vld [vmem:[%s5474_s27 + $0x68] sm:$0xff]  ;;  %v385_v31 = vadd.f32 %v5504_v27, %v5501_v26  ;;  %v378_v32 = vadd.f32 %v377_v24, %v356_v21  ;;  %v368_v33 = vadd.f32 %v367_v25, %v5496_v23  ;;  %v5514_v34 = vld [vmem:[%s5474_s27 + $0x78] sm:$0xff] }
  0x1b   : > { %921 = vst [vmem:[#allocation2 + $0x108] sm:$0x7] %v5388_v4  ;;  %922 = vst [vmem:[#allocation2 + $0x120] sm:$0x7] %v5388_v4  ;;  %v361_v35 = vrot.slane %v360_v29, 4 }
  0x1c   : > { %923 = vst [vmem:[#allocation2 + $0x138] sm:$0x7] %v5388_v4  ;;  %924 = vst [vmem:[#allocation2 + $0x150] sm:$0x7] %v5388_v4  ;;  %v386_v36 = vadd.f32 %v385_v31, %v5507_v28  ;;  %v379_v37 = vrot.slane %v378_v32, 4  ;;  %v369_v38 = vadd.f32 %v368_v33, %v349_v30 }
  0x1d   : > { %925 = vst [vmem:[#allocation2 + $0x168] sm:$0x7] %v5388_v4  ;;  %926 = vst [vmem:[#allocation2 + $0x180] sm:$0x7] %v5388_v4  ;;  %v362_v39 = vadd.f32 %v361_v35, %v360_v29 }
  0x1e   : > { %927 = vst [vmem:[#allocation2 + $0x198] sm:$0x7] %v5388_v4  ;;  %928 = vst [vmem:[#allocation2 + $0x1b0] sm:$0x7] %v5388_v4  ;;  %v387_v40 = vadd.f32 %v386_v36, %v5514_v34  ;;  %v380_v41 = vadd.f32 %v379_v37, %v378_v32  ;;  %v370_v42 = vrot.slane %v369_v38, 4 }
  0x1f   : > { %929 = vst [vmem:[#allocation2 + $0x5b] sm:$0x1f] %v5388_v4  ;;  %930 = vst [vmem:[#allocation2 + $0x73] sm:$0x1f] %v5388_v4  ;;  %v363_v43 = vrot.slane %v362_v39, 2 }
  0x20   : > { %931 = vst [vmem:[#allocation2 + $0x8b] sm:$0x1f] %v5388_v4  ;;  %932 = vst [vmem:[#allocation2 + $0xa3] sm:$0x1f] %v5388_v4  ;;  %v388_v44 = vrot.slane %v387_v40, 4  ;;  %v381_v45 = vrot.slane %v380_v41, 2  ;;  %v371_v46 = vadd.f32 %v370_v42, %v369_v38 }
  0x21   : > { %933 = vst [vmem:[#allocation2 + $0xbb] sm:$0x1f] %v5388_v4  ;;  %934 = vst [vmem:[#allocation2 + $0xd3] sm:$0x1f] %v5388_v4  ;;  %v364_v47 = vadd.f32 %v363_v43, %v362_v39 }
  0x22   : > { %935 = vst [vmem:[#allocation2 + $0xeb] sm:$0x1f] %v5388_v4  ;;  %936 = vst [vmem:[#allocation2 + $0x103] sm:$0x1f] %v5388_v4  ;;  %v389_v48 = vadd.f32 %v388_v44, %v387_v40  ;;  %v382_v49 = vadd.f32 %v381_v45, %v380_v41  ;;  %v372_v50 = vrot.slane %v371_v46, 2 }
  0x23   : > { %937 = vst [vmem:[#allocation2 + $0x11b] sm:$0x1f] %v5388_v4  ;;  %938 = vst [vmem:[#allocation2 + $0x133] sm:$0x1f] %v5388_v4  ;;  %v365_v51 = vrot.slane %v364_v47, 1 }
  0x24   : > { %939 = vst [vmem:[#allocation2 + $0x14b] sm:$0x1f] %v5388_v4  ;;  %940 = vst [vmem:[#allocation2 + $0x163] sm:$0x1f] %v5388_v4  ;;  %v390_v52 = vrot.slane %v389_v48, 2  ;;  %v383_v53 = vrot.slane %v382_v49, 1  ;;  %v373_v54 = vadd.f32 %v372_v50, %v371_v46 }
  0x25   : > { %941 = vst [vmem:[#allocation2 + $0x17b] sm:$0x1f] %v5388_v4  ;;  %942 = vst [vmem:[#allocation2 + $0x193] sm:$0x1f] %v5388_v4  ;;  %v366_v55 = vadd.f32 %v365_v51, %v364_v47 }
  0x26   : > { %943 = vst [vmem:[#allocation2 + $0x1ab] sm:$0x1f] %v5388_v4  ;;  %944 = vst [vmem:[#allocation2 + $0x1c3] sm:$0x1f] %v5388_v4  ;;  %v391_v56 = vadd.f32 %v390_v52, %v389_v48  ;;  %v384_v57 = vadd.f32 %v383_v53, %v382_v49  ;;  %v374_v58 = vrot.slane %v373_v54, 1 }
  0x27   : > { %v395_v59 = vmul.f32 0.03125, %v366_v55 }
  0x28   : > { %v397_v60 = vmul.f32 0.03125, %v384_v57  ;;  %v375_v61 = vadd.f32 %v374_v58, %v373_v54  ;;  %v392_v62 = vrot.slane %v391_v56, 1 }
  0x29   : > { %v5518_v63 = vsub.f32 %v342_v10, %v395_v59  ;;  %v5520_v0 = vsub.f32 %v344_v11, %v395_v59  ;;  %v5522_v1 = vsub.f32 %v346_v12, %v395_v59  ;;  %v5524_v2 = vsub.f32 %v348_v16, %v395_v59 }
  0x2a   : > { %v5526_v3 = vsub.f32 %v350_v14, %v397_v60  ;;  %v5528_v4 = vsub.f32 %v352_v15, %v397_v60  ;;  %v5530_v5 = vsub.f32 %v354_v17, %v397_v60  ;;  %v5532_v6 = vsub.f32 %v356_v21, %v397_v60 }
  0x2b   : > { %v415_v7 = vmul.f32 %v5518_v63, %v5518_v63  ;;  %v417_v8 = vmul.f32 %v5520_v0, %v5520_v0  ;;  %v419_v9 = vmul.f32 %v5522_v1, %v5522_v1  ;;  %v421_v13 = vmul.f32 %v5524_v2, %v5524_v2 }
  0x2c   : > { %v423_v10 = vmul.f32 %v5526_v3, %v5526_v3  ;;  %v425_v11 = vmul.f32 %v5528_v4, %v5528_v4  ;;  %v427_v12 = vmul.f32 %v5530_v5, %v5530_v5  ;;  %v396_v15 = vmul.f32 0.03125, %v375_v61 }
  0x2d   : > { %v431_v14 = vadd.f32 %v417_v8, %v415_v7  ;;  %v393_v16 = vadd.f32 %v392_v62, %v391_v56  ;;  %v429_v17 = vmul.f32 %v5532_v6, %v5532_v6 }
  0x2e   : > { %v449_v18 = vadd.f32 %v425_v11, %v423_v10  ;;  %v5551_v21 = vsub.f32 %v5489_v19, %v396_v15  ;;  %v5554_v24 = vsub.f32 %v5493_v22, %v396_v15  ;;  %v5557_v25 = vsub.f32 %v5496_v23, %v396_v15 }
  0x2f   : > { %v432_v20 = vadd.f32 %v431_v14, %v419_v9  ;;  %v5559_v31 = vsub.f32 %v349_v30, %v396_v15  ;;  %v398_v32 = vmul.f32 0.03125, %v393_v16 }
  0x30   : > { %v450_v29 = vadd.f32 %v449_v18, %v427_v12  ;;  %v416_v35 = vmul.f32 %v5551_v21, %v5551_v21  ;;  %v418_v36 = vmul.f32 %v5554_v24, %v5554_v24  ;;  %v420_v19 = vmul.f32 %v5557_v25, %v5557_v25 }
  0x31   : > { %v433_v33 = vadd.f32 %v432_v20, %v421_v13  ;;  %v422_v22 = vmul.f32 %v5559_v31, %v5559_v31  ;;  %v5570_v23 = vsub.f32 %v5501_v26, %v398_v32  ;;  %v5573_v30 = vsub.f32 %v5504_v27, %v398_v32 }
  0x32   : > { %v451_v37 = vadd.f32 %v450_v29, %v429_v17  ;;  %v440_v39 = vadd.f32 %v418_v36, %v416_v35  ;;  %v5576_v40 = vsub.f32 %v5507_v28, %v398_v32  ;;  %v5579_v41 = vsub.f32 %v5514_v34, %v398_v32  ;;  %v565_v35 = vld [vmem:[%s7634_s1 + $0x30] sm:$0xff]  ;;  %v566_v36 = vld [vmem:[%s7634_s1 + $0x38] sm:$0xff] }
  0x33   : > { %v434_v38 = vrot.slane %v433_v33, 4  ;;  %v424_v43 = vmul.f32 %v5570_v23, %v5570_v23  ;;  %v426_v44 = vmul.f32 %v5573_v30, %v5573_v30 }
  0x34   : > { %v452_v42 = vrot.slane %v451_v37, 4  ;;  %v441_v45 = vadd.f32 %v440_v39, %v420_v19  ;;  %v428_v27 = vmul.f32 %v5576_v40, %v5576_v40  ;;  %v430_v28 = vmul.f32 %v5579_v41, %v5579_v41 }
  0x35   : > { %v435_v26 = vadd.f32 %v434_v38, %v433_v33  ;;  %v458_v47 = vadd.f32 %v426_v44, %v424_v43 }
  0x36   : > { %v453_v46 = vadd.f32 %v452_v42, %v451_v37  ;;  %v442_v34 = vadd.f32 %v441_v45, %v422_v22  ;;  %v5079_v37 = vpack.c.bf16 %v566_v36, %v565_v35  ;;  %v567_v35 = vlaneseq }
  0x37   : > { %v436_v48 = vrot.slane %v435_v26, 2  ;;  %v459_v50 = vadd.f32 %v458_v47, %v428_v27 }
  0x38   : > { %v454_v49 = vrot.slane %v453_v46, 2  ;;  %v443_v52 = vrot.slane %v442_v34, 4  ;;  %5080 = vmatprep.subr.bf16.mxu0 %v5079_v37  ;;  %v5693_v36 = vshrl.u32 %v567_v35, 7 }
  0x39   : > { %v437_v51 = vadd.f32 %v436_v48, %v435_v26  ;;  %v460_v53 = vadd.f32 %v459_v50, %v430_v28  ;;  %5082 = vmatpush3.bf16.msra.mxu0 %v5079_v37  ;;  %v5701_v37 = vld [vmem:[%s7640_s7] sm:$0x1f] }
  0x3a   : > { %v455_v55 = vadd.f32 %v454_v49, %v453_v46  ;;  %v444_v56 = vadd.f32 %v443_v52, %v442_v34  ;;  %7736 = vst [vmem:[#allocation14_spill] sm:$0xff] %v5693_v36  ;;  %7738 = vst [vmem:[#allocation16_spill] sm:$0xff] %v5701_v37 }
  0x3b   : > { %v438_v54 = vrot.slane %v437_v51, 1  ;;  %v461_v57 = vrot.slane %v460_v53, 4 }
  0x3c   : > { %v445_v59 = vrot.slane %v444_v56, 2  ;;  %v456_v62 = vrot.slane %v455_v55, 1 }
  0x3d   : > { %v439_v58 = vadd.f32 %v438_v54, %v437_v51  ;;  %v462_v60 = vadd.f32 %v461_v57, %v460_v53 }
  0x3e   : > { %v446_v7 = vadd.f32 %v445_v59, %v444_v56  ;;  %v457_v12 = vadd.f32 %v456_v62, %v455_v55 }
  0x3f   : > { %v467_v61 = vmul.f32 0.03125, %v439_v58  ;;  %v463_v8 = vrot.slane %v462_v60, 2 }
  0x40   : > { %v447_v10 = vrot.slane %v446_v7, 1  ;;  %v469_v16 = vmul.f32 0.03125, %v457_v12 }
  0x41   : > { %v471_v9 = vadd.f32 1e-05, %v467_v61  ;;  %v464_v11 = vadd.f32 %v463_v8, %v462_v60 }
  0x42   : > { %v448_v13 = vadd.f32 %v447_v10, %v446_v7  ;;  %v473_v20 = vadd.f32 1e-05, %v469_v16  ;;  %v5661_v16 = vld [vmem:[%s7635_s2 + $0x18] sm:$0x7f] }
  0x43   : > { %5220 = vrsqrt.f32 %v471_v9  ;;  %v465_v15 = vrot.slane %v464_v11, 1  ;;  %7729 = vst [vmem:[#allocation7_spill] sm:$0xff] %v5661_v16 }
  0x44   : > { %v468_v14 = vmul.f32 0.03125, %v448_v13  ;;  %v5646_v13 = vld [vmem:[%s7635_s2] sm:$0x7f] }
  0x45   : > { %v466_v18 = vadd.f32 %v465_v15, %v464_v11  ;;  %7726 = vst [vmem:[#allocation4_spill] sm:$0xff] %v5646_v13  ;;  %v5656_v15 = vld [vmem:[%s7635_s2 + $0x10] sm:$0x7f] }
  0x46   : > { %v472_v17 = vadd.f32 1e-05, %v468_v14  ;;  %v5651_v14 = vld [vmem:[%s7635_s2 + $0x8] sm:$0x7f]  ;;  %7728 = vst [vmem:[#allocation6_spill] sm:$0xff] %v5656_v15 }
  0x47   : > { %v470_v32 = vmul.f32 0.03125, %v466_v18  ;;  %7727 = vst [vmem:[#allocation5_spill] sm:$0xff] %v5651_v14  ;;  %v5671_v18 = vld [vmem:[%s7635_s2 + $0x28] sm:$0x7f] }
  0x48   : > { %5222 = vrsqrt.f32 %v472_v17  ;;  %v5666_v17 = vld [vmem:[%s7635_s2 + $0x20] sm:$0x7f]  ;;  %7731 = vst [vmem:[#allocation9_spill] sm:$0xff] %v5671_v18 }
  0x49   : > { %5224 = vrsqrt.f32 %v473_v20  ;;  %v474_v22 = vadd.f32 1e-05, %v470_v32  ;;  %7730 = vst [vmem:[#allocation8_spill] sm:$0xff] %v5666_v17  ;;  %v5676_v20 = vld [vmem:[%s7635_s2 + $0x30] sm:$0x7f] }
  0x4a   : > { %7732 = vst [vmem:[#allocation10_spill] sm:$0xff] %v5676_v20  ;;  %v5686_v32 = vld [vmem:[%s7637_s4 + $0x4] sm:$0x7] }
  0x4b   : > { %5226 = vrsqrt.f32 %v474_v22  ;;  %7734 = vst [vmem:[#allocation12_spill] sm:$0xff] %v5686_v32 }
  0x4d   : > { %v5221_v29 = vpop.eup %5220 }
  0x4e   : > { %v479_v33 = vmul.f32 %v5221_v29, %v5518_v63  ;;  %v481_v19 = vmul.f32 %v5221_v29, %v5520_v0  ;;  %v483_v63 = vmul.f32 %v5221_v29, %v5522_v1  ;;  %v485_v43 = vmul.f32 %v5221_v29, %v5524_v2  ;;  %v5681_v29 = vld [vmem:[%s7637_s4] sm:$0x7] }
  0x4f   : > { %7733 = vst [vmem:[#allocation11_spill] sm:$0xff] %v5681_v29 }
  0x50   : > { %495 = vxpose.xlu0.b32.start [1/8] (short) %v479_v33, 128  ;;  %v5691_v33 = vld [vmem:[%s7637_s4 + $0x8] sm:$0x7] }
  0x51   : > { %7735 = vst [vmem:[#allocation13_spill] sm:$0xff] %v5691_v33 }
  0x52   : > { %v5223_v38 = vpop.eup %5222 }
  0x53   : > { %v480_v39 = vmul.f32 %v5223_v38, %v5551_v21  ;;  %v482_v42 = vmul.f32 %v5223_v38, %v5554_v24  ;;  %v5225_v44 = vpop.eup %5224  ;;  %v484_v0 = vmul.f32 %v5223_v38, %v5557_v25  ;;  %v486_v45 = vmul.f32 %v5223_v38, %v5559_v31 }
  0x54   : > { %496 = vxpose.xlu0.b32.cont [2/8] (short) %v481_v19, 128  ;;  %v487_v26 = vmul.f32 %v5225_v44, %v5526_v3  ;;  %v489_v21 = vmul.f32 %v5225_v44, %v5528_v4  ;;  %v491_v2 = vmul.f32 %v5225_v44, %v5530_v5  ;;  %v493_v25 = vmul.f32 %v5225_v44, %v5532_v6 }
  0x55   : > { %527 = vxpose.xlu1.b32.start [1/8] (short) %v480_v39, 128  ;;  %v5227_v1 = vpop.eup %5226  ;;  %v5696_v19 = vsub.s32 0, %v5693_v36 }
  0x56   : > { %v488_v24 = vmul.f32 %v5227_v1, %v5570_v23  ;;  %v490_v27 = vmul.f32 %v5227_v1, %v5573_v30  ;;  %v492_v3 = vmul.f32 %v5227_v1, %v5576_v40  ;;  %v494_v31 = vmul.f32 %v5227_v1, %v5579_v41 }
  0x57   : > { %7737 = vst [vmem:[#allocation15_spill] sm:$0xff] %v5696_v19  ;;  %v5705_v22 = vrot.slane %v5701_v37, %v5696_v19 }
  0x58   : > { %497 = vxpose.xlu0.b32.cont [3/8] (short) %v483_v63, 128 }
  0x59   : > { %528 = vxpose.xlu1.b32.cont [2/8] (short) %v482_v42, 128 }
  0x5c   : > { %498 = vxpose.xlu0.b32.cont [4/8] (short) %v485_v43, 128 }
  0x5d   : > { %529 = vxpose.xlu1.b32.cont [3/8] (short) %v484_v0, 128 }
  0x60   : > { %499 = vxpose.xlu0.b32.cont [5/8] (short) %v487_v26, 128 }
  0x61   : > { %530 = vxpose.xlu1.b32.cont [4/8] (short) %v486_v45, 128 }
  0x64   : > { %500 = vxpose.xlu0.b32.cont [6/8] (short) %v489_v21, 128 }
  0x65   : > { %531 = vxpose.xlu1.b32.cont [5/8] (short) %v488_v24, 128 }
  0x68   : > { %501 = vxpose.xlu0.b32.cont [7/8] (short) %v491_v2, 128 }
  0x69   : > { %532 = vxpose.xlu1.b32.cont [6/8] (short) %v490_v27, 128 }
  0x6c   : > { %502 = vxpose.xlu0.b32.end [8/8] (short) %v493_v25, 128 }
  0x6d   : > { %533 = vxpose.xlu1.b32.cont [7/8] (short) %v492_v3, 128 }
  0x71   : > { %534 = vxpose.xlu1.b32.end [8/8] (short) %v494_v31, 128 }
  0xd0   : > { %v511_v4 = vpop.trf.xlu0 }
  0xd1   : > { %4779 = vmatprep.mubr.msk.f32.mxu0 %vm571_vm0, %v511_v4 }
  0xd4   : > { %v512_v23 = vpop.trf.xlu0 }
  0xd5   : > { %4780 = vmatmul.mubr.msk.f32.vlgmr.msra.gmra.mrb[0].mxu0 %vm571_vm0, %v512_v23  ;;  %v543_v5 = vpop.trf.xlu1 }
  0xd8   : > { %v513_v30 = vpop.trf.xlu0 }
  0xd9   : > { %4782 = vmatprep.mubr.msk.f32.mxu0 %vm571_vm0, %v513_v30  ;;  %v544_v6 = vpop.trf.xlu1 }
  0xdc   : > { %v514_v46 = vpop.trf.xlu0 }
  0xdd   : > { %4783 = vmatmul.mubr.msk.f32.gmra.mrb[2].mxu0 %vm571_vm0, %v514_v46  ;;  %v545_v40 = vpop.trf.xlu1 }
  0xe0   : > { %v515_v28 = vpop.trf.xlu0 }
  0xe1   : > { %4785 = vmatprep.mubr.msk.f32.mxu0 %vm571_vm0, %v515_v28  ;;  %v546_v41 = vpop.trf.xlu1 }
  0xe4   : > { %v516_v47 = vpop.trf.xlu0 }
  0xe5   : > { %4786 = vmatmul.mubr.msk.f32.gmra.mrb[4].mxu0 %vm571_vm0, %v516_v47  ;;  %v547_v34 = vpop.trf.xlu1 }
  0xe8   : > { %v517_v48 = vpop.trf.xlu0 }
  0xe9   : > { %4788 = vmatprep.mubr.msk.f32.mxu0 %vm571_vm0, %v517_v48  ;;  %v548_v50 = vpop.trf.xlu1 }
  0xec   : > { %v518_v49 = vpop.trf.xlu0 }
  0xed   : > { %4789 = vmatmul.mubr.msk.f32.gmra.mrb[6].mxu0 %vm571_vm0, %v518_v49  ;;  %v549_v53 = vpop.trf.xlu1 }
  0xf0   : > { %v519_v51 = vpop.trf.xlu0 }
  0xf1   : > { %4791 = vmatprep.mubr.msk.f32.mxu0 %vm571_vm0, %v519_v51  ;;  %v550_v55 = vpop.trf.xlu1 }
  0xf4   : > { %v520_v52 = vpop.trf.xlu0 }
  0xf5   : > { %4792 = vmatmul.mubr.msk.f32.gmra.mrb[8].mxu0 %vm571_vm0, %v520_v52  ;;  %v551_v58 = vpop.trf.xlu1 }
  0xf8   : > { %v521_v54 = vpop.trf.xlu0 }
  0xf9   : > { %4794 = vmatprep.mubr.msk.f32.mxu0 %vm571_vm0, %v521_v54  ;;  %v552_v60 = vpop.trf.xlu1 }
  0xfc   : > { %v522_v56 = vpop.trf.xlu0 }
  0xfd   : > { %4795 = vmatmul.mubr.msk.f32.gmra.mrb[10].mxu0 %vm571_vm0, %v522_v56  ;;  %v553_v7 = vpop.trf.xlu1 }
 0x100   : > { %v523_v57 = vpop.trf.xlu0 }
 0x101   : > { %4797 = vmatprep.mubr.msk.f32.mxu0 %vm571_vm0, %v523_v57  ;;  %v554_v8 = vpop.trf.xlu1 }
 0x104   : > { %v524_v59 = vpop.trf.xlu0 }
 0x105   : > { %4798 = vmatmul.mubr.msk.f32.gmra.mrb[12].mxu0 %vm571_vm0, %v524_v59  ;;  %v555_v9 = vpop.trf.xlu1 }
 0x108   : > { %v525_v61 = vpop.trf.xlu0 }
 0x109   : > { %4800 = vmatprep.mubr.msk.f32.mxu0 %vm571_vm0, %v525_v61  ;;  %v556_v10 = vpop.trf.xlu1 }
 0x10c   : > { %v526_v62 = vpop.trf.xlu0 }
 0x10d   : > { %4801 = vmatmul.mubr.msk.f32.gmra.mrb[14].mxu0 %vm571_vm0, %v526_v62  ;;  %v557_v11 = vpop.trf.xlu1 }
 0x10e   : > { %4803 = vmatprep.mubr.msk.f32.mxu0 %vm571_vm0, %v543_v5 }
 0x111   : > { %4804 = vmatmul.mubr.msk.f32.gmra.mrb[16].mxu0 %vm571_vm0, %v544_v6  ;;  %v558_v12 = vpop.trf.xlu1 }
 0x112   : > { %4806 = vmatprep.mubr.msk.f32.mxu0 %vm571_vm0, %v545_v40 }
 0x115   : > { %4807 = vmatmul.mubr.msk.f32.gmra.mrb[18].mxu0 %vm571_vm0, %v546_v41 }
 0x116   : > { %4809 = vmatprep.mubr.msk.f32.mxu0 %vm571_vm0, %v547_v34 }
 0x119   : > { %4810 = vmatmul.mubr.msk.f32.gmra.mrb[20].mxu0 %vm571_vm0, %v548_v50 }
 0x11a   : > { %4812 = vmatprep.mubr.msk.f32.mxu0 %vm571_vm0, %v549_v53 }
 0x11d   : > { %4813 = vmatmul.mubr.msk.f32.gmra.mrb[22].mxu0 %vm571_vm0, %v550_v55 }
 0x11e   : > { %4815 = vmatprep.mubr.msk.f32.mxu0 %vm571_vm0, %v551_v58 }
 0x121   : > { %4816 = vmatmul.mubr.msk.f32.gmra.mrb[24].mxu0 %vm571_vm0, %v552_v60 }
 0x122   : > { %4818 = vmatprep.mubr.msk.f32.mxu0 %vm571_vm0, %v553_v7 }
 0x125   : > { %4819 = vmatmul.mubr.msk.f32.gmra.mrb[26].mxu0 %vm571_vm0, %v554_v8 }
 0x126   : > { %4821 = vmatprep.mubr.msk.f32.mxu0 %vm571_vm0, %v555_v9 }
 0x129   : > { %4822 = vmatmul.mubr.msk.f32.gmra.mrb[28].mxu0 %vm571_vm0, %v556_v10 }
 0x12a   : > { %4824 = vmatprep.mubr.msk.f32.mxu0 %vm571_vm0, %v557_v11 }
 0x12d   : > { %4825 = vmatmul.mubr.msk.f32.gmra.mrb[30].mxu0 %vm571_vm0, %v558_v12 }
 0x1a8   : > { %v4781_v38 = vpop.f32.mrb[0].mxu0 }
 0x1a9   : > { %v740_v63 = vadd.f32 %v4781_v38, %v5705_v22  ;;  %v734_v39 = vpop.f32.mrb[1].mxu0 }
 0x1aa   : > { %v735_v42 = vadd.f32 %v734_v39, %v5705_v22 }
 0x1ab   : > { %946 = vst [vmem:[#allocation2 + $0x53] sm:$0xff] %v740_v63 }
 0x1ac   : > { %945 = vst [vmem:[#allocation2 + $0x4b] sm:$0xff] %v735_v42 }
 0x1b0   : > { %v4784_v43 = vpop.f32.mrb[2].mxu0 }
 0x1b1   : > { %v750_v44 = vadd.f32 %v4784_v43, %v5705_v22  ;;  %v744_v0 = vpop.f32.mrb[3].mxu0 }
 0x1b2   : > { %v745_v26 = vadd.f32 %v744_v0, %v5705_v22 }
 0x1b3   : > { %948 = vst [vmem:[#allocation2 + $0x6b] sm:$0xff] %v750_v44 }
 0x1b4   : > { %947 = vst [vmem:[#allocation2 + $0x63] sm:$0xff] %v745_v26 }
 0x1b8   : > { %v4787_v45 = vpop.f32.mrb[4].mxu0 }
 0x1b9   : > { %v760_v1 = vadd.f32 %v4787_v45, %v5705_v22  ;;  %v754_v21 = vpop.f32.mrb[5].mxu0 }
 0x1ba   : > { %v755_v24 = vadd.f32 %v754_v21, %v5705_v22 }
 0x1bb   : > { %950 = vst [vmem:[#allocation2 + $0x83] sm:$0xff] %v760_v1 }
 0x1bc   : > { %949 = vst [vmem:[#allocation2 + $0x7b] sm:$0xff] %v755_v24 }
 0x1c0   : > { %v4790_v2 = vpop.f32.mrb[6].mxu0 }
 0x1c1   : > { %v770_v27 = vadd.f32 %v4790_v2, %v5705_v22  ;;  %v764_v25 = vpop.f32.mrb[7].mxu0 }
 0x1c2   : > { %v765_v3 = vadd.f32 %v764_v25, %v5705_v22 }
 0x1c3   : > { %952 = vst [vmem:[#allocation2 + $0x9b] sm:$0xff] %v770_v27 }
 0x1c4   : > { %951 = vst [vmem:[#allocation2 + $0x93] sm:$0xff] %v765_v3 }
 0x1c8   : > { %v4793_v31 = vpop.f32.mrb[8].mxu0 }
 0x1c9   : > { %v780_v4 = vadd.f32 %v4793_v31, %v5705_v22  ;;  %v774_v23 = vpop.f32.mrb[9].mxu0 }
 0x1ca   : > { %v775_v5 = vadd.f32 %v774_v23, %v5705_v22 }
 0x1cb   : > { %954 = vst [vmem:[#allocation2 + $0xb3] sm:$0xff] %v780_v4 }
 0x1cc   : > { %953 = vst [vmem:[#allocation2 + $0xab] sm:$0xff] %v775_v5 }
 0x1d0   : > { %v4796_v30 = vpop.f32.mrb[10].mxu0 }
 0x1d1   : > { %v790_v6 = vadd.f32 %v4796_v30, %v5705_v22  ;;  %v784_v46 = vpop.f32.mrb[11].mxu0 }
 0x1d2   : > { %v785_v40 = vadd.f32 %v784_v46, %v5705_v22 }
 0x1d3   : > { %956 = vst [vmem:[#allocation2 + $0xcb] sm:$0xff] %v790_v6 }
 0x1d4   : > { %955 = vst [vmem:[#allocation2 + $0xc3] sm:$0xff] %v785_v40 }
 0x1d8   : > { %v4799_v28 = vpop.f32.mrb[12].mxu0 }
 0x1d9   : > { %v800_v41 = vadd.f32 %v4799_v28, %v5705_v22  ;;  %v794_v47 = vpop.f32.mrb[13].mxu0 }
 0x1da   : > { %v795_v48 = vadd.f32 %v794_v47, %v5705_v22 }
 0x1db   : > { %958 = vst [vmem:[#allocation2 + $0xe3] sm:$0xff] %v800_v41 }
 0x1dc   : > { %957 = vst [vmem:[#allocation2 + $0xdb] sm:$0xff] %v795_v48 }
 0x1e0   : > { %v4802_v34 = vpop.f32.mrb[14].mxu0 }
 0x1e1   : > { %v810_v49 = vadd.f32 %v4802_v34, %v5705_v22  ;;  %v804_v50 = vpop.f32.mrb[15].mxu0 }
 0x1e2   : > { %v805_v51 = vadd.f32 %v804_v50, %v5705_v22 }
 0x1e3   : > { %960 = vst [vmem:[#allocation2 + $0xfb] sm:$0xff] %v810_v49 }
 0x1e4   : > { %959 = vst [vmem:[#allocation2 + $0xf3] sm:$0xff] %v805_v51  ;;  %v4805_v52 = vpop.f32.mrb[16].mxu0 }
 0x1e5   : > { %v820_v53 = vadd.f32 %v4805_v52, %v5705_v22  ;;  %v814_v54 = vpop.f32.mrb[17].mxu0 }
 0x1e6   : > { %v815_v55 = vadd.f32 %v814_v54, %v5705_v22 }
 0x1e7   : > { %962 = vst [vmem:[#allocation2 + $0x113] sm:$0xff] %v820_v53 }
 0x1e8   : > { %961 = vst [vmem:[#allocation2 + $0x10b] sm:$0xff] %v815_v55  ;;  %v4808_v56 = vpop.f32.mrb[18].mxu0 }
 0x1e9   : > { %v830_v57 = vadd.f32 %v4808_v56, %v5705_v22  ;;  %v824_v58 = vpop.f32.mrb[19].mxu0 }
 0x1ea   : > { %v825_v59 = vadd.f32 %v824_v58, %v5705_v22 }
 0x1eb   : > { %964 = vst [vmem:[#allocation2 + $0x12b] sm:$0xff] %v830_v57 }
 0x1ec   : > { %963 = vst [vmem:[#allocation2 + $0x123] sm:$0xff] %v825_v59  ;;  %v4811_v60 = vpop.f32.mrb[20].mxu0 }
 0x1ed   : > { %v840_v61 = vadd.f32 %v4811_v60, %v5705_v22  ;;  %v834_v62 = vpop.f32.mrb[21].mxu0 }
 0x1ee   : > { %v835_v7 = vadd.f32 %v834_v62, %v5705_v22 }
 0x1ef   : > { %966 = vst [vmem:[#allocation2 + $0x143] sm:$0xff] %v840_v61 }
 0x1f0   : > { %965 = vst [vmem:[#allocation2 + $0x13b] sm:$0xff] %v835_v7  ;;  %v4814_v8 = vpop.f32.mrb[22].mxu0 }
 0x1f1   : > { %v850_v9 = vadd.f32 %v4814_v8, %v5705_v22  ;;  %v844_v10 = vpop.f32.mrb[23].mxu0 }
 0x1f2   : > { %v845_v11 = vadd.f32 %v844_v10, %v5705_v22 }
 0x1f3   : > { %968 = vst [vmem:[#allocation2 + $0x15b] sm:$0xff] %v850_v9 }
 0x1f4   : > { %967 = vst [vmem:[#allocation2 + $0x153] sm:$0xff] %v845_v11  ;;  %v4817_v12 = vpop.f32.mrb[24].mxu0 }
 0x1f5   : > { %v860_v35 = vadd.f32 %v4817_v12, %v5705_v22  ;;  %v854_v38 = vpop.f32.mrb[25].mxu0 }
 0x1f6   : > { %v855_v63 = vadd.f32 %v854_v38, %v5705_v22 }
 0x1f7   : > { %970 = vst [vmem:[#allocation2 + $0x173] sm:$0xff] %v860_v35 }
 0x1f8   : > { %969 = vst [vmem:[#allocation2 + $0x16b] sm:$0xff] %v855_v63  ;;  %v4820_v39 = vpop.f32.mrb[26].mxu0 }
 0x1f9   : > { %v870_v42 = vadd.f32 %v4820_v39, %v5705_v22  ;;  %v864_v43 = vpop.f32.mrb[27].mxu0 }
 0x1fa   : > { %v865_v44 = vadd.f32 %v864_v43, %v5705_v22 }
 0x1fb   : > { %972 = vst [vmem:[#allocation2 + $0x18b] sm:$0xff] %v870_v42 }
 0x1fc   : > { %971 = vst [vmem:[#allocation2 + $0x183] sm:$0xff] %v865_v44  ;;  %v4823_v0 = vpop.f32.mrb[28].mxu0 }
 0x1fd   : > { %v880_v26 = vadd.f32 %v4823_v0, %v5705_v22  ;;  %v874_v45 = vpop.f32.mrb[29].mxu0 }
 0x1fe   : > { %v875_v1 = vadd.f32 %v874_v45, %v5705_v22 }
 0x1ff   : > { %974 = vst [vmem:[#allocation2 + $0x1a3] sm:$0xff] %v880_v26 }
 0x200   : > { %973 = vst [vmem:[#allocation2 + $0x19b] sm:$0xff] %v875_v1  ;;  %v4826_v21 = vpop.f32.mrb[30].mxu0 }
 0x201   : > { %v890_v24 = vadd.f32 %v4826_v21, %v5705_v22  ;;  %v884_v2 = vpop.f32.mrb[31].mxu0 }
 0x202   : > { %v885_v27 = vadd.f32 %v884_v2, %v5705_v22 }
 0x203   : > { %976 = vst [vmem:[#allocation2 + $0x1bb] sm:$0xff] %v890_v24 }
 0x204   : > { %975 = vst [vmem:[#allocation2 + $0x1b3] sm:$0xff] %v885_v27 }
 0x205 LB: >> { %v7739_v15 = vld [vmem:[#allocation6_spill] sm:$0xff]  ;;  %v7740_v19 = vld [vmem:[#allocation15_spill] sm:$0xff]  ;;  %v7742_v14 = vld [vmem:[#allocation5_spill] sm:$0xff]  ;;  %s4142_s20 = smul.u32 96, %s5382_s19  ;;  %s4577_s22 = sshll.u32 %s5382_s19, 6  ;;  %s5382_s19 = sphi %s5739_s19, %s992_s19  }
 0x206   : >> { %v7741_v36 = vld [vmem:[#allocation14_spill] sm:$0xff]  ;;  %v7743_v13 = vld [vmem:[#allocation4_spill] sm:$0xff]  ;;  %v5766_v30 = vrot.slane %v7742_v14, %v7740_v19  ;;  %v5822_v56 = vrot.slane %v7739_v15, %v7740_v19  ;;  %s2407_s23 = scalar_lea.vmem [#allocation3], %s4577_s22  ;;  %s992_s19 = sadd.s32 1, %s5382_s19  }
 0x207   : >> { %v1007_v25 = vrot.slane %v7743_v13, %v7740_v19  ;;  %v5747_v3 = vsub.s32 1, %v7741_v36  ;;  %v5750_v31 = vsub.s32 2, %v7741_v36  ;;  %v5753_v22 = vsub.s32 3, %v7741_v36  ;;  %s5815_s21 = scalar_lea.vmem [#allocation2], %s4142_s20  ;;  %p989_p4 = scmp.ge.s32.totalorder %s992_s19, 4  }
 0x208   : >> { %v5756_v4 = vsub.s32 4, %v7741_v36  ;;  %v5759_v23 = vsub.s32 5, %v7741_v36  ;;  %v5762_v5 = vsub.s32 6, %v7741_v36  ;;  %7753 = vst [vmem:[#allocation26_spill] sm:$0xff] %v5822_v56  ;;  %s7125_s20 = smov (%p989_p4), 0  }
 0x209   : >> { %7744 = vst [vmem:[#allocation17_spill] sm:$0xff] %v5747_v3  ;;  %7745 = vst [vmem:[#allocation18_spill] sm:$0xff] %v5750_v31  ;;  %v1035_v6 = vrot.slane %v7743_v13, %v5747_v3  ;;  %v5773_v46 = vrot.slane %v7743_v13, %v5750_v31  ;;  %v5777_v40 = vrot.slane %v7743_v13, %v5753_v22 }
 0x20a   : >> { %7746 = vst [vmem:[#allocation19_spill] sm:$0xff] %v5753_v22  ;;  %7747 = vst [vmem:[#allocation20_spill] sm:$0xff] %v5756_v4  ;;  %v5781_v28 = vrot.slane %v7742_v14, %v5747_v3  ;;  %v5785_v41 = vrot.slane %v7743_v13, %v5756_v4  ;;  %v5789_v47 = vrot.slane %v7743_v13, %v5759_v23 }
 0x20b   : >> { %7748 = vst [vmem:[#allocation21_spill] sm:$0xff] %v5759_v23  ;;  %7749 = vst [vmem:[#allocation22_spill] sm:$0xff] %v5762_v5  ;;  %v5793_v48 = vrot.slane %v7743_v13, %v5762_v5  ;;  %v5797_v34 = vrot.slane %v7742_v14, %v5750_v31  ;;  %v5801_v49 = vrot.slane %v7742_v14, %v5753_v22  ;;  %v996_v53 = vld [vmem:[%s5815_s21] sm:$0xff]  ;;  %v997_v54 = vld [vmem:[%s5815_s21 + $0x8] sm:$0xff] }
 0x20c   : >> { %v5805_v50 = vrot.slane %v7742_v14, %v5756_v4  ;;  %v5809_v51 = vrot.slane %v7742_v14, %v5759_v23  ;;  %v5813_v52 = vrot.slane %v7742_v14, %v5762_v5  ;;  %v998_v55 = vld [vmem:[%s5815_s21 + $0x18] sm:$0xff]  ;;  %v5826_v57 = vrot.slane %v7739_v15, %v5747_v3  ;;  %v999_v60 = vld [vmem:[%s5815_s21 + $0x20] sm:$0xff]  ;;  %v5838_v61 = vld [vmem:[%s5815_s21 + $0x30] sm:$0xff] }
 0x20d   : >> { %v5830_v58 = vrot.slane %v7739_v15, %v5750_v31  ;;  %v5834_v59 = vrot.slane %v7739_v15, %v5753_v22  ;;  %7757 = vst [vmem:[#allocation30_spill] sm:$0xff] %v5838_v61  ;;  %v5841_v62 = vld [vmem:[%s5815_s21 + $0x38] sm:$0xff]  ;;  %v1008_v7 = vmul.f32 %v1007_v25, %v996_v53  ;;  %v1009_v8 = vmul.f32 %v1007_v25, %v997_v54  ;;  %v5847_v11 = vld [vmem:[%s5815_s21 + $0x48] sm:$0xff]  ;;  %v5850_v12 = vld [vmem:[%s5815_s21 + $0x50] sm:$0xff] }
 0x20e   : >> { %7750 = vst [vmem:[#allocation23_spill] sm:$0xff] %v5805_v50  ;;  %7751 = vst [vmem:[#allocation24_spill] sm:$0xff] %v5809_v51  ;;  %v1010_v9 = vmul.f32 %v1007_v25, %v998_v55  ;;  %v5844_v10 = vmul.f32 %v5766_v30, %v998_v55  ;;  %v1011_v35 = vmul.f32 %v1007_v25, %v999_v60  ;;  %v1024_v39 = vld [vmem:[%s5815_s21 + $0x1] sm:$0xff]  ;;  %v1025_v0 = vld [vmem:[%s5815_s21 + $0x9] sm:$0xff] }
 0x20f   : >> { %7752 = vst [vmem:[#allocation25_spill] sm:$0xff] %v5813_v52  ;;  %7754 = vst [vmem:[#allocation27_spill] sm:$0xff] %v5826_v57  ;;  %v1012_v38 = vmul.f32 %v1007_v25, %v5838_v61  ;;  %v1013_v63 = vmul.f32 %v1007_v25, %v5841_v62  ;;  %v5856_v42 = vmul.f32 %v5766_v30, %v999_v60  ;;  %v5862_v26 = vld [vmem:[%s5815_s21 + $0x19] sm:$0xff]  ;;  %v5865_v45 = vld [vmem:[%s5815_s21 + $0x21] sm:$0xff] }
 0x210   : >> { %7755 = vst [vmem:[#allocation28_spill] sm:$0xff] %v5830_v58  ;;  %7756 = vst [vmem:[#allocation29_spill] sm:$0xff] %v5834_v59  ;;  %v1014_v43 = vmul.f32 %v1007_v25, %v5847_v11  ;;  %v1015_v44 = vmul.f32 %v1007_v25, %v5850_v12  ;;  %v1036_v1 = vmul.f32 %v1035_v6, %v1024_v39  ;;  %v5872_v24 = vld [vmem:[%s5815_s21 + $0x31] sm:$0xff]  ;;  %v5875_v2 = vld [vmem:[%s5815_s21 + $0x39] sm:$0xff] }
 0x211   : >> { %7758 = vst [vmem:[#allocation31_spill] sm:$0xff] %v5841_v62  ;;  %v5869_v21 = vmul.f32 %v5766_v30, %v5838_v61  ;;  %v5878_v27 = vld [vmem:[%s5815_s21 + $0x49] sm:$0xff]  ;;  %v1037_v25 = vmul.f32 %v1035_v6, %v1025_v0  ;;  %v1038_v53 = vmul.f32 %v1035_v6, %v5862_v26  ;;  %v1039_v54 = vmul.f32 %v1035_v6, %v5865_v45  ;;  %v5887_v60 = vld [vmem:[%s5815_s21 + $0x51] sm:$0xff]  ;;  %v5896_v18 = vld [vmem:[%s5815_s21 + $0x1a] sm:$0xff] }
 0x212   : >> { %v5884_v55 = vmul.f32 %v5766_v30, %v5841_v62  ;;  %v1040_v39 = vmul.f32 %v1035_v6, %v5872_v24  ;;  %v1041_v13 = vmul.f32 %v1035_v6, %v5875_v2  ;;  %v1042_v0 = vmul.f32 %v1035_v6, %v5878_v27  ;;  %v1052_v36 = vld [vmem:[%s5815_s21 + $0x2] sm:$0xff]  ;;  %v1053_v33 = vld [vmem:[%s5815_s21 + $0xa] sm:$0xff]  ;;  %v5902_v22 = vld [vmem:[%s5815_s21 + $0x32] sm:$0xff] }
 0x213   : >> { %v1044_v14 = vadd.f32 %v1036_v1, %v1008_v7  ;;  %v1043_v32 = vmul.f32 %v1035_v6, %v5887_v60  ;;  %v1045_v29 = vadd.f32 %v1037_v25, %v1009_v8  ;;  %v1046_v37 = vadd.f32 %v1038_v53, %v1010_v9  ;;  %v5899_v17 = vld [vmem:[%s5815_s21 + $0x22] sm:$0xff]  ;;  %v5905_v7 = vld [vmem:[%s5815_s21 + $0x3a] sm:$0xff]  ;;  %v5908_v6 = vld [vmem:[%s5815_s21 + $0x4a] sm:$0xff] }
 0x214   : >> { %v1047_v20 = vadd.f32 %v1039_v54, %v1011_v35  ;;  %v1048_v31 = vadd.f32 %v1040_v39, %v1012_v38  ;;  %v1049_v3 = vadd.f32 %v1041_v13, %v1013_v63  ;;  %v1050_v16 = vadd.f32 %v1042_v0, %v1014_v43  ;;  %v5911_v8 = vld [vmem:[%s5815_s21 + $0x52] sm:$0xff]  ;;  %v1080_v63 = vld [vmem:[%s5815_s21 + $0x3] sm:$0xff]  ;;  %v5939_v23 = vld [vmem:[%s5815_s21 + $0x3b] sm:$0xff] }
 0x215   : >> { %v1064_v9 = vmul.f32 %v5773_v46, %v1052_v36  ;;  %v1051_v35 = vadd.f32 %v1043_v32, %v1015_v44  ;;  %v1065_v1 = vmul.f32 %v5773_v46, %v1053_v33  ;;  %v1066_v38 = vmul.f32 %v5773_v46, %v5896_v18  ;;  %v1081_v43 = vld [vmem:[%s5815_s21 + $0xb] sm:$0xff]  ;;  %v5930_v44 = vld [vmem:[%s5815_s21 + $0x1b] sm:$0xff]  ;;  %v5933_v53 = vld [vmem:[%s5815_s21 + $0x23] sm:$0xff] }
 0x216   : >> { %v1067_v13 = vmul.f32 %v5773_v46, %v5899_v17  ;;  %v1068_v25 = vmul.f32 %v5773_v46, %v5902_v22  ;;  %v1069_v36 = vmul.f32 %v5773_v46, %v5905_v7  ;;  %v1070_v32 = vmul.f32 %v5773_v46, %v5908_v6  ;;  %v5936_v54 = vld [vmem:[%s5815_s21 + $0x33] sm:$0xff]  ;;  %v5942_v15 = vld [vmem:[%s5815_s21 + $0x4b] sm:$0xff] }
 0x217   : >> { %v1071_v33 = vmul.f32 %v5773_v46, %v5911_v8  ;;  %v1072_v39 = vadd.f32 %v1064_v9, %v1044_v14  ;;  %v1073_v0 = vadd.f32 %v1065_v1, %v1045_v29  ;;  %v1074_v19 = vadd.f32 %v1066_v38, %v1046_v37  ;;  %v5945_v4 = vld [vmem:[%s5815_s21 + $0x53] sm:$0xff]  ;;  %v1108_v37 = vld [vmem:[%s5815_s21 + $0x4] sm:$0xff]  ;;  %v5964_v1 = vld [vmem:[%s5815_s21 + $0x1c] sm:$0xff] }
 0x218   : >> { %v1075_v5 = vadd.f32 %v1067_v13, %v1047_v20  ;;  %v1076_v46 = vadd.f32 %v1068_v25, %v1048_v31  ;;  %v1077_v59 = vadd.f32 %v1069_v36, %v1049_v3  ;;  %v1078_v58 = vadd.f32 %v1070_v32, %v1050_v16  ;;  %v1109_v9 = vld [vmem:[%s5815_s21 + $0xc] sm:$0xff]  ;;  %v5967_v38 = vld [vmem:[%s5815_s21 + $0x24] sm:$0xff]  ;;  %v5970_v13 = vld [vmem:[%s5815_s21 + $0x34] sm:$0xff] }
 0x219   : >> { %v1079_v57 = vadd.f32 %v1071_v33, %v1051_v35  ;;  %v1092_v62 = vmul.f32 %v5777_v40, %v1080_v63  ;;  %v1093_v14 = vmul.f32 %v5777_v40, %v1081_v43  ;;  %v1094_v20 = vmul.f32 %v5777_v40, %v5930_v44  ;;  %7759 = vst [vmem:[#allocation32_spill] sm:$0xff] %v5967_v38  ;;  %v5973_v32 = vld [vmem:[%s5815_s21 + $0x3c] sm:$0xff]  ;;  %v5976_v33 = vld [vmem:[%s5815_s21 + $0x4c] sm:$0xff]  ;;  %v5979_v56 = vld [vmem:[%s5815_s21 + $0x54] sm:$0xff] }
 0x21a   : >> { %v1095_v29 = vmul.f32 %v5777_v40, %v5933_v53  ;;  %v1096_v3 = vmul.f32 %v5777_v40, %v5936_v54  ;;  %v1097_v16 = vmul.f32 %v5777_v40, %v5939_v23  ;;  %v1098_v31 = vmul.f32 %v5777_v40, %v5942_v15  ;;  %7760 = vst [vmem:[#allocation33_spill] sm:$0xff] %v5970_v13 }
 0x21b   : >> { %v1099_v35 = vmul.f32 %v5777_v40, %v5945_v4  ;;  %v1100_v63 = vadd.f32 %v1092_v62, %v1072_v39  ;;  %v1101_v43 = vadd.f32 %v1093_v14, %v1073_v0  ;;  %v1102_v25 = vadd.f32 %v1094_v20, %v1074_v19  ;;  %7761 = vst [vmem:[#allocation34_spill] sm:$0xff] %v5973_v32  ;;  %v1136_v39 = vld [vmem:[%s5815_s21 + $0x5] sm:$0xff]  ;;  %v1137_v0 = vld [vmem:[%s5815_s21 + $0xd] sm:$0xff]  ;;  %v5998_v14 = vld [vmem:[%s5815_s21 + $0x1d] sm:$0xff] }
 0x21c   : >> { %v1103_v36 = vadd.f32 %v1095_v29, %v1075_v5  ;;  %7762 = vst [vmem:[#allocation35_spill] sm:$0xff] %v5976_v33  ;;  %7763 = vst [vmem:[#allocation36_spill] sm:$0xff] %v5979_v56  ;;  %v1104_v40 = vadd.f32 %v1096_v3, %v1076_v46  ;;  %v1105_v61 = vadd.f32 %v1097_v16, %v1077_v59  ;;  %v6001_v20 = vld [vmem:[%s5815_s21 + $0x25] sm:$0xff]  ;;  %v6004_v29 = vld [vmem:[%s5815_s21 + $0x35] sm:$0xff] }
 0x21d   : >> { %v1106_v52 = vadd.f32 %v1098_v31, %v1078_v58  ;;  %v1107_v51 = vadd.f32 %v1099_v35, %v1079_v57  ;;  %v1120_v50 = vmul.f32 %v5785_v41, %v1108_v37  ;;  %v1121_v62 = vmul.f32 %v5785_v41, %v1109_v9  ;;  %7764 = vst [vmem:[#allocation37_spill] sm:$0xff] %v5998_v14  ;;  %v6007_v31 = vld [vmem:[%s5815_s21 + $0x3d] sm:$0xff]  ;;  %v6010_v35 = vld [vmem:[%s5815_s21 + $0x4d] sm:$0xff] }
 0x21e   : >> { %v1122_v19 = vmul.f32 %v5785_v41, %v5964_v1  ;;  %v1123_v5 = vmul.f32 %v5785_v41, %v5967_v38  ;;  %v1124_v59 = vmul.f32 %v5785_v41, %v5970_v13  ;;  %v1125_v57 = vmul.f32 %v5785_v41, %v5973_v32  ;;  %7765 = vst [vmem:[#allocation38_spill] sm:$0xff] %v6001_v20 }
 0x21f   : >> { %v1126_v58 = vmul.f32 %v5785_v41, %v5976_v33  ;;  %v1127_v46 = vmul.f32 %v5785_v41, %v5979_v56  ;;  %7766 = vst [vmem:[#allocation39_spill] sm:$0xff] %v6004_v29  ;;  %v1128_v37 = vadd.f32 %v1120_v50, %v1100_v63  ;;  %v1129_v9 = vadd.f32 %v1121_v62, %v1101_v43  ;;  %v6013_v33 = vld [vmem:[%s5815_s21 + $0x55] sm:$0xff]  ;;  %v6032_v62 = vld [vmem:[%s5815_s21 + $0x1e] sm:$0xff] }
 0x220   : >> { %v1130_v3 = vadd.f32 %v1122_v19, %v1102_v25  ;;  %v1131_v16 = vadd.f32 %v1123_v5, %v1103_v36  ;;  %7767 = vst [vmem:[#allocation40_spill] sm:$0xff] %v6007_v31  ;;  %7768 = vst [vmem:[#allocation41_spill] sm:$0xff] %v6010_v35  ;;  %v1132_v41 = vadd.f32 %v1124_v59, %v1104_v40  ;;  %v1164_v25 = vld [vmem:[%s5815_s21 + $0x6] sm:$0xff]  ;;  %v1165_v36 = vld [vmem:[%s5815_s21 + $0xe] sm:$0xff] }
 0x221   : >> { %7769 = vst [vmem:[#allocation42_spill] sm:$0xff] %v6013_v33  ;;  %v1133_v56 = vadd.f32 %v1125_v57, %v1105_v61  ;;  %v1134_v32 = vadd.f32 %v1126_v58, %v1106_v52  ;;  %v1135_v13 = vadd.f32 %v1127_v46, %v1107_v51  ;;  %v1148_v38 = vmul.f32 %v5789_v47, %v1136_v39  ;;  %v6035_v19 = vld [vmem:[%s5815_s21 + $0x26] sm:$0xff]  ;;  %v6038_v5 = vld [vmem:[%s5815_s21 + $0x36] sm:$0xff]  ;;  %v6041_v58 = vld [vmem:[%s5815_s21 + $0x3e] sm:$0xff] }
 0x222   : >> { %v1149_v50 = vmul.f32 %v5789_v47, %v1137_v0  ;;  %v1150_v63 = vmul.f32 %v5789_v47, %v5998_v14  ;;  %v1151_v43 = vmul.f32 %v5789_v47, %v6001_v20  ;;  %v1152_v61 = vmul.f32 %v5789_v47, %v6004_v29  ;;  %v6044_v46 = vld [vmem:[%s5815_s21 + $0x4e] sm:$0xff] }
 0x223   : >> { %v1153_v51 = vmul.f32 %v5789_v47, %v6007_v31  ;;  %v1154_v52 = vmul.f32 %v5789_v47, %v6010_v35  ;;  %v1155_v40 = vmul.f32 %v5789_v47, %v6013_v33  ;;  %v1156_v39 = vadd.f32 %v1148_v38, %v1128_v37  ;;  %v6047_v35 = vld [vmem:[%s5815_s21 + $0x56] sm:$0xff] }
 0x224   : >> { %v1157_v0 = vadd.f32 %v1149_v50, %v1129_v9  ;;  %v1158_v59 = vadd.f32 %v1150_v63, %v1130_v3  ;;  %v1159_v57 = vadd.f32 %v1151_v43, %v1131_v16  ;;  %7770 = vst [vmem:[#allocation43_spill] sm:$0xff] %v6047_v35  ;;  %v1160_v31 = vadd.f32 %v1152_v61, %v1132_v41  ;;  %v6067_v16 = vld [vmem:[%s5815_s21 + $0x68] sm:$0xff] }
 0x225   : >> { %v1161_v47 = vadd.f32 %v1153_v51, %v1133_v56  ;;  %v1162_v33 = vadd.f32 %v1154_v52, %v1134_v32  ;;  %v1163_v29 = vadd.f32 %v1155_v40, %v1135_v13  ;;  %v1176_v20 = vmul.f32 %v5793_v48, %v1164_v25  ;;  %v6064_v32 = vld [vmem:[%s5815_s21 + $0x60] sm:$0xff] }
 0x226   : >> { %v1177_v14 = vmul.f32 %v5793_v48, %v1165_v36  ;;  %v1178_v38 = vmul.f32 %v5793_v48, %v6032_v62  ;;  %v1179_v37 = vmul.f32 %v5793_v48, %v6035_v19  ;;  %v1180_v9 = vmul.f32 %v5793_v48, %v6038_v5 }
 0x227   : >> { %v1181_v3 = vmul.f32 %v5793_v48, %v6041_v58  ;;  %v1182_v56 = vmul.f32 %v5793_v48, %v6044_v46  ;;  %v1183_v13 = vmul.f32 %v5793_v48, %v6047_v35  ;;  %v1184_v41 = vadd.f32 %v1176_v20, %v1156_v39 }
 0x228   : >> { %v1185_v50 = vadd.f32 %v1177_v14, %v1157_v0  ;;  %v1186_v63 = vadd.f32 %v1178_v38, %v1158_v59  ;;  %v1187_v43 = vadd.f32 %v1179_v37, %v1159_v57  ;;  %v1188_v25 = vadd.f32 %v1180_v9, %v1160_v31  ;;  %v6085_v0 = vld [vmem:[%s5815_s21 + $0x69] sm:$0xff] }
 0x229   : >> { %v1189_v36 = vadd.f32 %v1181_v3, %v1161_v47  ;;  %v1190_v61 = vadd.f32 %v1182_v56, %v1162_v33  ;;  %v1191_v51 = vadd.f32 %v1183_v13, %v1163_v29  ;;  %v1211_v52 = vmul.f32 %v5766_v30, %v5847_v11  ;;  %v6082_v29 = vld [vmem:[%s5815_s21 + $0x61] sm:$0xff] }
 0x22a   : >> { %v1212_v48 = vmul.f32 %v5766_v30, %v5850_v12  ;;  %v1213_v40 = vmul.f32 %v6064_v32, %v5766_v30  ;;  %v1214_v20 = vmul.f32 %v6067_v16, %v5766_v30  ;;  %v1215_v14 = vadd.f32 %v5844_v10, %v1184_v41  ;;  %v6104_v41 = vld [vmem:[%s5815_s21 + $0x62] sm:$0xff] }
 0x22b   : >> { %v1216_v39 = vadd.f32 %v5856_v42, %v1185_v50  ;;  %v1217_v31 = vadd.f32 %v5869_v21, %v1186_v63  ;;  %v1218_v33 = vadd.f32 %v5884_v55, %v1187_v43  ;;  %v1219_v59 = vadd.f32 %v1211_v52, %v1188_v25  ;;  %v6107_v50 = vld [vmem:[%s5815_s21 + $0x6a] sm:$0xff] }
 0x22c   : >> { %v1220_v57 = vadd.f32 %v1212_v48, %v1189_v36  ;;  %v1221_v47 = vadd.f32 %v1213_v40, %v1190_v61  ;;  %v1222_v38 = vadd.f32 %v1214_v20, %v1191_v51  ;;  %v1235_v30 = vmul.f32 %v5781_v28, %v5862_v26 }
 0x22d   : >> { %v1236_v10 = vmul.f32 %v5781_v28, %v5865_v45  ;;  %v1237_v42 = vmul.f32 %v5781_v28, %v5872_v24  ;;  %v1238_v21 = vmul.f32 %v5781_v28, %v5875_v2  ;;  %v1239_v55 = vmul.f32 %v5781_v28, %v5878_v27 }
 0x22e   : >> { %v1240_v37 = vmul.f32 %v5781_v28, %v5887_v60  ;;  %v1241_v9 = vmul.f32 %v6082_v29, %v5781_v28  ;;  %v1242_v26 = vmul.f32 %v6085_v0, %v5781_v28  ;;  %v1243_v3 = vadd.f32 %v1235_v30, %v1215_v14 }
 0x22f   : >> { %v1244_v45 = vadd.f32 %v1236_v10, %v1216_v39  ;;  %v1245_v56 = vadd.f32 %v1237_v42, %v1217_v31  ;;  %v1246_v13 = vadd.f32 %v1238_v21, %v1218_v33  ;;  %v1247_v63 = vadd.f32 %v1239_v55, %v1219_v59  ;;  %v6126_v33 = vld [vmem:[%s5815_s21 + $0x63] sm:$0xff]  ;;  %v6129_v59 = vld [vmem:[%s5815_s21 + $0x6b] sm:$0xff] }
 0x230   : >> { %v1248_v43 = vadd.f32 %v1240_v37, %v1220_v57  ;;  %v1249_v25 = vadd.f32 %v1241_v9, %v1221_v47  ;;  %v1250_v36 = vadd.f32 %v1242_v26, %v1222_v38  ;;  %v1263_v61 = vmul.f32 %v5797_v34, %v5896_v18 }
 0x231   : >> { %v1264_v28 = vmul.f32 %v5797_v34, %v5899_v17  ;;  %v1265_v51 = vmul.f32 %v5797_v34, %v5902_v22  ;;  %v1266_v52 = vmul.f32 %v5797_v34, %v5905_v7  ;;  %v1267_v48 = vmul.f32 %v5797_v34, %v5908_v6 }
 0x232   : >> { %v1268_v40 = vmul.f32 %v5797_v34, %v5911_v8  ;;  %v1269_v20 = vmul.f32 %v6104_v41, %v5797_v34  ;;  %v1270_v18 = vmul.f32 %v6107_v50, %v5797_v34  ;;  %v1271_v14 = vadd.f32 %v1263_v61, %v1243_v3  ;;  %v7772_v61 = vld [vmem:[#allocation23_spill] sm:$0xff] }
 0x233   : >> { %v1272_v17 = vadd.f32 %v1264_v28, %v1244_v45  ;;  %v1273_v39 = vadd.f32 %v1265_v51, %v1245_v56  ;;  %v1274_v31 = vadd.f32 %v1266_v52, %v1246_v13  ;;  %v1275_v57 = vadd.f32 %v1267_v48, %v1247_v63  ;;  %v6148_v56 = vld [vmem:[%s5815_s21 + $0x64] sm:$0xff]  ;;  %v6151_v13 = vld [vmem:[%s5815_s21 + $0x6c] sm:$0xff]  ;;  %v7774_v52 = vld [vmem:[#allocation33_spill] sm:$0xff] }
 0x234   : >> { %v1276_v47 = vadd.f32 %v1268_v40, %v1248_v43  ;;  %v1277_v38 = vadd.f32 %v1269_v20, %v1249_v25  ;;  %v1278_v30 = vadd.f32 %v1270_v18, %v1250_v36  ;;  %v1291_v10 = vmul.f32 %v5801_v49, %v5930_v44  ;;  %7771 = vst [vmem:[#allocation44_spill] sm:$0xff] %v6148_v56  ;;  %v7773_v51 = vld [vmem:[#allocation32_spill] sm:$0xff]  ;;  %v7775_v40 = vld [vmem:[#allocation34_spill] sm:$0xff]  ;;  %v7776_v18 = vld [vmem:[#allocation35_spill] sm:$0xff] }
 0x235   : >> { %v1292_v34 = vmul.f32 %v5801_v49, %v5933_v53  ;;  %v1293_v42 = vmul.f32 %v5801_v49, %v5936_v54  ;;  %v1294_v21 = vmul.f32 %v5801_v49, %v5939_v23  ;;  %v1295_v55 = vmul.f32 %v5801_v49, %v5942_v15 }
 0x236   : >> { %v1296_v37 = vmul.f32 %v5801_v49, %v5945_v4  ;;  %v1297_v9 = vmul.f32 %v6126_v33, %v5801_v49  ;;  %v1298_v44 = vmul.f32 %v6129_v59, %v5801_v49  ;;  %v1299_v26 = vadd.f32 %v1291_v10, %v1271_v14  ;;  %v6170_v10 = vld [vmem:[%s5815_s21 + $0x65] sm:$0xff] }
 0x237   : >> { %v1300_v53 = vadd.f32 %v1292_v34, %v1272_v17  ;;  %v1301_v3 = vadd.f32 %v1293_v42, %v1273_v39  ;;  %v1302_v45 = vadd.f32 %v1294_v21, %v1274_v31  ;;  %v1303_v63 = vadd.f32 %v1295_v55, %v1275_v57  ;;  %v7777_v17 = vld [vmem:[#allocation36_spill] sm:$0xff]  ;;  %7778 = vst [vmem:[#allocation23_spill] sm:$0xff] %v6170_v10 }
 0x238   : >> { %v1304_v43 = vadd.f32 %v1296_v37, %v1276_v47  ;;  %v1305_v25 = vadd.f32 %v1297_v9, %v1277_v38  ;;  %v1306_v36 = vadd.f32 %v1298_v44, %v1278_v30  ;;  %v1319_v28 = vmul.f32 %v7772_v61, %v5964_v1  ;;  %v6173_v34 = vld [vmem:[%s5815_s21 + $0x6d] sm:$0xff]  ;;  %v7779_v9 = vld [vmem:[#allocation37_spill] sm:$0xff] }
 0x239   : >> { %v1320_v49 = vmul.f32 %v7772_v61, %v7773_v51  ;;  %v1321_v48 = vmul.f32 %v7772_v61, %v7774_v52  ;;  %v1322_v20 = vmul.f32 %v7772_v61, %v7775_v40  ;;  %v1323_v14 = vmul.f32 %v7772_v61, %v7776_v18  ;;  %v7780_v44 = vld [vmem:[#allocation24_spill] sm:$0xff] }
 0x23a   : >> { %v1324_v39 = vmul.f32 %v7772_v61, %v7777_v17  ;;  %v1325_v31 = vmul.f32 %v6148_v56, %v7772_v61  ;;  %v1326_v1 = vmul.f32 %v6151_v13, %v7772_v61  ;;  %v1327_v57 = vadd.f32 %v1319_v28, %v1299_v26  ;;  %v7781_v56 = vld [vmem:[#allocation38_spill] sm:$0xff]  ;;  %v7782_v26 = vld [vmem:[#allocation39_spill] sm:$0xff]  ;;  %v7784_v28 = vld [vmem:[#allocation41_spill] sm:$0xff] }
 0x23b   : >> { %v1328_v47 = vadd.f32 %v1320_v49, %v1300_v53  ;;  %v1329_v38 = vadd.f32 %v1321_v48, %v1301_v3  ;;  %v1330_v30 = vadd.f32 %v1322_v20, %v1302_v45  ;;  %v1331_v42 = vadd.f32 %v1323_v14, %v1303_v63  ;;  %v7783_v3 = vld [vmem:[#allocation40_spill] sm:$0xff]  ;;  %v7785_v49 = vld [vmem:[#allocation42_spill] sm:$0xff] }
 0x23c   : >> { %v1332_v21 = vadd.f32 %v1324_v39, %v1304_v43  ;;  %v1333_v55 = vadd.f32 %v1325_v31, %v1305_v25  ;;  %v1334_v37 = vadd.f32 %v1326_v1, %v1306_v36  ;;  %v1347_v51 = vmul.f32 %v7780_v44, %v7779_v9  ;;  %v6192_v39 = vld [vmem:[%s5815_s21 + $0x66] sm:$0xff]  ;;  %v6195_v31 = vld [vmem:[%s5815_s21 + $0x6e] sm:$0xff] }
 0x23d   : >> { %v1348_v61 = vmul.f32 %v7780_v44, %v7781_v56  ;;  %v1349_v53 = vmul.f32 %v7780_v44, %v7782_v26  ;;  %v1350_v45 = vmul.f32 %v7780_v44, %v7783_v3  ;;  %v1351_v63 = vmul.f32 %v7780_v44, %v7784_v28  ;;  %7786 = vst [vmem:[#allocation32_spill] sm:$0xff] %v6192_v39  ;;  %v7787_v3 = vld [vmem:[#allocation25_spill] sm:$0xff] }
 0x23e   : >> { %v1352_v43 = vmul.f32 %v7780_v44, %v7785_v49  ;;  %v1353_v25 = vmul.f32 %v6170_v10, %v7780_v44  ;;  %v1354_v36 = vmul.f32 %v6173_v34, %v7780_v44  ;;  %v1355_v48 = vadd.f32 %v1347_v51, %v1327_v57  ;;  %v6214_v51 = vld [vmem:[%s5815_s21 + $0x78] sm:$0xff] }
 0x23f   : >> { %v1356_v56 = vadd.f32 %v1348_v61, %v1328_v47  ;;  %v1357_v20 = vadd.f32 %v1349_v53, %v1329_v38  ;;  %v1358_v14 = vadd.f32 %v1350_v45, %v1330_v30  ;;  %v1359_v1 = vadd.f32 %v1351_v63, %v1331_v42  ;;  %v6217_v61 = vld [vmem:[%s5815_s21 + $0x80] sm:$0xff] }
 0x240   : >> { %v1360_v9 = vadd.f32 %v1352_v43, %v1332_v21  ;;  %v1361_v28 = vadd.f32 %v1353_v25, %v1333_v55  ;;  %v1362_v49 = vadd.f32 %v1354_v36, %v1334_v37  ;;  %v1375_v10 = vmul.f32 %v7787_v3, %v6032_v62  ;;  %v7788_v25 = vld [vmem:[#allocation30_spill] sm:$0xff] }
 0x241   : >> { %v1376_v44 = vmul.f32 %v7787_v3, %v6035_v19  ;;  %v1377_v57 = vmul.f32 %v7787_v3, %v6038_v5  ;;  %v1378_v47 = vmul.f32 %v7787_v3, %v6041_v58  ;;  %v1379_v38 = vmul.f32 %v7787_v3, %v6044_v46  ;;  %v7789_v36 = vld [vmem:[#allocation26_spill] sm:$0xff] }
 0x242   : >> { %v1380_v30 = vmul.f32 %v7787_v3, %v6047_v35  ;;  %v1381_v42 = vmul.f32 %v6192_v39, %v7787_v3  ;;  %v1382_v62 = vmul.f32 %v6195_v31, %v7787_v3  ;;  %v1383_v21 = vadd.f32 %v1375_v10, %v1355_v48  ;;  %v7790_v35 = vld [vmem:[#allocation31_spill] sm:$0xff] }
 0x243   : >> { %v1384_v19 = vadd.f32 %v1376_v44, %v1356_v56  ;;  %v1385_v55 = vadd.f32 %v1377_v57, %v1357_v20  ;;  %v1386_v37 = vadd.f32 %v1378_v47, %v1358_v14  ;;  %v1387_v53 = vadd.f32 %v1379_v38, %v1359_v1  ;;  %v6239_v44 = vld [vmem:[%s5815_s21 + $0x81] sm:$0xff] }
 0x244   : >> { %v1388_v45 = vadd.f32 %v1380_v30, %v1360_v9  ;;  %v1389_v63 = vadd.f32 %v1381_v42, %v1361_v28  ;;  %v1390_v43 = vadd.f32 %v1382_v62, %v1362_v49  ;;  %v1406_v39 = vmul.f32 %v7789_v36, %v7788_v25  ;;  %v7791_v30 = vld [vmem:[#allocation27_spill] sm:$0xff] }
 0x245   : >> { %v1407_v3 = vmul.f32 %v7789_v36, %v7790_v35  ;;  %v1408_v10 = vmul.f32 %v7789_v36, %v5847_v11  ;;  %v1409_v48 = vmul.f32 %v7789_v36, %v5850_v12  ;;  %v1410_v56 = vmul.f32 %v6064_v32, %v7789_v36  ;;  %v6236_v11 = vld [vmem:[%s5815_s21 + $0x79] sm:$0xff] }
 0x246   : >> { %v1411_v20 = vmul.f32 %v6067_v16, %v7789_v36  ;;  %v1412_v28 = vmul.f32 %v6214_v51, %v7789_v36  ;;  %v1413_v49 = vmul.f32 %v6217_v61, %v7789_v36  ;;  %v1414_v14 = vadd.f32 %v1406_v39, %v1383_v21 }
 0x247   : >> { %v1415_v35 = vadd.f32 %v1407_v3, %v1384_v19  ;;  %v1416_v1 = vadd.f32 %v1408_v10, %v1385_v55  ;;  %v1417_v9 = vadd.f32 %v1409_v48, %v1386_v37  ;;  %v1418_v12 = vadd.f32 %v1410_v56, %v1387_v53  ;;  %v7792_v10 = vld [vmem:[#allocation28_spill] sm:$0xff] }
 0x248   : >> { %v1419_v57 = vadd.f32 %v1411_v20, %v1388_v45  ;;  %v1420_v47 = vadd.f32 %v1412_v28, %v1389_v63  ;;  %v1421_v38 = vadd.f32 %v1413_v49, %v1390_v43  ;;  %v1434_v42 = vmul.f32 %v7791_v30, %v5872_v24  ;;  %v6261_v43 = vld [vmem:[%s5815_s21 + $0x82] sm:$0xff] }
 0x249   : >> { %v1435_v62 = vmul.f32 %v7791_v30, %v5875_v2  ;;  %v1436_v39 = vmul.f32 %v7791_v30, %v5878_v27  ;;  %v1437_v21 = vmul.f32 %v7791_v30, %v5887_v60  ;;  %v1438_v19 = vmul.f32 %v6082_v29, %v7791_v30  ;;  %v6258_v27 = vld [vmem:[%s5815_s21 + $0x7a] sm:$0xff] }
 0x24a   : >> { %v1439_v55 = vmul.f32 %v6085_v0, %v7791_v30  ;;  %v1440_v37 = vmul.f32 %v6236_v11, %v7791_v30  ;;  %v1441_v24 = vmul.f32 %v6239_v44, %v7791_v30  ;;  %v1442_v53 = vadd.f32 %v1434_v42, %v1414_v14  ;;  %v7793_v42 = vld [vmem:[#allocation29_spill] sm:$0xff] }
 0x24b   : >> { %v1443_v2 = vadd.f32 %v1435_v62, %v1415_v35  ;;  %v1444_v45 = vadd.f32 %v1436_v39, %v1416_v1  ;;  %v1445_v63 = vadd.f32 %v1437_v21, %v1417_v9  ;;  %v1446_v60 = vadd.f32 %v1438_v19, %v1418_v12 }
 0x24c   : >> { %v1447_v25 = vadd.f32 %v1439_v55, %v1419_v57  ;;  %v1448_v36 = vadd.f32 %v1440_v37, %v1420_v47  ;;  %v1449_v3 = vadd.f32 %v1441_v24, %v1421_v38  ;;  %v1462_v48 = vmul.f32 %v7792_v10, %v5902_v22  ;;  %v6283_v57 = vld [vmem:[%s5815_s21 + $0x83] sm:$0xff] }
 0x24d   : >> { %v1463_v56 = vmul.f32 %v7792_v10, %v5905_v7  ;;  %v1464_v20 = vmul.f32 %v7792_v10, %v5908_v6  ;;  %v1465_v28 = vmul.f32 %v7792_v10, %v5911_v8  ;;  %v1466_v49 = vmul.f32 %v6104_v41, %v7792_v10  ;;  %v6280_v6 = vld [vmem:[%s5815_s21 + $0x7b] sm:$0xff] }
 0x24e   : >> { %v1467_v14 = vmul.f32 %v6107_v50, %v7792_v10  ;;  %v1468_v35 = vmul.f32 %v6258_v27, %v7792_v10  ;;  %v1469_v22 = vmul.f32 %v6261_v43, %v7792_v10  ;;  %v1470_v1 = vadd.f32 %v1462_v48, %v1442_v53  ;;  %v7795_v10 = vld [vmem:[#allocation6_spill] sm:$0xff] }
 0x24f   : >> { %v1471_v7 = vadd.f32 %v1463_v56, %v1443_v2  ;;  %v1472_v9 = vadd.f32 %v1464_v20, %v1444_v45  ;;  %v1473_v12 = vadd.f32 %v1465_v28, %v1445_v63  ;;  %v1474_v8 = vadd.f32 %v1466_v49, %v1446_v60  ;;  %v7796_v56 = vld [vmem:[#allocation21_spill] sm:$0xff]  ;;  %v7797_v28 = vld [vmem:[#allocation22_spill] sm:$0xff] }
 0x250   : >> { %v1475_v47 = vadd.f32 %v1467_v14, %v1447_v25  ;;  %v1476_v38 = vadd.f32 %v1468_v35, %v1448_v36  ;;  %v1477_v30 = vadd.f32 %v1469_v22, %v1449_v3  ;;  %v1490_v62 = vmul.f32 %v7793_v42, %v5936_v54  ;;  %v6302_v25 = vld [vmem:[%s5815_s21 + $0x7c] sm:$0xff]  ;;  %v6305_v36 = vld [vmem:[%s5815_s21 + $0x84] sm:$0xff]  ;;  %v7794_v3 = vld [vmem:[#allocation20_spill] sm:$0xff] }
 0x251   : >> { %v1491_v39 = vmul.f32 %v7793_v42, %v5939_v23  ;;  %v1492_v21 = vmul.f32 %v7793_v42, %v5942_v15  ;;  %v1493_v19 = vmul.f32 %v7793_v42, %v5945_v4  ;;  %v1494_v55 = vmul.f32 %v6126_v33, %v7793_v42  ;;  %v7798_v14 = vld [vmem:[#allocation15_spill] sm:$0xff] }
 0x252   : >> { %v1495_v37 = vmul.f32 %v6129_v59, %v7793_v42  ;;  %v1496_v54 = vmul.f32 %v6280_v6, %v7793_v42  ;;  %v1497_v24 = vmul.f32 %v6283_v57, %v7793_v42  ;;  %v1498_v23 = vadd.f32 %v1490_v62, %v1470_v1  ;;  %v7799_v35 = vld [vmem:[#allocation7_spill] sm:$0xff]  ;;  %v7800_v1 = vld [vmem:[#allocation17_spill] sm:$0xff] }
 0x253   : >> { %v1499_v53 = vadd.f32 %v1491_v39, %v1471_v7  ;;  %v1500_v2 = vadd.f32 %v1492_v21, %v1472_v9  ;;  %v1501_v45 = vadd.f32 %v1493_v19, %v1473_v12  ;;  %v1502_v15 = vadd.f32 %v1494_v55, %v1474_v8  ;;  %v7801_v9 = vld [vmem:[#allocation18_spill] sm:$0xff]  ;;  %v7802_v8 = vld [vmem:[#allocation19_spill] sm:$0xff]  ;;  %v7803_v21 = vld [vmem:[#allocation44_spill] sm:$0xff] }
 0x254   : >> { %v1503_v63 = vadd.f32 %v1495_v37, %v1475_v47  ;;  %v1504_v60 = vadd.f32 %v1496_v54, %v1476_v38  ;;  %v1505_v4 = vadd.f32 %v1497_v24, %v1477_v30  ;;  %v1517_v48 = vrot.slane %v7795_v10, %v7794_v3 }
 0x255   : >> { %v1545_v20 = vrot.slane %v7795_v10, %v7796_v56  ;;  %v1573_v49 = vrot.slane %v7795_v10, %v7797_v28  ;;  %v6315_v22 = vrot.slane %v7799_v35, %v7798_v14  ;;  %v6319_v7 = vrot.slane %v7799_v35, %v7800_v1  ;;  %v7804_v28 = vld [vmem:[#allocation40_spill] sm:$0xff]  ;;  %v7805_v56 = vld [vmem:[#allocation41_spill] sm:$0xff] }
 0x256   : >> { %v6323_v12 = vrot.slane %v7799_v35, %v7801_v9  ;;  %v6327_v47 = vrot.slane %v7799_v35, %v7802_v8  ;;  %v6331_v38 = vrot.slane %v7799_v35, %v7794_v3  ;;  %v1518_v30 = vmul.f32 %v1517_v48, %v7774_v52  ;;  %v6342_v9 = vld [vmem:[%s5815_s21 + $0x7d] sm:$0xff]  ;;  %v6345_v52 = vld [vmem:[%s5815_s21 + $0x85] sm:$0xff] }
 0x257   : >> { %v1519_v42 = vmul.f32 %v1517_v48, %v7775_v40  ;;  %v1520_v62 = vmul.f32 %v1517_v48, %v7776_v18  ;;  %v1521_v39 = vmul.f32 %v1517_v48, %v7777_v17  ;;  %v1522_v19 = vmul.f32 %v7803_v21, %v1517_v48 }
 0x258   : >> { %v1523_v55 = vmul.f32 %v6151_v13, %v1517_v48  ;;  %v1524_v37 = vmul.f32 %v6302_v25, %v1517_v48  ;;  %v1525_v54 = vmul.f32 %v6305_v36, %v1517_v48  ;;  %v1526_v24 = vadd.f32 %v1518_v30, %v1498_v23  ;;  %v7806_v23 = vld [vmem:[#allocation42_spill] sm:$0xff] }
 0x259   : >> { %v1527_v10 = vadd.f32 %v1519_v42, %v1499_v53  ;;  %v1528_v3 = vadd.f32 %v1520_v62, %v1500_v2  ;;  %v1529_v8 = vadd.f32 %v1521_v39, %v1501_v45  ;;  %v1530_v40 = vadd.f32 %v1522_v19, %v1502_v15  ;;  %v7807_v2 = vld [vmem:[#allocation23_spill] sm:$0xff] }
 0x25a   : >> { %v1531_v18 = vadd.f32 %v1523_v55, %v1503_v63  ;;  %v1532_v17 = vadd.f32 %v1524_v37, %v1504_v60  ;;  %v1533_v1 = vadd.f32 %v1525_v54, %v1505_v4  ;;  %v1546_v14 = vmul.f32 %v1545_v20, %v7782_v26  ;;  %v6356_v26 = vld [vmem:[%s5815_s21 + $0x7e] sm:$0xff] }
 0x25b   : >> { %v1547_v35 = vmul.f32 %v1545_v20, %v7804_v28  ;;  %v1548_v48 = vmul.f32 %v1545_v20, %v7805_v56  ;;  %v1549_v53 = vmul.f32 %v1545_v20, %v7806_v23  ;;  %v1550_v45 = vmul.f32 %v7807_v2, %v1545_v20  ;;  %v6359_v28 = vld [vmem:[%s5815_s21 + $0x86] sm:$0xff] }
 0x25c   : >> { %v1551_v30 = vmul.f32 %v6173_v34, %v1545_v20  ;;  %v1552_v42 = vmul.f32 %v6342_v9, %v1545_v20  ;;  %v1553_v15 = vmul.f32 %v6345_v52, %v1545_v20  ;;  %v1554_v63 = vadd.f32 %v1546_v14, %v1526_v24 }
 0x25d   : >> { %v1555_v62 = vadd.f32 %v1547_v35, %v1527_v10  ;;  %v1556_v60 = vadd.f32 %v1548_v48, %v1528_v3  ;;  %v1557_v4 = vadd.f32 %v1549_v53, %v1529_v8  ;;  %v1558_v56 = vadd.f32 %v1550_v45, %v1530_v40  ;;  %v7808_v3 = vld [vmem:[#allocation43_spill] sm:$0xff]  ;;  %v7809_v8 = vld [vmem:[#allocation32_spill] sm:$0xff] }
 0x25e   : >> { %v1559_v39 = vadd.f32 %v1551_v30, %v1531_v18  ;;  %v1560_v19 = vadd.f32 %v1552_v42, %v1532_v17  ;;  %v1561_v55 = vadd.f32 %v1553_v15, %v1533_v1  ;;  %v1574_v37 = vmul.f32 %v1573_v49, %v6038_v5  ;;  %v4261_v18 = vld [vmem:[%s5815_s21 + $0x48] sm:$0xff]  ;;  %v4262_v17 = vld [vmem:[%s5815_s21 + $0x50] sm:$0xff] }
 0x25f   : >> { %v1575_v20 = vmul.f32 %v1573_v49, %v6041_v58  ;;  %v1576_v14 = vmul.f32 %v1573_v49, %v6044_v46  ;;  %v1577_v35 = vmul.f32 %v1573_v49, %v7808_v3  ;;  %v1578_v54 = vmul.f32 %v7809_v8, %v1573_v49  ;;  %v6372_v58 = vld [vmem:[%s5815_s21 + $0x90] sm:$0xff]  ;;  %v6375_v46 = vld [vmem:[%s5815_s21 + $0x98] sm:$0xff] }
 0x260   : >> { %v1579_v24 = vmul.f32 %v6195_v31, %v1573_v49  ;;  %v1580_v10 = vmul.f32 %v6356_v26, %v1573_v49  ;;  %v1581_v40 = vmul.f32 %v6359_v28, %v1573_v49  ;;  %v1582_v1 = vadd.f32 %v1574_v37, %v1554_v63  ;;  %v6397_v3 = vld [vmem:[%s5815_s21 + $0x99] sm:$0xff] }
 0x261   : >> { %v1583_v48 = vadd.f32 %v1575_v20, %v1555_v62  ;;  %v1584_v23 = vadd.f32 %v1576_v14, %v1556_v60  ;;  %v1585_v5 = vadd.f32 %v1577_v35, %v1557_v4  ;;  %v1586_v53 = vadd.f32 %v1578_v54, %v1558_v56 }
 0x262   : >> { %v1587_v45 = vadd.f32 %v1579_v24, %v1559_v39  ;;  %v1588_v30 = vadd.f32 %v1580_v10, %v1560_v19  ;;  %v1589_v42 = vadd.f32 %v1581_v40, %v1561_v55  ;;  %v1605_v49 = vmul.f32 %v4261_v18, %v6315_v22  ;;  %v4269_v19 = vld [vmem:[%s5815_s21 + $0x49] sm:$0xff]  ;;  %v4270_v55 = vld [vmem:[%s5815_s21 + $0x51] sm:$0xff] }
 0x263   : >> { %v1606_v15 = vmul.f32 %v4262_v17, %v6315_v22  ;;  %v1607_v63 = vmul.f32 %v6064_v32, %v6315_v22  ;;  %v1608_v62 = vmul.f32 %v6067_v16, %v6315_v22  ;;  %v1609_v60 = vmul.f32 %v6214_v51, %v6315_v22  ;;  %v6394_v16 = vld [vmem:[%s5815_s21 + $0x91] sm:$0xff] }
 0x264   : >> { %v1610_v4 = vmul.f32 %v6217_v61, %v6315_v22  ;;  %v1611_v56 = vmul.f32 %v6372_v58, %v6315_v22  ;;  %v1612_v39 = vmul.f32 %v6375_v46, %v6315_v22  ;;  %v1613_v37 = vadd.f32 %v1605_v49, %v1582_v1 }
 0x265   : >> { %v1614_v20 = vadd.f32 %v1606_v15, %v1583_v48  ;;  %v1615_v32 = vadd.f32 %v1607_v63, %v1584_v23  ;;  %v1616_v14 = vadd.f32 %v1608_v62, %v1585_v5  ;;  %v1617_v35 = vadd.f32 %v1609_v60, %v1586_v53  ;;  %v4277_v53 = vld [vmem:[%s5815_s21 + $0x4a] sm:$0xff]  ;;  %v6419_v15 = vld [vmem:[%s5815_s21 + $0x9a] sm:$0xff] }
 0x266   : >> { %v1618_v54 = vadd.f32 %v1610_v4, %v1587_v45  ;;  %v1619_v24 = vadd.f32 %v1611_v56, %v1588_v30  ;;  %v1620_v10 = vadd.f32 %v1612_v39, %v1589_v42  ;;  %v1633_v22 = vmul.f32 %v4269_v19, %v6319_v7  ;;  %v4278_v45 = vld [vmem:[%s5815_s21 + $0x52] sm:$0xff] }
 0x267   : >> { %v1634_v40 = vmul.f32 %v4270_v55, %v6319_v7  ;;  %v1635_v18 = vmul.f32 %v6082_v29, %v6319_v7  ;;  %v1636_v17 = vmul.f32 %v6085_v0, %v6319_v7  ;;  %v1637_v1 = vmul.f32 %v6236_v11, %v6319_v7  ;;  %v6416_v0 = vld [vmem:[%s5815_s21 + $0x92] sm:$0xff] }
 0x268   : >> { %v1638_v48 = vmul.f32 %v6239_v44, %v6319_v7  ;;  %v1639_v23 = vmul.f32 %v6394_v16, %v6319_v7  ;;  %v1640_v5 = vmul.f32 %v6397_v3, %v6319_v7  ;;  %v1641_v30 = vadd.f32 %v1633_v22, %v1613_v37  ;;  %v6441_v22 = vld [vmem:[%s5815_s21 + $0x9b] sm:$0xff] }
 0x269   : >> { %v1642_v42 = vadd.f32 %v1634_v40, %v1614_v20  ;;  %v1643_v29 = vadd.f32 %v1635_v18, %v1615_v32  ;;  %v1644_v49 = vadd.f32 %v1636_v17, %v1616_v14  ;;  %v1645_v63 = vadd.f32 %v1637_v1, %v1617_v35  ;;  %v4285_v14 = vld [vmem:[%s5815_s21 + $0x4b] sm:$0xff]  ;;  %v4286_v35 = vld [vmem:[%s5815_s21 + $0x53] sm:$0xff] }
 0x26a   : >> { %v1646_v62 = vadd.f32 %v1638_v48, %v1618_v54  ;;  %v1647_v60 = vadd.f32 %v1639_v23, %v1619_v24  ;;  %v1648_v4 = vadd.f32 %v1640_v5, %v1620_v10  ;;  %v1661_v7 = vmul.f32 %v4277_v53, %v6323_v12 }
 0x26b   : >> { %v1662_v56 = vmul.f32 %v4278_v45, %v6323_v12  ;;  %v1663_v39 = vmul.f32 %v6104_v41, %v6323_v12  ;;  %v1664_v19 = vmul.f32 %v6107_v50, %v6323_v12  ;;  %v1665_v55 = vmul.f32 %v6258_v27, %v6323_v12  ;;  %v6438_v50 = vld [vmem:[%s5815_s21 + $0x93] sm:$0xff] }
 0x26c   : >> { %v1666_v37 = vmul.f32 %v6261_v43, %v6323_v12  ;;  %v1667_v20 = vmul.f32 %v6416_v0, %v6323_v12  ;;  %v1668_v32 = vmul.f32 %v6419_v15, %v6323_v12  ;;  %v1669_v54 = vadd.f32 %v1661_v7, %v1641_v30 }
 0x26d   : >> { %v1670_v24 = vadd.f32 %v1662_v56, %v1642_v42  ;;  %v1671_v41 = vadd.f32 %v1663_v39, %v1643_v29  ;;  %v1672_v10 = vadd.f32 %v1664_v19, %v1644_v49  ;;  %v1673_v40 = vadd.f32 %v1665_v55, %v1645_v63  ;;  %v4293_v29 = vld [vmem:[%s5815_s21 + $0x4c] sm:$0xff]  ;;  %v4294_v49 = vld [vmem:[%s5815_s21 + $0x54] sm:$0xff] }
 0x26e   : >> { %v1674_v18 = vadd.f32 %v1666_v37, %v1646_v62  ;;  %v1675_v17 = vadd.f32 %v1667_v20, %v1647_v60  ;;  %v1676_v1 = vadd.f32 %v1668_v32, %v1648_v4  ;;  %v1689_v12 = vmul.f32 %v4285_v14, %v6327_v47  ;;  %v6460_v4 = vld [vmem:[%s5815_s21 + $0x94] sm:$0xff] }
 0x26f   : >> { %v1690_v48 = vmul.f32 %v4286_v35, %v6327_v47  ;;  %v1691_v23 = vmul.f32 %v6126_v33, %v6327_v47  ;;  %v1692_v5 = vmul.f32 %v6129_v59, %v6327_v47  ;;  %v1693_v53 = vmul.f32 %v6280_v6, %v6327_v47  ;;  %v6463_v59 = vld [vmem:[%s5815_s21 + $0x9c] sm:$0xff] }
 0x270   : >> { %v1694_v45 = vmul.f32 %v6283_v57, %v6327_v47  ;;  %v1695_v30 = vmul.f32 %v6438_v50, %v6327_v47  ;;  %v1696_v42 = vmul.f32 %v6441_v22, %v6327_v47  ;;  %v1697_v63 = vadd.f32 %v1689_v12, %v1669_v54  ;;  %v4302_v12 = vld [vmem:[%s5815_s21 + $0x55] sm:$0xff] }
 0x271   : >> { %v1698_v62 = vadd.f32 %v1690_v48, %v1670_v24  ;;  %v1699_v33 = vadd.f32 %v1691_v23, %v1671_v41  ;;  %v1700_v60 = vadd.f32 %v1692_v5, %v1672_v10  ;;  %v1701_v7 = vadd.f32 %v1693_v53, %v1673_v40  ;;  %v6482_v48 = vld [vmem:[%s5815_s21 + $0x95] sm:$0xff]  ;;  %v6485_v23 = vld [vmem:[%s5815_s21 + $0x9d] sm:$0xff]  ;;  %v7813_v53 = vld [vmem:[#allocation7_spill] sm:$0xff] }
 0x272   : >> { %v1702_v56 = vadd.f32 %v1694_v45, %v1674_v18  ;;  %v1703_v39 = vadd.f32 %v1695_v30, %v1675_v17  ;;  %v1704_v19 = vadd.f32 %v1696_v42, %v1676_v1  ;;  %v1717_v55 = vmul.f32 %v4293_v29, %v6331_v38  ;;  %v4301_v1 = vld [vmem:[%s5815_s21 + $0x4d] sm:$0xff]  ;;  %7810 = vst [vmem:[#allocation33_spill] sm:$0xff] %v6482_v48  ;;  %v7812_v5 = vld [vmem:[#allocation21_spill] sm:$0xff]  ;;  %v7814_v30 = vld [vmem:[#allocation22_spill] sm:$0xff] }
 0x273   : >> { %v1718_v37 = vmul.f32 %v4294_v49, %v6331_v38  ;;  %v1719_v47 = vmul.f32 %v7803_v21, %v6331_v38  ;;  %v1720_v20 = vmul.f32 %v6151_v13, %v6331_v38  ;;  %v1721_v32 = vmul.f32 %v6302_v25, %v6331_v38  ;;  %7811 = vst [vmem:[#allocation34_spill] sm:$0xff] %v6485_v23  ;;  %v7815_v42 = vld [vmem:[#allocation15_spill] sm:$0xff]  ;;  %v7816_v29 = vld [vmem:[#allocation8_spill] sm:$0xff] }
 0x274   : >> { %v1722_v14 = vmul.f32 %v6305_v36, %v6331_v38  ;;  %v1723_v35 = vmul.f32 %v6460_v4, %v6331_v38  ;;  %v1724_v54 = vmul.f32 %v6463_v59, %v6331_v38  ;;  %v1725_v24 = vadd.f32 %v1717_v55, %v1697_v63  ;;  %v7817_v63 = vld [vmem:[#allocation17_spill] sm:$0xff] }
 0x275   : >> { %v1726_v41 = vadd.f32 %v1718_v37, %v1698_v62  ;;  %v1727_v21 = vadd.f32 %v1719_v47, %v1699_v33  ;;  %v1728_v10 = vadd.f32 %v1720_v20, %v1700_v60  ;;  %v1729_v40 = vadd.f32 %v1721_v32, %v1701_v7  ;;  %v7818_v33 = vld [vmem:[#allocation18_spill] sm:$0xff]  ;;  %v7819_v7 = vld [vmem:[#allocation19_spill] sm:$0xff] }
 0x276   : >> { %v1730_v18 = vadd.f32 %v1722_v14, %v1702_v56  ;;  %v1731_v13 = vadd.f32 %v1723_v35, %v1703_v39  ;;  %v1732_v17 = vadd.f32 %v1724_v54, %v1704_v19  ;;  %v1744_v45 = vrot.slane %v7813_v53, %v7812_v5  ;;  %v7820_v39 = vld [vmem:[#allocation20_spill] sm:$0xff] }
 0x277   : >> { %v1772_v38 = vrot.slane %v7813_v53, %v7814_v30  ;;  %v1803_v49 = vrot.slane %v7816_v29, %v7815_v42  ;;  %v6495_v62 = vrot.slane %v7816_v29, %v7817_v63  ;;  %v6499_v60 = vrot.slane %v7816_v29, %v7818_v33 }
 0x278   : >> { %v6503_v56 = vrot.slane %v7816_v29, %v7819_v7  ;;  %v6507_v19 = vrot.slane %v7816_v29, %v7820_v39  ;;  %v6511_v55 = vrot.slane %v7816_v29, %v7812_v5  ;;  %v1745_v37 = vmul.f32 %v4301_v1, %v1744_v45  ;;  %v4309_v39 = vld [vmem:[%s5815_s21 + $0x4e] sm:$0xff]  ;;  %v4310_v7 = vld [vmem:[%s5815_s21 + $0x56] sm:$0xff] }
 0x279   : >> { %v1746_v47 = vmul.f32 %v4302_v12, %v1744_v45  ;;  %v1747_v20 = vmul.f32 %v7807_v2, %v1744_v45  ;;  %v1748_v32 = vmul.f32 %v6173_v34, %v1744_v45  ;;  %v1749_v14 = vmul.f32 %v6342_v9, %v1744_v45  ;;  %v6522_v12 = vld [vmem:[%s5815_s21 + $0x96] sm:$0xff]  ;;  %v6525_v2 = vld [vmem:[%s5815_s21 + $0x9e] sm:$0xff] }
 0x27a   : >> { %v1750_v35 = vmul.f32 %v6345_v52, %v1744_v45  ;;  %v1751_v54 = vmul.f32 %v6482_v48, %v1744_v45  ;;  %v1752_v53 = vmul.f32 %v6485_v23, %v1744_v45  ;;  %v1753_v33 = vadd.f32 %v1745_v37, %v1725_v24 }
 0x27b   : >> { %v1754_v5 = vadd.f32 %v1746_v47, %v1726_v41  ;;  %v1755_v63 = vadd.f32 %v1747_v20, %v1727_v21  ;;  %v1756_v1 = vadd.f32 %v1748_v32, %v1728_v10  ;;  %v1757_v34 = vadd.f32 %v1749_v14, %v1729_v40  ;;  %v4319_v40 = vld [vmem:[%s5815_s21 + $0x60] sm:$0xff] }
 0x27c   : >> { %v1758_v42 = vadd.f32 %v1750_v35, %v1730_v18  ;;  %v1759_v29 = vadd.f32 %v1751_v54, %v1731_v13  ;;  %v1760_v30 = vadd.f32 %v1752_v53, %v1732_v17  ;;  %v1773_v48 = vmul.f32 %v4309_v39, %v1772_v38  ;;  %v4320_v18 = vld [vmem:[%s5815_s21 + $0x68] sm:$0xff] }
 0x27d   : >> { %v1774_v45 = vmul.f32 %v4310_v7, %v1772_v38  ;;  %v1775_v23 = vmul.f32 %v7809_v8, %v1772_v38  ;;  %v1776_v24 = vmul.f32 %v6195_v31, %v1772_v38  ;;  %v1777_v41 = vmul.f32 %v6356_v26, %v1772_v38  ;;  %v6536_v7 = vld [vmem:[%s5815_s21 + $0xa8] sm:$0xff]  ;;  %v6539_v8 = vld [vmem:[%s5815_s21 + $0xb0] sm:$0xff] }
 0x27e   : >> { %v1778_v21 = vmul.f32 %v6359_v28, %v1772_v38  ;;  %v1779_v10 = vmul.f32 %v6522_v12, %v1772_v38  ;;  %v1780_v37 = vmul.f32 %v6525_v2, %v1772_v38  ;;  %v1781_v13 = vadd.f32 %v1773_v48, %v1753_v33  ;;  %v4327_v54 = vld [vmem:[%s5815_s21 + $0x61] sm:$0xff] }
 0x27f   : >> { %v1782_v47 = vadd.f32 %v1774_v45, %v1754_v5  ;;  %v1783_v17 = vadd.f32 %v1775_v23, %v1755_v63  ;;  %v1784_v53 = vadd.f32 %v1776_v24, %v1756_v1  ;;  %v1785_v31 = vadd.f32 %v1777_v41, %v1757_v34  ;;  %v6550_v45 = vld [vmem:[%s5815_s21 + $0xa9] sm:$0xff] }
 0x280   : >> { %v1786_v39 = vadd.f32 %v1778_v21, %v1758_v42  ;;  %v1787_v20 = vadd.f32 %v1779_v10, %v1759_v29  ;;  %v1788_v32 = vadd.f32 %v1780_v37, %v1760_v30  ;;  %v1804_v14 = vmul.f32 %v4319_v40, %v1803_v49  ;;  %v4328_v42 = vld [vmem:[%s5815_s21 + $0x69] sm:$0xff] }
 0x281   : >> { %v1805_v38 = vmul.f32 %v4320_v18, %v1803_v49  ;;  %v1806_v35 = vmul.f32 %v6214_v51, %v1803_v49  ;;  %v1807_v48 = vmul.f32 %v6217_v61, %v1803_v49  ;;  %v1808_v23 = vmul.f32 %v6372_v58, %v1803_v49  ;;  %v6553_v51 = vld [vmem:[%s5815_s21 + $0xb1] sm:$0xff] }
 0x282   : >> { %v1809_v5 = vmul.f32 %v6375_v46, %v1803_v49  ;;  %v1810_v63 = vmul.f32 %v6536_v7, %v1803_v49  ;;  %v1811_v33 = vmul.f32 %v6539_v8, %v1803_v49  ;;  %v1812_v29 = vadd.f32 %v1804_v14, %v1781_v13  ;;  %v6575_v14 = vld [vmem:[%s5815_s21 + $0xb2] sm:$0xff] }
 0x283   : >> { %v1813_v1 = vadd.f32 %v1805_v38, %v1782_v47  ;;  %v1814_v30 = vadd.f32 %v1806_v35, %v1783_v17  ;;  %v1815_v34 = vadd.f32 %v1807_v48, %v1784_v53  ;;  %v1816_v61 = vadd.f32 %v1808_v23, %v1785_v31  ;;  %v4335_v53 = vld [vmem:[%s5815_s21 + $0x62] sm:$0xff]  ;;  %v4336_v31 = vld [vmem:[%s5815_s21 + $0x6a] sm:$0xff] }
 0x284   : >> { %v1817_v24 = vadd.f32 %v1809_v5, %v1786_v39  ;;  %v1818_v41 = vadd.f32 %v1810_v63, %v1787_v20  ;;  %v1819_v21 = vadd.f32 %v1811_v33, %v1788_v32  ;;  %v1832_v49 = vmul.f32 %v4327_v54, %v6495_v62 }
 0x285   : >> { %v1833_v10 = vmul.f32 %v4328_v42, %v6495_v62  ;;  %v1834_v37 = vmul.f32 %v6236_v11, %v6495_v62  ;;  %v1835_v40 = vmul.f32 %v6239_v44, %v6495_v62  ;;  %v1836_v18 = vmul.f32 %v6394_v16, %v6495_v62  ;;  %v6572_v44 = vld [vmem:[%s5815_s21 + $0xaa] sm:$0xff] }
 0x286   : >> { %v1837_v13 = vmul.f32 %v6397_v3, %v6495_v62  ;;  %v1838_v47 = vmul.f32 %v6550_v45, %v6495_v62  ;;  %v1839_v17 = vmul.f32 %v6553_v51, %v6495_v62  ;;  %v1840_v39 = vadd.f32 %v1832_v49, %v1812_v29 }
 0x287   : >> { %v1841_v20 = vadd.f32 %v1833_v10, %v1813_v1  ;;  %v1842_v11 = vadd.f32 %v1834_v37, %v1814_v30  ;;  %v1843_v32 = vadd.f32 %v1835_v40, %v1815_v34  ;;  %v1844_v38 = vadd.f32 %v1836_v18, %v1816_v61  ;;  %v4343_v30 = vld [vmem:[%s5815_s21 + $0x63] sm:$0xff]  ;;  %v4344_v34 = vld [vmem:[%s5815_s21 + $0x6b] sm:$0xff] }
 0x288   : >> { %v1845_v35 = vadd.f32 %v1837_v13, %v1817_v24  ;;  %v1846_v48 = vadd.f32 %v1838_v47, %v1818_v41  ;;  %v1847_v23 = vadd.f32 %v1839_v17, %v1819_v21  ;;  %v1860_v62 = vmul.f32 %v4335_v53, %v6499_v60  ;;  %v6597_v21 = vld [vmem:[%s5815_s21 + $0xb3] sm:$0xff] }
 0x289   : >> { %v1861_v5 = vmul.f32 %v4336_v31, %v6499_v60  ;;  %v1862_v63 = vmul.f32 %v6258_v27, %v6499_v60  ;;  %v1863_v33 = vmul.f32 %v6261_v43, %v6499_v60  ;;  %v1864_v54 = vmul.f32 %v6416_v0, %v6499_v60  ;;  %v6594_v43 = vld [vmem:[%s5815_s21 + $0xab] sm:$0xff] }
 0x28a   : >> { %v1865_v42 = vmul.f32 %v6419_v15, %v6499_v60  ;;  %v1866_v29 = vmul.f32 %v6572_v44, %v6499_v60  ;;  %v1867_v1 = vmul.f32 %v6575_v14, %v6499_v60  ;;  %v1868_v61 = vadd.f32 %v1860_v62, %v1840_v39 }
 0x28b   : >> { %v1869_v24 = vadd.f32 %v1861_v5, %v1841_v20  ;;  %v1870_v27 = vadd.f32 %v1862_v63, %v1842_v11  ;;  %v1871_v41 = vadd.f32 %v1863_v33, %v1843_v32  ;;  %v1872_v49 = vadd.f32 %v1864_v54, %v1844_v38  ;;  %v4351_v20 = vld [vmem:[%s5815_s21 + $0x64] sm:$0xff]  ;;  %v4352_v11 = vld [vmem:[%s5815_s21 + $0x6c] sm:$0xff] }
 0x28c   : >> { %v1873_v10 = vadd.f32 %v1865_v42, %v1845_v35  ;;  %v1874_v37 = vadd.f32 %v1866_v29, %v1846_v48  ;;  %v1875_v40 = vadd.f32 %v1867_v1, %v1847_v23  ;;  %v1888_v60 = vmul.f32 %v4343_v30, %v6503_v56  ;;  %v6619_v48 = vld [vmem:[%s5815_s21 + $0xb4] sm:$0xff] }
 0x28d   : >> { %v1889_v18 = vmul.f32 %v4344_v34, %v6503_v56  ;;  %v1890_v13 = vmul.f32 %v6280_v6, %v6503_v56  ;;  %v1891_v47 = vmul.f32 %v6283_v57, %v6503_v56  ;;  %v1892_v17 = vmul.f32 %v6438_v50, %v6503_v56  ;;  %v6616_v57 = vld [vmem:[%s5815_s21 + $0xac] sm:$0xff] }
 0x28e   : >> { %v1893_v53 = vmul.f32 %v6441_v22, %v6503_v56  ;;  %v1894_v31 = vmul.f32 %v6594_v43, %v6503_v56  ;;  %v1895_v39 = vmul.f32 %v6597_v21, %v6503_v56  ;;  %v1896_v32 = vadd.f32 %v1888_v60, %v1868_v61  ;;  %v4359_v61 = vld [vmem:[%s5815_s21 + $0x65] sm:$0xff] }
 0x28f   : >> { %v1897_v38 = vadd.f32 %v1889_v18, %v1869_v24  ;;  %v1898_v6 = vadd.f32 %v1890_v13, %v1870_v27  ;;  %v1899_v35 = vadd.f32 %v1891_v47, %v1871_v41  ;;  %v1900_v23 = vadd.f32 %v1892_v17, %v1872_v49  ;;  %v4360_v24 = vld [vmem:[%s5815_s21 + $0x6d] sm:$0xff] }
 0x290   : >> { %v1901_v62 = vadd.f32 %v1893_v53, %v1873_v10  ;;  %v1902_v5 = vadd.f32 %v1894_v31, %v1874_v37  ;;  %v1903_v63 = vadd.f32 %v1895_v39, %v1875_v40  ;;  %v1916_v56 = vmul.f32 %v4351_v20, %v6507_v19  ;;  %v6638_v10 = vld [vmem:[%s5815_s21 + $0xad] sm:$0xff]  ;;  %v7821_v53 = vld [vmem:[#allocation33_spill] sm:$0xff]  ;;  %v7822_v39 = vld [vmem:[#allocation34_spill] sm:$0xff] }
 0x291   : >> { %v1917_v33 = vmul.f32 %v4352_v11, %v6507_v19  ;;  %v1918_v54 = vmul.f32 %v6302_v25, %v6507_v19  ;;  %v1919_v42 = vmul.f32 %v6305_v36, %v6507_v19  ;;  %v1920_v29 = vmul.f32 %v6460_v4, %v6507_v19  ;;  %v6641_v36 = vld [vmem:[%s5815_s21 + $0xb5] sm:$0xff] }
 0x292   : >> { %v1921_v1 = vmul.f32 %v6463_v59, %v6507_v19  ;;  %v1922_v30 = vmul.f32 %v6616_v57, %v6507_v19  ;;  %v1923_v34 = vmul.f32 %v6619_v48, %v6507_v19  ;;  %v1924_v27 = vadd.f32 %v1916_v56, %v1896_v32  ;;  %v4368_v56 = vld [vmem:[%s5815_s21 + $0x6e] sm:$0xff] }
 0x293   : >> { %v1925_v41 = vadd.f32 %v1917_v33, %v1897_v38  ;;  %v1926_v25 = vadd.f32 %v1918_v54, %v1898_v6  ;;  %v1927_v49 = vadd.f32 %v1919_v42, %v1899_v35  ;;  %v1928_v37 = vadd.f32 %v1920_v29, %v1900_v23  ;;  %v6660_v33 = vld [vmem:[%s5815_s21 + $0xae] sm:$0xff]  ;;  %v6663_v54 = vld [vmem:[%s5815_s21 + $0xb6] sm:$0xff]  ;;  %v7825_v42 = vld [vmem:[#allocation22_spill] sm:$0xff] }
 0x294   : >> { %v1929_v40 = vadd.f32 %v1921_v1, %v1901_v62  ;;  %v1930_v60 = vadd.f32 %v1922_v30, %v1902_v5  ;;  %v1931_v18 = vadd.f32 %v1923_v34, %v1903_v63  ;;  %v1944_v13 = vmul.f32 %v4359_v61, %v6511_v55  ;;  %v4367_v63 = vld [vmem:[%s5815_s21 + $0x66] sm:$0xff]  ;;  %7823 = vst [vmem:[#allocation35_spill] sm:$0xff] %v6660_v33  ;;  %v7826_v29 = vld [vmem:[#allocation8_spill] sm:$0xff]  ;;  %v7828_v34 = vld [vmem:[#allocation9_spill] sm:$0xff] }
 0x295   : >> { %v1945_v47 = vmul.f32 %v4360_v24, %v6511_v55  ;;  %v1946_v19 = vmul.f32 %v6342_v9, %v6511_v55  ;;  %v1947_v17 = vmul.f32 %v6345_v52, %v6511_v55  ;;  %v1948_v31 = vmul.f32 %v7821_v53, %v6511_v55  ;;  %7824 = vst [vmem:[#allocation36_spill] sm:$0xff] %v6663_v54  ;;  %v7827_v30 = vld [vmem:[#allocation15_spill] sm:$0xff]  ;;  %v7829_v61 = vld [vmem:[#allocation17_spill] sm:$0xff] }
 0x296   : >> { %v1949_v20 = vmul.f32 %v7822_v39, %v6511_v55  ;;  %v1950_v11 = vmul.f32 %v6638_v10, %v6511_v55  ;;  %v1951_v32 = vmul.f32 %v6641_v36, %v6511_v55  ;;  %v1952_v38 = vadd.f32 %v1944_v13, %v1924_v27  ;;  %v7830_v27 = vld [vmem:[#allocation18_spill] sm:$0xff] }
 0x297   : >> { %v1953_v6 = vadd.f32 %v1945_v47, %v1925_v41  ;;  %v1954_v9 = vadd.f32 %v1946_v19, %v1926_v25  ;;  %v1955_v35 = vadd.f32 %v1947_v17, %v1927_v49  ;;  %v1956_v23 = vadd.f32 %v1948_v31, %v1928_v37  ;;  %v7831_v25 = vld [vmem:[#allocation19_spill] sm:$0xff]  ;;  %v7832_v37 = vld [vmem:[#allocation20_spill] sm:$0xff] }
 0x298   : >> { %v1957_v62 = vadd.f32 %v1949_v20, %v1929_v40  ;;  %v1958_v52 = vadd.f32 %v1950_v11, %v1930_v60  ;;  %v1959_v5 = vadd.f32 %v1951_v32, %v1931_v18  ;;  %v1971_v1 = vrot.slane %v7826_v29, %v7825_v42  ;;  %v7833_v60 = vld [vmem:[#allocation21_spill] sm:$0xff] }
 0x299   : >> { %v2002_v55 = vrot.slane %v7828_v34, %v7827_v30  ;;  %v2030_v24 = vrot.slane %v7828_v34, %v7829_v61  ;;  %v6673_v41 = vrot.slane %v7828_v34, %v7830_v27  ;;  %v6677_v49 = vrot.slane %v7828_v34, %v7831_v25 }
 0x29a   : >> { %v6681_v40 = vrot.slane %v7828_v34, %v7832_v37  ;;  %v6685_v18 = vrot.slane %v7828_v34, %v7833_v60  ;;  %v6689_v13 = vrot.slane %v7828_v34, %v7825_v42  ;;  %v1972_v47 = vmul.f32 %v4367_v63, %v1971_v1  ;;  %v4377_v60 = vld [vmem:[%s5815_s21 + $0x78] sm:$0xff]  ;;  %v4378_v37 = vld [vmem:[%s5815_s21 + $0x80] sm:$0xff] }
 0x29b   : >> { %v1973_v19 = vmul.f32 %v4368_v56, %v1971_v1  ;;  %v1974_v17 = vmul.f32 %v6356_v26, %v1971_v1  ;;  %v1975_v31 = vmul.f32 %v6359_v28, %v1971_v1  ;;  %v1976_v20 = vmul.f32 %v6522_v12, %v1971_v1  ;;  %v6700_v56 = vld [vmem:[%s5815_s21 + $0xc0] sm:$0xff]  ;;  %v6703_v26 = vld [vmem:[%s5815_s21 + $0xc8] sm:$0xff] }
 0x29c   : >> { %v1977_v11 = vmul.f32 %v6525_v2, %v1971_v1  ;;  %v1978_v32 = vmul.f32 %v6660_v33, %v1971_v1  ;;  %v1979_v29 = vmul.f32 %v6663_v54, %v1971_v1  ;;  %v1980_v25 = vadd.f32 %v1972_v47, %v1952_v38 }
 0x29d   : >> { %v1981_v34 = vadd.f32 %v1973_v19, %v1953_v6  ;;  %v1982_v42 = vadd.f32 %v1974_v17, %v1954_v9  ;;  %v1983_v63 = vadd.f32 %v1975_v31, %v1955_v35  ;;  %v1984_v28 = vadd.f32 %v1976_v20, %v1956_v23  ;;  %v4385_v23 = vld [vmem:[%s5815_s21 + $0x79] sm:$0xff] }
 0x29e   : >> { %v1985_v27 = vadd.f32 %v1977_v11, %v1957_v62  ;;  %v1986_v61 = vadd.f32 %v1978_v32, %v1958_v52  ;;  %v1987_v30 = vadd.f32 %v1979_v29, %v1959_v5  ;;  %v2003_v33 = vmul.f32 %v4377_v60, %v2002_v55  ;;  %v4386_v62 = vld [vmem:[%s5815_s21 + $0x81] sm:$0xff] }
 0x29f   : >> { %v2004_v1 = vmul.f32 %v4378_v37, %v2002_v55  ;;  %v2005_v54 = vmul.f32 %v6372_v58, %v2002_v55  ;;  %v2006_v38 = vmul.f32 %v6375_v46, %v2002_v55  ;;  %v2007_v6 = vmul.f32 %v6536_v7, %v2002_v55  ;;  %v6714_v37 = vld [vmem:[%s5815_s21 + $0xc1] sm:$0xff]  ;;  %v6717_v58 = vld [vmem:[%s5815_s21 + $0xc9] sm:$0xff] }
 0x2a0   : >> { %v2008_v9 = vmul.f32 %v6539_v8, %v2002_v55  ;;  %v2009_v35 = vmul.f32 %v6700_v56, %v2002_v55  ;;  %v2010_v47 = vmul.f32 %v6703_v26, %v2002_v55  ;;  %v2011_v52 = vadd.f32 %v2003_v33, %v1980_v25  ;;  %v4393_v29 = vld [vmem:[%s5815_s21 + $0x7a] sm:$0xff] }
 0x2a1   : >> { %v2012_v19 = vadd.f32 %v2004_v1, %v1981_v34  ;;  %v2013_v5 = vadd.f32 %v2005_v54, %v1982_v42  ;;  %v2014_v60 = vadd.f32 %v2006_v38, %v1983_v63  ;;  %v2015_v46 = vadd.f32 %v2007_v6, %v1984_v28  ;;  %v6728_v1 = vld [vmem:[%s5815_s21 + $0xc2] sm:$0xff] }
 0x2a2   : >> { %v2016_v17 = vadd.f32 %v2008_v9, %v1985_v27  ;;  %v2017_v31 = vadd.f32 %v2009_v35, %v1986_v61  ;;  %v2018_v20 = vadd.f32 %v2010_v47, %v1987_v30  ;;  %v2031_v11 = vmul.f32 %v4385_v23, %v2030_v24  ;;  %v4394_v27 = vld [vmem:[%s5815_s21 + $0x82] sm:$0xff] }
 0x2a3   : >> { %v2032_v55 = vmul.f32 %v4386_v62, %v2030_v24  ;;  %v2033_v32 = vmul.f32 %v6394_v16, %v2030_v24  ;;  %v2034_v33 = vmul.f32 %v6397_v3, %v2030_v24  ;;  %v2035_v54 = vmul.f32 %v6550_v45, %v2030_v24  ;;  %v6731_v16 = vld [vmem:[%s5815_s21 + $0xca] sm:$0xff] }
 0x2a4   : >> { %v2036_v42 = vmul.f32 %v6553_v51, %v2030_v24  ;;  %v2037_v34 = vmul.f32 %v6714_v37, %v2030_v24  ;;  %v2038_v25 = vmul.f32 %v6717_v58, %v2030_v24  ;;  %v2039_v61 = vadd.f32 %v2031_v11, %v2011_v52  ;;  %v6753_v11 = vld [vmem:[%s5815_s21 + $0xcb] sm:$0xff] }
 0x2a5   : >> { %v2040_v63 = vadd.f32 %v2032_v55, %v2012_v19  ;;  %v2041_v30 = vadd.f32 %v2033_v32, %v2013_v5  ;;  %v2042_v28 = vadd.f32 %v2034_v33, %v2014_v60  ;;  %v2043_v3 = vadd.f32 %v2035_v54, %v2015_v46  ;;  %v4401_v60 = vld [vmem:[%s5815_s21 + $0x7b] sm:$0xff]  ;;  %v4402_v46 = vld [vmem:[%s5815_s21 + $0x83] sm:$0xff] }
 0x2a6   : >> { %v2044_v38 = vadd.f32 %v2036_v42, %v2016_v17  ;;  %v2045_v6 = vadd.f32 %v2037_v34, %v2017_v31  ;;  %v2046_v9 = vadd.f32 %v2038_v25, %v2018_v20  ;;  %v2059_v24 = vmul.f32 %v4393_v29, %v6673_v41 }
 0x2a7   : >> { %v2060_v35 = vmul.f32 %v4394_v27, %v6673_v41  ;;  %v2061_v47 = vmul.f32 %v6416_v0, %v6673_v41  ;;  %v2062_v23 = vmul.f32 %v6419_v15, %v6673_v41  ;;  %v2063_v62 = vmul.f32 %v6572_v44, %v6673_v41  ;;  %v6750_v15 = vld [vmem:[%s5815_s21 + $0xc3] sm:$0xff] }
 0x2a8   : >> { %v2064_v52 = vmul.f32 %v6575_v14, %v6673_v41  ;;  %v2065_v19 = vmul.f32 %v6728_v1, %v6673_v41  ;;  %v2066_v5 = vmul.f32 %v6731_v16, %v6673_v41  ;;  %v2067_v17 = vadd.f32 %v2059_v24, %v2039_v61 }
 0x2a9   : >> { %v2068_v31 = vadd.f32 %v2060_v35, %v2040_v63  ;;  %v2069_v0 = vadd.f32 %v2061_v47, %v2041_v30  ;;  %v2070_v20 = vadd.f32 %v2062_v23, %v2042_v28  ;;  %v2071_v55 = vadd.f32 %v2063_v62, %v2043_v3  ;;  %v4409_v30 = vld [vmem:[%s5815_s21 + $0x7c] sm:$0xff]  ;;  %v4410_v28 = vld [vmem:[%s5815_s21 + $0x84] sm:$0xff] }
 0x2aa   : >> { %v2072_v32 = vadd.f32 %v2064_v52, %v2044_v38  ;;  %v2073_v33 = vadd.f32 %v2065_v19, %v2045_v6  ;;  %v2074_v54 = vadd.f32 %v2066_v5, %v2046_v9  ;;  %v2087_v41 = vmul.f32 %v4401_v60, %v6677_v49  ;;  %v6775_v9 = vld [vmem:[%s5815_s21 + $0xcc] sm:$0xff] }
 0x2ab   : >> { %v2088_v42 = vmul.f32 %v4402_v46, %v6677_v49  ;;  %v2089_v34 = vmul.f32 %v6438_v50, %v6677_v49  ;;  %v2090_v25 = vmul.f32 %v6441_v22, %v6677_v49  ;;  %v2091_v29 = vmul.f32 %v6594_v43, %v6677_v49  ;;  %v6772_v22 = vld [vmem:[%s5815_s21 + $0xc4] sm:$0xff] }
 0x2ac   : >> { %v2092_v27 = vmul.f32 %v6597_v21, %v6677_v49  ;;  %v2093_v61 = vmul.f32 %v6750_v15, %v6677_v49  ;;  %v2094_v63 = vmul.f32 %v6753_v11, %v6677_v49  ;;  %v2095_v3 = vadd.f32 %v2087_v41, %v2067_v17 }
 0x2ad   : >> { %v2096_v38 = vadd.f32 %v2088_v42, %v2068_v31  ;;  %v2097_v50 = vadd.f32 %v2089_v34, %v2069_v0  ;;  %v2098_v6 = vadd.f32 %v2090_v25, %v2070_v20  ;;  %v2099_v24 = vadd.f32 %v2091_v29, %v2071_v55  ;;  %v4417_v31 = vld [vmem:[%s5815_s21 + $0x7d] sm:$0xff]  ;;  %v4418_v0 = vld [vmem:[%s5815_s21 + $0x85] sm:$0xff] }
 0x2ae   : >> { %v2100_v35 = vadd.f32 %v2092_v27, %v2072_v32  ;;  %v2101_v47 = vadd.f32 %v2093_v61, %v2073_v33  ;;  %v2102_v23 = vadd.f32 %v2094_v63, %v2074_v54  ;;  %v2115_v49 = vmul.f32 %v4409_v30, %v6681_v40  ;;  %v6797_v33 = vld [vmem:[%s5815_s21 + $0xcd] sm:$0xff] }
 0x2af   : >> { %v2116_v62 = vmul.f32 %v4410_v28, %v6681_v40  ;;  %v2117_v52 = vmul.f32 %v6460_v4, %v6681_v40  ;;  %v2118_v19 = vmul.f32 %v6463_v59, %v6681_v40  ;;  %v2119_v5 = vmul.f32 %v6616_v57, %v6681_v40  ;;  %v6794_v59 = vld [vmem:[%s5815_s21 + $0xc5] sm:$0xff] }
 0x2b0   : >> { %v2120_v60 = vmul.f32 %v6619_v48, %v6681_v40  ;;  %v2121_v46 = vmul.f32 %v6772_v22, %v6681_v40  ;;  %v2122_v17 = vmul.f32 %v6775_v9, %v6681_v40  ;;  %v2123_v20 = vadd.f32 %v2115_v49, %v2095_v3  ;;  %v4425_v3 = vld [vmem:[%s5815_s21 + $0x7e] sm:$0xff] }
 0x2b1   : >> { %v2124_v55 = vadd.f32 %v2116_v62, %v2096_v38  ;;  %v2125_v4 = vadd.f32 %v2117_v52, %v2097_v50  ;;  %v2126_v32 = vadd.f32 %v2118_v19, %v2098_v6  ;;  %v2127_v54 = vadd.f32 %v2119_v5, %v2099_v24  ;;  %v4426_v38 = vld [vmem:[%s5815_s21 + $0x86] sm:$0xff] }
 0x2b2   : >> { %v2128_v41 = vadd.f32 %v2120_v60, %v2100_v35  ;;  %v2129_v42 = vadd.f32 %v2121_v46, %v2101_v47  ;;  %v2130_v34 = vadd.f32 %v2122_v17, %v2102_v23  ;;  %v2143_v40 = vmul.f32 %v4417_v31, %v6685_v18  ;;  %v6816_v35 = vld [vmem:[%s5815_s21 + $0xc6] sm:$0xff]  ;;  %v7835_v17 = vld [vmem:[#allocation36_spill] sm:$0xff] }
 0x2b3   : >> { %v2144_v25 = vmul.f32 %v4418_v0, %v6685_v18  ;;  %v2145_v29 = vmul.f32 %v7821_v53, %v6685_v18  ;;  %v2146_v27 = vmul.f32 %v7822_v39, %v6685_v18  ;;  %v2147_v61 = vmul.f32 %v6638_v10, %v6685_v18  ;;  %v6819_v39 = vld [vmem:[%s5815_s21 + $0xce] sm:$0xff] }
 0x2b4   : >> { %v2148_v63 = vmul.f32 %v6641_v36, %v6685_v18  ;;  %v2149_v30 = vmul.f32 %v6794_v59, %v6685_v18  ;;  %v2150_v28 = vmul.f32 %v6797_v33, %v6685_v18  ;;  %v2151_v50 = vadd.f32 %v2143_v40, %v2123_v20  ;;  %v7834_v60 = vld [vmem:[#allocation35_spill] sm:$0xff]  ;;  %v4436_v40 = vld [vmem:[%s5815_s21 + $0x98] sm:$0xff] }
 0x2b5   : >> { %v2152_v6 = vadd.f32 %v2144_v25, %v2124_v55  ;;  %v2153_v53 = vadd.f32 %v2145_v29, %v2125_v4  ;;  %v2154_v24 = vadd.f32 %v2146_v27, %v2126_v32  ;;  %v2155_v47 = vadd.f32 %v2147_v61, %v2127_v54  ;;  %v4441_v25 = vld [vmem:[%s5815_s21 + $0xd8] sm:$0xff]  ;;  %v4442_v29 = vld [vmem:[%s5815_s21 + $0xe0] sm:$0xff]  ;;  %v7836_v27 = vld [vmem:[#allocation15_spill] sm:$0xff] }
 0x2b6   : >> { %v2156_v23 = vadd.f32 %v2148_v63, %v2128_v41  ;;  %v2157_v49 = vadd.f32 %v2149_v30, %v2129_v42  ;;  %v2158_v62 = vadd.f32 %v2150_v28, %v2130_v34  ;;  %v2171_v52 = vmul.f32 %v4425_v3, %v6689_v13  ;;  %v4435_v34 = vld [vmem:[%s5815_s21 + $0x90] sm:$0xff]  ;;  %v7837_v61 = vld [vmem:[#allocation10_spill] sm:$0xff]  ;;  %v7838_v30 = vld [vmem:[#allocation17_spill] sm:$0xff] }
 0x2b7   : >> { %v2172_v19 = vmul.f32 %v4426_v38, %v6689_v13  ;;  %v2173_v18 = vmul.f32 %v6522_v12, %v6689_v13  ;;  %v2174_v5 = vmul.f32 %v6525_v2, %v6689_v13  ;;  %v2175_v46 = vmul.f32 %v7834_v60, %v6689_v13  ;;  %v7840_v38 = vld [vmem:[#allocation19_spill] sm:$0xff] }
 0x2b8   : >> { %v2176_v31 = vmul.f32 %v7835_v17, %v6689_v13  ;;  %v2177_v0 = vmul.f32 %v6816_v35, %v6689_v13  ;;  %v2178_v20 = vmul.f32 %v6819_v39, %v6689_v13  ;;  %v2179_v55 = vadd.f32 %v2171_v52, %v2151_v50  ;;  %v7839_v13 = vld [vmem:[#allocation18_spill] sm:$0xff] }
 0x2b9   : >> { %v2180_v4 = vadd.f32 %v2172_v19, %v2152_v6  ;;  %v2181_v12 = vadd.f32 %v2173_v18, %v2153_v53  ;;  %v2182_v32 = vadd.f32 %v2174_v5, %v2154_v24  ;;  %v2183_v54 = vadd.f32 %v2175_v46, %v2155_v47  ;;  %v7841_v6 = vld [vmem:[#allocation20_spill] sm:$0xff]  ;;  %v7842_v24 = vld [vmem:[#allocation21_spill] sm:$0xff] }
 0x2ba   : >> { %v2184_v41 = vadd.f32 %v2176_v31, %v2156_v23  ;;  %v2185_v2 = vadd.f32 %v2177_v0, %v2157_v49  ;;  %v2186_v42 = vadd.f32 %v2178_v20, %v2158_v62  ;;  %v2201_v63 = vrot.slane %v7837_v61, %v7836_v27  ;;  %v7843_v23 = vld [vmem:[#allocation22_spill] sm:$0xff]  ;;  %v7844_v62 = vld [vmem:[#allocation16_spill] sm:$0xff] }
 0x2bb   : >> { %v2229_v28 = vrot.slane %v7837_v61, %v7838_v30  ;;  %v2257_v3 = vrot.slane %v7837_v61, %v7839_v13  ;;  %v6847_v50 = vrot.slane %v7837_v61, %v7840_v38  ;;  %v6851_v53 = vrot.slane %v7837_v61, %v7841_v6  ;;  %v4443_v13 = vld [vmem:[%s5815_s21 + $0x91] sm:$0xff]  ;;  %v4444_v38 = vld [vmem:[%s5815_s21 + $0x99] sm:$0xff] }
 0x2bc   : >> { %v6855_v47 = vrot.slane %v7837_v61, %v7842_v24  ;;  %v6859_v49 = vrot.slane %v7837_v61, %v7843_v23  ;;  %v6863_v52 = vrot.slane %v7844_v62, %v7838_v30  ;;  %v2202_v19 = vmul.f32 %v4435_v34, %v2201_v63  ;;  %v4449_v34 = vld [vmem:[%s5815_s21 + $0xd9] sm:$0xff] }
 0x2bd   : >> { %v2203_v18 = vmul.f32 %v4436_v40, %v2201_v63  ;;  %v2204_v5 = vmul.f32 %v6536_v7, %v2201_v63  ;;  %v2205_v46 = vmul.f32 %v6539_v8, %v2201_v63  ;;  %v2206_v31 = vmul.f32 %v6700_v56, %v2201_v63  ;;  %v4450_v40 = vld [vmem:[%s5815_s21 + $0xe1] sm:$0xff] }
 0x2be   : >> { %v2207_v0 = vmul.f32 %v6703_v26, %v2201_v63  ;;  %v2208_v20 = vmul.f32 %v4441_v25, %v2201_v63  ;;  %v2209_v27 = vmul.f32 %v4442_v29, %v2201_v63  ;;  %v2210_v6 = vadd.f32 %v2202_v19, %v2179_v55  ;;  %v4451_v63 = vld [vmem:[%s5815_s21 + $0x92] sm:$0xff]  ;;  %v4452_v19 = vld [vmem:[%s5815_s21 + $0x9a] sm:$0xff] }
 0x2bf   : >> { %v2211_v24 = vadd.f32 %v2203_v18, %v2180_v4  ;;  %v2212_v23 = vadd.f32 %v2204_v5, %v2181_v12  ;;  %v2213_v30 = vadd.f32 %v2205_v46, %v2182_v32  ;;  %v2214_v62 = vadd.f32 %v2206_v31, %v2183_v54  ;;  %v4457_v18 = vld [vmem:[%s5815_s21 + $0xda] sm:$0xff]  ;;  %v4458_v5 = vld [vmem:[%s5815_s21 + $0xe2] sm:$0xff] }
 0x2c0   : >> { %v2215_v7 = vadd.f32 %v2207_v0, %v2184_v41  ;;  %v2216_v61 = vadd.f32 %v2208_v20, %v2185_v2  ;;  %v2217_v8 = vadd.f32 %v2209_v27, %v2186_v42  ;;  %v2230_v56 = vmul.f32 %v4443_v13, %v2229_v28 }
 0x2c1   : >> { %v2231_v26 = vmul.f32 %v4444_v38, %v2229_v28  ;;  %v2232_v25 = vmul.f32 %v6550_v45, %v2229_v28  ;;  %v2233_v29 = vmul.f32 %v6553_v51, %v2229_v28  ;;  %v2234_v55 = vmul.f32 %v6714_v37, %v2229_v28 }
 0x2c2   : >> { %v2235_v4 = vmul.f32 %v6717_v58, %v2229_v28  ;;  %v2236_v12 = vmul.f32 %v4449_v34, %v2229_v28  ;;  %v2237_v32 = vmul.f32 %v4450_v40, %v2229_v28  ;;  %v2238_v54 = vadd.f32 %v2230_v56, %v2210_v6  ;;  %v4459_v6 = vld [vmem:[%s5815_s21 + $0x93] sm:$0xff]  ;;  %v4465_v40 = vld [vmem:[%s5815_s21 + $0xdb] sm:$0xff] }
 0x2c3   : >> { %v2239_v41 = vadd.f32 %v2231_v26, %v2211_v24  ;;  %v2240_v2 = vadd.f32 %v2232_v25, %v2212_v23  ;;  %v2241_v42 = vadd.f32 %v2233_v29, %v2213_v30  ;;  %v2242_v46 = vadd.f32 %v2234_v55, %v2214_v62  ;;  %v4460_v24 = vld [vmem:[%s5815_s21 + $0x9b] sm:$0xff]  ;;  %v4466_v62 = vld [vmem:[%s5815_s21 + $0xe3] sm:$0xff] }
 0x2c4   : >> { %v2243_v45 = vadd.f32 %v2235_v4, %v2215_v7  ;;  %v2244_v31 = vadd.f32 %v2236_v12, %v2216_v61  ;;  %v2245_v51 = vadd.f32 %v2237_v32, %v2217_v8  ;;  %v2258_v37 = vmul.f32 %v4451_v63, %v2257_v3  ;;  %v4467_v4 = vld [vmem:[%s5815_s21 + $0x94] sm:$0xff]  ;;  %v4468_v12 = vld [vmem:[%s5815_s21 + $0x9c] sm:$0xff] }
 0x2c5   : >> { %v2259_v58 = vmul.f32 %v4452_v19, %v2257_v3  ;;  %v2260_v28 = vmul.f32 %v6572_v44, %v2257_v3  ;;  %v2261_v0 = vmul.f32 %v6575_v14, %v2257_v3  ;;  %v2262_v20 = vmul.f32 %v6728_v1, %v2257_v3 }
 0x2c6   : >> { %v2263_v27 = vmul.f32 %v6731_v16, %v2257_v3  ;;  %v2264_v13 = vmul.f32 %v4457_v18, %v2257_v3  ;;  %v2265_v38 = vmul.f32 %v4458_v5, %v2257_v3  ;;  %v2266_v23 = vadd.f32 %v2258_v37, %v2238_v54  ;;  %v4473_v54 = vld [vmem:[%s5815_s21 + $0xdc] sm:$0xff] }
 0x2c7   : >> { %v2267_v30 = vadd.f32 %v2259_v58, %v2239_v41  ;;  %v2268_v61 = vadd.f32 %v2260_v28, %v2240_v2  ;;  %v2269_v34 = vadd.f32 %v2261_v0, %v2241_v42  ;;  %v2270_v7 = vadd.f32 %v2262_v20, %v2242_v46  ;;  %v4475_v37 = vld [vmem:[%s5815_s21 + $0x95] sm:$0xff]  ;;  %v4476_v58 = vld [vmem:[%s5815_s21 + $0x9d] sm:$0xff] }
 0x2c8   : >> { %v2271_v44 = vadd.f32 %v2263_v27, %v2243_v45  ;;  %v2272_v8 = vadd.f32 %v2264_v13, %v2244_v31  ;;  %v2273_v14 = vadd.f32 %v2265_v38, %v2245_v51  ;;  %v2286_v1 = vmul.f32 %v4459_v6, %v6847_v50  ;;  %v4481_v27 = vld [vmem:[%s5815_s21 + $0xdd] sm:$0xff] }
 0x2c9   : >> { %v2287_v16 = vmul.f32 %v4460_v24, %v6847_v50  ;;  %v2288_v3 = vmul.f32 %v6594_v43, %v6847_v50  ;;  %v2289_v56 = vmul.f32 %v6597_v21, %v6847_v50  ;;  %v2290_v26 = vmul.f32 %v6750_v15, %v6847_v50  ;;  %v4474_v21 = vld [vmem:[%s5815_s21 + $0xe4] sm:$0xff] }
 0x2ca   : >> { %v2291_v25 = vmul.f32 %v6753_v11, %v6847_v50  ;;  %v2292_v29 = vmul.f32 %v4465_v40, %v6847_v50  ;;  %v2293_v55 = vmul.f32 %v4466_v62, %v6847_v50  ;;  %v2294_v32 = vadd.f32 %v2286_v1, %v2266_v23  ;;  %v4483_v62 = vld [vmem:[%s5815_s21 + $0x96] sm:$0xff] }
 0x2cb   : >> { %v2295_v63 = vadd.f32 %v2287_v16, %v2267_v30  ;;  %v2296_v19 = vadd.f32 %v2288_v3, %v2268_v61  ;;  %v2297_v43 = vadd.f32 %v2289_v56, %v2269_v34  ;;  %v2298_v41 = vadd.f32 %v2290_v26, %v2270_v7  ;;  %v4484_v7 = vld [vmem:[%s5815_s21 + $0x9e] sm:$0xff]  ;;  %v4490_v16 = vld [vmem:[%s5815_s21 + $0xe6] sm:$0xff] }
 0x2cc   : >> { %v2299_v2 = vadd.f32 %v2291_v25, %v2271_v44  ;;  %v2300_v15 = vadd.f32 %v2292_v29, %v2272_v8  ;;  %v2301_v42 = vadd.f32 %v2293_v55, %v2273_v14  ;;  %v2314_v11 = vmul.f32 %v4467_v4, %v6851_v53 }
 0x2cd   : >> { %v2315_v50 = vmul.f32 %v4468_v12, %v6851_v53  ;;  %v2316_v18 = vmul.f32 %v6616_v57, %v6851_v53  ;;  %v2317_v5 = vmul.f32 %v6619_v48, %v6851_v53  ;;  %v2318_v46 = vmul.f32 %v6772_v22, %v6851_v53  ;;  %v4482_v48 = vld [vmem:[%s5815_s21 + $0xe5] sm:$0xff] }
 0x2ce   : >> { %v2319_v45 = vmul.f32 %v6775_v9, %v6851_v53  ;;  %v2320_v31 = vmul.f32 %v4473_v54, %v6851_v53  ;;  %v2321_v51 = vmul.f32 %v4474_v21, %v6851_v53  ;;  %v2322_v28 = vadd.f32 %v2314_v11, %v2294_v32 }
 0x2cf   : >> { %v2323_v0 = vadd.f32 %v2315_v50, %v2295_v63  ;;  %v2324_v20 = vadd.f32 %v2316_v18, %v2296_v19  ;;  %v2325_v57 = vadd.f32 %v2317_v5, %v2297_v43  ;;  %v2326_v13 = vadd.f32 %v2318_v46, %v2298_v41  ;;  %v5228_v50 = vld [vmem:[%s5815_s21 + $0x4b] sm:$0xff]  ;;  %v5229_v5 = vld [vmem:[%s5815_s21 + $0x53] sm:$0xff] }
 0x2d0   : >> { %v2327_v38 = vadd.f32 %v2319_v45, %v2299_v2  ;;  %v2328_v22 = vadd.f32 %v2320_v31, %v2300_v15  ;;  %v2329_v6 = vadd.f32 %v2321_v51, %v2301_v42  ;;  %v2342_v9 = vmul.f32 %v4475_v37, %v6855_v47  ;;  %v5230_v45 = vld [vmem:[%s5815_s21 + $0x63] sm:$0xff]  ;;  %v5231_v51 = vld [vmem:[%s5815_s21 + $0x6b] sm:$0xff] }
 0x2d1   : >> { %v2343_v53 = vmul.f32 %v4476_v58, %v6855_v47  ;;  %v2344_v24 = vmul.f32 %v6638_v10, %v6855_v47  ;;  %v2345_v23 = vmul.f32 %v6641_v36, %v6855_v47  ;;  %v2346_v30 = vmul.f32 %v6794_v59, %v6855_v47  ;;  %v4489_v10 = vld [vmem:[%s5815_s21 + $0xde] sm:$0xff] }
 0x2d2   : >> { %v2347_v61 = vmul.f32 %v6797_v33, %v6855_v47  ;;  %v2348_v34 = vmul.f32 %v4481_v27, %v6855_v47  ;;  %v2349_v40 = vmul.f32 %v4482_v48, %v6855_v47  ;;  %v2350_v44 = vadd.f32 %v2342_v9, %v2322_v28  ;;  %v5232_v58 = vld [vmem:[%s5815_s21 + $0x7b] sm:$0xff] }
 0x2d3   : >> { %v2351_v8 = vadd.f32 %v2343_v53, %v2323_v0  ;;  %v2352_v14 = vadd.f32 %v2344_v24, %v2324_v20  ;;  %v2353_v1 = vadd.f32 %v2345_v23, %v2325_v57  ;;  %v2354_v3 = vadd.f32 %v2346_v30, %v2326_v13  ;;  %v5233_v0 = vld [vmem:[%s5815_s21 + $0x83] sm:$0xff]  ;;  %v5234_v57 = vld [vmem:[%s5815_s21 + $0x93] sm:$0xff]  ;;  %v5235_v48 = vld [vmem:[%s5815_s21 + $0x9b] sm:$0xff] }
 0x2d4   : >> { %v2355_v36 = vadd.f32 %v2347_v61, %v2327_v38  ;;  %v2356_v56 = vadd.f32 %v2348_v34, %v2328_v22  ;;  %v2357_v59 = vadd.f32 %v2349_v40, %v2329_v6  ;;  %v2370_v26 = vmul.f32 %v4483_v62, %v6859_v49  ;;  %v2449_v38 = vld [vmem:[%s7636_s3 + $0x8] sm:$0xff] (%p989_p4)  ;;  %v2450_v22 = vld [vmem:[%s7636_s3 + $0x10] sm:$0xff] (%p989_p4)  ;;  %v2451_v9 = vld [vmem:[%s7636_s3 + $0x18] sm:$0xff] (%p989_p4) }
 0x2d5   : >> { %v2371_v33 = vmul.f32 %v4484_v7, %v6859_v49  ;;  %v2372_v47 = vmul.f32 %v7834_v60, %v6859_v49  ;;  %v2373_v25 = vmul.f32 %v7835_v17, %v6859_v49  ;;  %v2374_v29 = vmul.f32 %v6816_v35, %v6859_v49  ;;  %v2452_v24 = vld [vmem:[%s7636_s3 + $0x20] sm:$0xff] (%p989_p4)  ;;  %v2453_v23 = vld [vmem:[%s7636_s3 + $0x28] sm:$0xff] (%p989_p4)  ;;  %v2454_v34 = vld [vmem:[%s7636_s3 + $0x30] sm:$0xff] (%p989_p4) }
 0x2d6   : >> { %v2375_v55 = vmul.f32 %v6819_v39, %v6859_v49  ;;  %v2376_v4 = vmul.f32 %v4489_v10, %v6859_v49  ;;  %v2377_v12 = vmul.f32 %v4490_v16, %v6859_v49  ;;  %v2378_v32 = vadd.f32 %v2370_v26, %v2350_v44  ;;  %v2455_v40 = vld [vmem:[%s7636_s3 + $0x38] sm:$0xff] (%p989_p4)  ;;  %v2456_v7 = vld [vmem:[%s7636_s3 + $0x40] sm:$0xff] (%p989_p4)  ;;  %v2457_v44 = vld [vmem:[%s7636_s3 + $0x48] sm:$0xff] (%p989_p4) }
 0x2d7   : >> { %v2379_v63 = vadd.f32 %v2371_v33, %v2351_v8  ;;  %v2380_v19 = vadd.f32 %v2372_v47, %v2352_v14  ;;  %v2381_v43 = vadd.f32 %v2373_v25, %v2353_v1  ;;  %v2382_v60 = vadd.f32 %v2374_v29, %v2354_v3  ;;  %v2458_v14 = vld [vmem:[%s7636_s3 + $0x50] sm:$0xff] (%p989_p4)  ;;  %v2459_v1 = vld [vmem:[%s7636_s3 + $0x58] sm:$0xff] (%p989_p4)  ;;  %v2460_v16 = vld [vmem:[%s7636_s3 + $0x60] sm:$0xff] (%p989_p4) }
 0x2d8   : >> { %v2383_v17 = vadd.f32 %v2375_v55, %v2355_v36  ;;  %v2384_v54 = vadd.f32 %v2376_v4, %v2356_v56  ;;  %v2385_v35 = vadd.f32 %v2377_v12, %v2357_v59  ;;  %v2390_v21 = vadd.f32 %v6863_v52, %v2378_v32  ;;  %v2461_v3 = vld [vmem:[%s7636_s3 + $0x68] sm:$0xff] (%p989_p4)  ;;  %v2462_v56 = vld [vmem:[%s7636_s3 + $0x70] sm:$0xff] (%p989_p4)  ;;  %v2463_v59 = vld [vmem:[%s7636_s3 + $0x78] sm:$0xff] (%p989_p4) }
 0x2d9   : >> { %v2391_v39 = vadd.f32 %v6863_v52, %v2379_v63  ;;  %v2392_v49 = vadd.f32 %v6863_v52, %v2380_v19  ;;  %v2393_v41 = vadd.f32 %v6863_v52, %v2381_v43  ;;  %v2394_v2 = vadd.f32 %v6863_v52, %v2382_v60 }
 0x2da   : >> { %v2395_v15 = vadd.f32 %v6863_v52, %v2383_v17  ;;  %v2396_v42 = vadd.f32 %v6863_v52, %v2384_v54  ;;  %v2397_v11 = vadd.f32 %v6863_v52, %v2385_v35  ;;  %v2398_v18 = vadd.f32 %v5228_v50, %v2390_v21  ;;  %991 = sbr.rel (!%p989_p4) target bundleno = 517 (0x205), region = 114  ;;  %v2448_v52 = vld [vmem:[%s7636_s3] sm:$0xff] (%p989_p4) }
 0x2db   : >> { %v2399_v46 = vadd.f32 %v5229_v5, %v2391_v39  ;;  %v2400_v31 = vadd.f32 %v5230_v45, %v2392_v49  ;;  %v2401_v37 = vadd.f32 %v5231_v51, %v2393_v41  ;;  %v2402_v28 = vadd.f32 %v5232_v58, %v2394_v2  ;;  %v7845_v58 = vld [vmem:[#allocation18_spill] sm:$0xff] (%p989_p4) }
 0x2dc   : >> { %v2403_v20 = vadd.f32 %v5233_v0, %v2395_v15  ;;  %v2404_v27 = vadd.f32 %v5234_v57, %v2396_v42  ;;  %v2405_v13 = vadd.f32 %v5235_v48, %v2397_v11  ;;  %2408 = vst [vmem:[%s2407_s23] sm:$0xff] %v2398_v18  ;;  %v5083_v6 = vpack.c.bf16 (%p989_p4), %v2449_v38, %v2448_v52 }
 0x2dd   : >> { %2409 = vst [vmem:[%s2407_s23 + $0x8] sm:$0xff] %v2399_v46  ;;  %2410 = vst [vmem:[%s2407_s23 + $0x10] sm:$0xff] %v2400_v31  ;;  %v5087_v53 = vpack.c.bf16 (%p989_p4), %v2451_v9, %v2450_v22  ;;  %v5091_v30 = vpack.c.bf16 (%p989_p4), %v2453_v23, %v2452_v24  ;;  %v5095_v62 = vpack.c.bf16 (%p989_p4), %v2455_v40, %v2454_v34 }
 0x2de   : >> { %2411 = vst [vmem:[%s2407_s23 + $0x18] sm:$0xff] %v2401_v37  ;;  %2412 = vst [vmem:[%s2407_s23 + $0x20] sm:$0xff] %v2402_v28  ;;  %5084 = vmatprep.subr.bf16.mxu1 (%p989_p4), %v5083_v6  ;;  %v5099_v8 = vpack.c.bf16 (%p989_p4), %v2457_v44, %v2456_v7  ;;  %v5103_v10 = vpack.c.bf16 (%p989_p4), %v2459_v1, %v2458_v14  ;;  %v5107_v36 = vpack.c.bf16 (%p989_p4), %v2461_v3, %v2460_v16  ;;  %v7846_v28 = vld [vmem:[#allocation16_spill] sm:$0xff] (%p989_p4) }
 0x2df   : >> { %2413 = vst [vmem:[%s2407_s23 + $0x28] sm:$0xff] %v2403_v20  ;;  %2414 = vst [vmem:[%s2407_s23 + $0x30] sm:$0xff] %v2404_v27  ;;  %5086 = vmatpush3.bf16.msra.mxu1 (%p989_p4), %v5083_v6  ;;  %v5111_v26 = vpack.c.bf16 (%p989_p4), %v2463_v59, %v2462_v56  ;;  %v7019_v0 = vrot.slane (%p989_p4), %v7846_v28, %v7845_v58 }
 0x2e0   : >> { %2415 = vst [vmem:[%s2407_s23 + $0x38] sm:$0xff] %v2405_v13  ;;  %5088 = vmatprep.subr.bf16.mxu1 (%p989_p4), %v5087_v53 }
 0x2e3   : > { %5090 = vmatpush3.bf16.msra.mxu1 %v5087_v53 }
 0x2e4   : > { %5092 = vmatprep.subr.bf16.mxu1 %v5091_v30 }
 0x2e7   : > { %v2416_v61 = vld [vmem:[#allocation3] sm:$0xff]  ;;  %5094 = vmatpush3.bf16.msra.mxu1 %v5091_v30  ;;  %v2417_v33 = vld [vmem:[#allocation3 + $0x8] sm:$0xff]  ;;  %v2418_v47 = vld [vmem:[#allocation3 + $0x10] sm:$0xff] }
 0x2e8   : > { %4859 = vmatprep.mubr.f32.mxu1 %v2416_v61  ;;  %5096 = vmatprep.subr.bf16.mxu1 %v5095_v62  ;;  %v2419_v25 = vld [vmem:[#allocation3 + $0x18] sm:$0xff]  ;;  %v2420_v29 = vld [vmem:[#allocation3 + $0x20] sm:$0xff]  ;;  %v2421_v55 = vld [vmem:[#allocation3 + $0x28] sm:$0xff] }
 0x2e9   : > { %v2422_v4 = vld [vmem:[#allocation3 + $0x30] sm:$0xff]  ;;  %v2423_v12 = vld [vmem:[#allocation3 + $0x38] sm:$0xff]  ;;  %v2424_v32 = vld [vmem:[#allocation3 + $0x40] sm:$0xff] }
 0x2ea   : > { %v2425_v63 = vld [vmem:[#allocation3 + $0x48] sm:$0xff]  ;;  %v2426_v19 = vld [vmem:[#allocation3 + $0x50] sm:$0xff]  ;;  %v2427_v43 = vld [vmem:[#allocation3 + $0x58] sm:$0xff] }
 0x2eb   : > { %5098 = vmatpush3.bf16.msra.mxu1 %v5095_v62  ;;  %v2428_v60 = vld [vmem:[#allocation3 + $0x60] sm:$0xff]  ;;  %v2429_v17 = vld [vmem:[#allocation3 + $0x68] sm:$0xff]  ;;  %v2430_v54 = vld [vmem:[#allocation3 + $0x70] sm:$0xff] }
 0x2ec   : > { %5100 = vmatprep.subr.bf16.mxu1 %v5099_v8  ;;  %v2431_v35 = vld [vmem:[#allocation3 + $0x78] sm:$0xff]  ;;  %v2432_v21 = vld [vmem:[#allocation3 + $0x80] sm:$0xff]  ;;  %v2433_v39 = vld [vmem:[#allocation3 + $0x88] sm:$0xff] }
 0x2ed   : > { %v2434_v49 = vld [vmem:[#allocation3 + $0x90] sm:$0xff]  ;;  %v2435_v41 = vld [vmem:[#allocation3 + $0x98] sm:$0xff]  ;;  %v2436_v2 = vld [vmem:[#allocation3 + $0xa0] sm:$0xff] }
 0x2ee   : > { %v2437_v15 = vld [vmem:[#allocation3 + $0xa8] sm:$0xff]  ;;  %v2438_v42 = vld [vmem:[#allocation3 + $0xb0] sm:$0xff]  ;;  %v2439_v11 = vld [vmem:[#allocation3 + $0xb8] sm:$0xff] }
 0x2ef   : > { %5102 = vmatpush3.bf16.msra.mxu1 %v5099_v8  ;;  %v2440_v50 = vld [vmem:[#allocation3 + $0xc0] sm:$0xff]  ;;  %v2441_v18 = vld [vmem:[#allocation3 + $0xc8] sm:$0xff]  ;;  %v2442_v5 = vld [vmem:[#allocation3 + $0xd0] sm:$0xff] }
 0x2f0   : > { %5104 = vmatprep.subr.bf16.mxu1 %v5103_v10  ;;  %v2443_v46 = vld [vmem:[#allocation3 + $0xd8] sm:$0xff]  ;;  %v2444_v45 = vld [vmem:[#allocation3 + $0xe0] sm:$0xff]  ;;  %v2445_v31 = vld [vmem:[#allocation3 + $0xe8] sm:$0xff] }
 0x2f1   : > { %v2446_v51 = vld [vmem:[#allocation3 + $0xf0] sm:$0xff]  ;;  %v2447_v37 = vld [vmem:[#allocation3 + $0xf8] sm:$0xff] }
 0x2f3   : > { %5106 = vmatpush3.bf16.msra.mxu1 %v5103_v10 }
 0x2f4   : > { %5108 = vmatprep.subr.bf16.mxu1 %v5107_v36 }
 0x2f7   : > { %5110 = vmatpush3.bf16.msra.mxu1 %v5107_v36 }
 0x2f8   : > { %5112 = vmatprep.subr.bf16.mxu1 %v5111_v26 }
 0x2fb   : > { %5114 = vmatpush3.bf16.msra.mxu1 %v5111_v26 }
 0x2fe   : > { %4860 = vmatmul.mubr.f32.vlgmr.msra.gmra.mrb[0].mxu1 %v2417_v33 }
 0x2ff   : > { %4862 = vmatprep.mubr.f32.mxu1 %v2418_v47 }
 0x302   : > { %4863 = vmatmul.mubr.f32.gmra.mrb[2].mxu1 %v2419_v25 }
 0x303   : > { %4865 = vmatprep.mubr.f32.mxu1 %v2420_v29 }
 0x306   : > { %4866 = vmatmul.mubr.f32.gmra.mrb[4].mxu1 %v2421_v55 }
 0x307   : > { %4868 = vmatprep.mubr.f32.mxu1 %v2422_v4 }
 0x30a   : > { %4869 = vmatmul.mubr.f32.gmra.mrb[6].mxu1 %v2423_v12 }
 0x30b   : > { %4871 = vmatprep.mubr.f32.mxu1 %v2424_v32 }
 0x30e   : > { %4872 = vmatmul.mubr.f32.gmra.mrb[8].mxu1 %v2425_v63 }
 0x30f   : > { %4874 = vmatprep.mubr.f32.mxu1 %v2426_v19 }
 0x312   : > { %4875 = vmatmul.mubr.f32.gmra.mrb[10].mxu1 %v2427_v43 }
 0x313   : > { %4877 = vmatprep.mubr.f32.mxu1 %v2428_v60 }
 0x316   : > { %4878 = vmatmul.mubr.f32.gmra.mrb[12].mxu1 %v2429_v17 }
 0x317   : > { %4880 = vmatprep.mubr.f32.mxu1 %v2430_v54 }
 0x31a   : > { %4881 = vmatmul.mubr.f32.gmra.mrb[14].mxu1 %v2431_v35 }
 0x31b   : > { %4883 = vmatprep.mubr.f32.mxu1 %v2432_v21 }
 0x31e   : > { %4884 = vmatmul.mubr.f32.gmra.mrb[16].mxu1 %v2433_v39 }
 0x31f   : > { %4886 = vmatprep.mubr.f32.mxu1 %v2434_v49 }
 0x322   : > { %4887 = vmatmul.mubr.f32.gmra.mrb[18].mxu1 %v2435_v41 }
 0x323   : > { %4889 = vmatprep.mubr.f32.mxu1 %v2436_v2 }
 0x326   : > { %4890 = vmatmul.mubr.f32.gmra.mrb[20].mxu1 %v2437_v15 }
 0x327   : > { %4892 = vmatprep.mubr.f32.mxu1 %v2438_v42 }
 0x32a   : > { %4893 = vmatmul.mubr.f32.gmra.mrb[22].mxu1 %v2439_v11 }
 0x32b   : > { %4895 = vmatprep.mubr.f32.mxu1 %v2440_v50 }
 0x32e   : > { %4896 = vmatmul.mubr.f32.gmra.mrb[24].mxu1 %v2441_v18 }
 0x32f   : > { %4898 = vmatprep.mubr.f32.mxu1 %v2442_v5 }
 0x332   : > { %4899 = vmatmul.mubr.f32.gmra.mrb[26].mxu1 %v2443_v46 }
 0x333   : > { %4901 = vmatprep.mubr.f32.mxu1 %v2444_v45 }
 0x336   : > { %4902 = vmatmul.mubr.f32.gmra.mrb[28].mxu1 %v2445_v31 }
 0x337   : > { %4904 = vmatprep.mubr.f32.mxu1 %v2446_v51 }
 0x33a   : > { %4905 = vmatmul.mubr.f32.gmra.mrb[30].mxu1 %v2447_v37 }
 0x3d1   : > { %v4861_v20 = vpop.f32.mrb[0].mxu1 }
 0x3d2   : > { %v2540_v57 = vadd.f32 %v4861_v20, %v7019_v0  ;;  %v2534_v27 = vpop.f32.mrb[1].mxu1 }
 0x3d3   : > { %v2535_v48 = vadd.f32 %v2534_v27, %v7019_v0 }
 0x3d4   : > { %v2726_v13 = vmul.f32 0.70710677, %v2540_v57  ;;  %v2694_v3 = vmul.f32 0.5, %v2540_v57 }
 0x3d5   : > { %v2725_v52 = vmul.f32 0.70710677, %v2535_v48  ;;  %v4864_v38 = vpop.f32.mrb[2].mxu1  ;;  %v2693_v26 = vmul.f32 0.5, %v2535_v48 }
 0x3d6   : > { %5236 = verf.f32 %v2726_v13  ;;  %v2550_v22 = vadd.f32 %v4864_v38, %v7019_v0  ;;  %v2544_v6 = vpop.f32.mrb[3].mxu1 }
 0x3d7   : > { %5238 = verf.f32 %v2725_v52  ;;  %v2545_v9 = vadd.f32 %v2544_v6, %v7019_v0 }
 0x3d8   : > { %v2728_v53 = vmul.f32 0.70710677, %v2550_v22  ;;  %v2696_v19 = vmul.f32 0.5, %v2550_v22 }
 0x3d9   : > { %v2727_v24 = vmul.f32 0.70710677, %v2545_v9  ;;  %v4867_v23 = vpop.f32.mrb[4].mxu1  ;;  %v2695_v54 = vmul.f32 0.5, %v2545_v9 }
 0x3da   : > { %5240 = verf.f32 %v2728_v53  ;;  %v2560_v30 = vadd.f32 %v4867_v23, %v7019_v0  ;;  %v2554_v61 = vpop.f32.mrb[5].mxu1 }
 0x3db   : > { %5242 = verf.f32 %v2727_v24  ;;  %v2555_v34 = vadd.f32 %v2554_v61, %v7019_v0 }
 0x3dc   : > { %v2730_v40 = vmul.f32 0.70710677, %v2560_v30  ;;  %v2698_v50 = vmul.f32 0.5, %v2560_v30 }
 0x3dd   : > { %v2729_v62 = vmul.f32 0.70710677, %v2555_v34  ;;  %v4870_v7 = vpop.f32.mrb[6].mxu1  ;;  %v2697_v45 = vmul.f32 0.5, %v2555_v34 }
 0x3de   : > { %5244 = verf.f32 %v2730_v40  ;;  %v2570_v44 = vadd.f32 %v4870_v7, %v7019_v0  ;;  %v2564_v8 = vpop.f32.mrb[7].mxu1 }
 0x3df   : > { %5246 = verf.f32 %v2729_v62  ;;  %v2565_v14 = vadd.f32 %v2564_v8, %v7019_v0 }
 0x3e0   : > { %v5237_v1 = vpop.eup %5236  ;;  %v2732_v10 = vmul.f32 0.70710677, %v2570_v44  ;;  %v2700_v13 = vmul.f32 0.5, %v2570_v44 }
 0x3e1   : > { %v5239_v16 = vpop.eup %5238  ;;  %v2790_v36 = vadd.f32 1.0, %v5237_v1  ;;  %v2731_v56 = vmul.f32 0.70710677, %v2565_v14  ;;  %v4873_v59 = vpop.f32.mrb[8].mxu1  ;;  %v2699_v6 = vmul.f32 0.5, %v2565_v14 }
 0x3e2   : > { %v2789_v33 = vadd.f32 1.0, %v5239_v16  ;;  %5248 = verf.f32 %v2732_v10  ;;  %v7030_v47 = vadd.f32 %v4873_v59, %v7019_v0  ;;  %v2574_v25 = vpop.f32.mrb[9].mxu1 }
 0x3e3   : > { %v2822_v29 = vmul.f32 %v2790_v36, %v2694_v3  ;;  %5250 = verf.f32 %v2731_v56  ;;  %v7033_v55 = vadd.f32 %v2574_v25, %v7019_v0 }
 0x3e4   : > { %v5241_v4 = vpop.eup %5240  ;;  %v2821_v12 = vmul.f32 %v2789_v33, %v2693_v26  ;;  %v2734_v32 = vmul.f32 0.70710677, %v7030_v47  ;;  %v2702_v7 = vmul.f32 0.5, %v7030_v47 }
 0x3e5   : > { %v5243_v63 = vpop.eup %5242  ;;  %2854 = vst [vmem:[#allocation2 + $0x53] sm:$0xff] %v2822_v29  ;;  %v2792_v43 = vadd.f32 1.0, %v5241_v4  ;;  %v2733_v60 = vmul.f32 0.70710677, %v7033_v55  ;;  %v4876_v17 = vpop.f32.mrb[10].mxu1  ;;  %v2701_v1 = vmul.f32 0.5, %v7033_v55 }
 0x3e6   : > { %2853 = vst [vmem:[#allocation2 + $0x4b] sm:$0xff] %v2821_v12  ;;  %v2791_v35 = vadd.f32 1.0, %v5243_v63  ;;  %5252 = verf.f32 %v2734_v32  ;;  %v7038_v21 = vadd.f32 %v4876_v17, %v7019_v0  ;;  %v2584_v39 = vpop.f32.mrb[11].mxu1 }
 0x3e7   : > { %v2824_v49 = vmul.f32 %v2792_v43, %v2696_v19  ;;  %5254 = verf.f32 %v2733_v60  ;;  %v7041_v41 = vadd.f32 %v2584_v39, %v7019_v0 }
 0x3e8   : > { %v5245_v2 = vpop.eup %5244  ;;  %v2823_v15 = vmul.f32 %v2791_v35, %v2695_v54  ;;  %v2736_v42 = vmul.f32 0.70710677, %v7038_v21  ;;  %v2704_v25 = vmul.f32 0.5, %v7038_v21 }
 0x3e9   : > { %v5247_v11 = vpop.eup %5246  ;;  %2856 = vst [vmem:[#allocation2 + $0x6b] sm:$0xff] %v2824_v49  ;;  %v2794_v18 = vadd.f32 1.0, %v5245_v2  ;;  %v2735_v5 = vmul.f32 0.70710677, %v7041_v41  ;;  %v4879_v46 = vpop.f32.mrb[12].mxu1  ;;  %v2703_v12 = vmul.f32 0.5, %v7041_v41 }
 0x3ea   : > { %2855 = vst [vmem:[#allocation2 + $0x63] sm:$0xff] %v2823_v15  ;;  %v2793_v31 = vadd.f32 1.0, %v5247_v11  ;;  %5256 = verf.f32 %v2736_v42  ;;  %v7046_v51 = vadd.f32 %v4879_v46, %v7019_v0  ;;  %v2594_v37 = vpop.f32.mrb[13].mxu1 }
 0x3eb   : > { %v2826_v58 = vmul.f32 %v2794_v18, %v2698_v50  ;;  %5258 = verf.f32 %v2735_v5  ;;  %v7049_v28 = vadd.f32 %v2594_v37, %v7019_v0 }
 0x3ec   : > { %v5249_v20 = vpop.eup %5248  ;;  %v2825_v57 = vmul.f32 %v2793_v31, %v2697_v45  ;;  %v2738_v27 = vmul.f32 0.70710677, %v7046_v51  ;;  %v2706_v39 = vmul.f32 0.5, %v7046_v51 }
 0x3ed   : > { %v5251_v48 = vpop.eup %5250  ;;  %2858 = vst [vmem:[#allocation2 + $0x83] sm:$0xff] %v2826_v58  ;;  %v2796_v52 = vadd.f32 1.0, %v5249_v20  ;;  %v2737_v38 = vmul.f32 0.70710677, %v7049_v28  ;;  %v4882_v22 = vpop.f32.mrb[14].mxu1  ;;  %v2705_v15 = vmul.f32 0.5, %v7049_v28 }
 0x3ee   : > { %2857 = vst [vmem:[#allocation2 + $0x7b] sm:$0xff] %v2825_v57  ;;  %v2795_v9 = vadd.f32 1.0, %v5251_v48  ;;  %5260 = verf.f32 %v2738_v27  ;;  %v7054_v53 = vadd.f32 %v4882_v22, %v7019_v0  ;;  %v2604_v24 = vpop.f32.mrb[15].mxu1 }
 0x3ef   : > { %v2828_v23 = vmul.f32 %v2796_v52, %v2700_v13  ;;  %5262 = verf.f32 %v2737_v38  ;;  %v7057_v30 = vadd.f32 %v2604_v24, %v7019_v0 }
 0x3f0   : > { %v5253_v61 = vpop.eup %5252  ;;  %v2827_v34 = vmul.f32 %v2795_v9, %v2699_v6  ;;  %v2740_v40 = vmul.f32 0.70710677, %v7054_v53  ;;  %v2708_v37 = vmul.f32 0.5, %v7054_v53 }
 0x3f1   : > { %v5255_v62 = vpop.eup %5254  ;;  %2860 = vst [vmem:[#allocation2 + $0x9b] sm:$0xff] %v2828_v23  ;;  %v2798_v44 = vadd.f32 1.0, %v5253_v61  ;;  %v2739_v8 = vmul.f32 0.70710677, %v7057_v30  ;;  %v4885_v14 = vpop.f32.mrb[16].mxu1  ;;  %v2707_v57 = vmul.f32 0.5, %v7057_v30 }
 0x3f2   : > { %2859 = vst [vmem:[#allocation2 + $0x93] sm:$0xff] %v2827_v34  ;;  %v2797_v10 = vadd.f32 1.0, %v5255_v62  ;;  %5264 = verf.f32 %v2740_v40  ;;  %v7064_v16 = vadd.f32 %v4885_v14, %v7019_v0  ;;  %v2614_v3 = vpop.f32.mrb[17].mxu1 }
 0x3f3   : > { %v2830_v36 = vmul.f32 %v2798_v44, %v2702_v7  ;;  %5266 = verf.f32 %v2739_v8  ;;  %v7067_v56 = vadd.f32 %v2614_v3, %v7019_v0 }
 0x3f4   : > { %v5257_v59 = vpop.eup %5256  ;;  %v2829_v26 = vmul.f32 %v2797_v10, %v2701_v1  ;;  %v2742_v33 = vmul.f32 0.70710677, %v7064_v16  ;;  %v2710_v24 = vmul.f32 0.5, %v7064_v16 }
 0x3f5   : > { %v5259_v47 = vpop.eup %5258  ;;  %2862 = vst [vmem:[#allocation2 + $0xb3] sm:$0xff] %v2830_v36  ;;  %v2800_v29 = vadd.f32 1.0, %v5257_v59  ;;  %v2741_v55 = vmul.f32 0.70710677, %v7067_v56  ;;  %v4888_v4 = vpop.f32.mrb[18].mxu1  ;;  %v2709_v34 = vmul.f32 0.5, %v7067_v56 }
 0x3f6   : > { %2861 = vst [vmem:[#allocation2 + $0xab] sm:$0xff] %v2829_v26  ;;  %v2799_v32 = vadd.f32 1.0, %v5259_v47  ;;  %5268 = verf.f32 %v2742_v33  ;;  %v7074_v63 = vadd.f32 %v4888_v4, %v7019_v0  ;;  %v2624_v19 = vpop.f32.mrb[19].mxu1 }
 0x3f7   : > { %v2832_v43 = vmul.f32 %v2800_v29, %v2704_v25  ;;  %5270 = verf.f32 %v2741_v55  ;;  %v7077_v60 = vadd.f32 %v2624_v19, %v7019_v0 }
 0x3f8   : > { %v5261_v17 = vpop.eup %5260  ;;  %v2831_v54 = vmul.f32 %v2799_v32, %v2703_v12  ;;  %v2744_v35 = vmul.f32 0.70710677, %v7074_v63  ;;  %v2712_v3 = vmul.f32 0.5, %v7074_v63 }
 0x3f9   : > { %v5263_v21 = vpop.eup %5262  ;;  %2864 = vst [vmem:[#allocation2 + $0xcb] sm:$0xff] %v2832_v43  ;;  %v2802_v49 = vadd.f32 1.0, %v5261_v17  ;;  %v2743_v41 = vmul.f32 0.70710677, %v7077_v60  ;;  %v4891_v2 = vpop.f32.mrb[20].mxu1  ;;  %v2711_v26 = vmul.f32 0.5, %v7077_v60 }
 0x3fa   : > { %2863 = vst [vmem:[#allocation2 + $0xc3] sm:$0xff] %v2831_v54  ;;  %v2801_v42 = vadd.f32 1.0, %v5263_v21  ;;  %5272 = verf.f32 %v2744_v35  ;;  %v7084_v11 = vadd.f32 %v4891_v2, %v7019_v0  ;;  %v2634_v50 = vpop.f32.mrb[21].mxu1 }
 0x3fb   : > { %v2834_v18 = vmul.f32 %v2802_v49, %v2706_v39  ;;  %5274 = verf.f32 %v2743_v41  ;;  %v7087_v5 = vadd.f32 %v2634_v50, %v7019_v0 }
 0x3fc   : > { %v5265_v46 = vpop.eup %5264  ;;  %v2833_v45 = vmul.f32 %v2801_v42, %v2705_v15  ;;  %v2746_v31 = vmul.f32 0.70710677, %v7084_v11  ;;  %v2714_v19 = vmul.f32 0.5, %v7084_v11 }
 0x3fd   : > { %v5267_v51 = vpop.eup %5266  ;;  %2866 = vst [vmem:[#allocation2 + $0xe3] sm:$0xff] %v2834_v18  ;;  %v2804_v58 = vadd.f32 1.0, %v5265_v46  ;;  %v2745_v28 = vmul.f32 0.70710677, %v7087_v5  ;;  %v4894_v20 = vpop.f32.mrb[22].mxu1  ;;  %v2713_v60 = vmul.f32 0.5, %v7087_v5 }
 0x3fe   : > { %2865 = vst [vmem:[#allocation2 + $0xdb] sm:$0xff] %v2833_v45  ;;  %v2803_v27 = vadd.f32 1.0, %v5267_v51  ;;  %5276 = verf.f32 %v2746_v31  ;;  %v7094_v48 = vadd.f32 %v4894_v20, %v7019_v0  ;;  %v2644_v13 = vpop.f32.mrb[23].mxu1 }
 0x3ff   : > { %v2836_v52 = vmul.f32 %v2804_v58, %v2708_v37  ;;  %5278 = verf.f32 %v2745_v28  ;;  %v7097_v38 = vadd.f32 %v2644_v13, %v7019_v0 }
 0x400   : > { %v5269_v22 = vpop.eup %5268  ;;  %v2835_v6 = vmul.f32 %v2803_v27, %v2707_v57  ;;  %v2748_v9 = vmul.f32 0.70710677, %v7094_v48  ;;  %v2716_v11 = vmul.f32 0.5, %v7094_v48 }
 0x401   : > { %v5271_v53 = vpop.eup %5270  ;;  %2868 = vst [vmem:[#allocation2 + $0xfb] sm:$0xff] %v2836_v52  ;;  %v2806_v23 = vadd.f32 1.0, %v5269_v22  ;;  %v2747_v30 = vmul.f32 0.70710677, %v7097_v38  ;;  %v4897_v61 = vpop.f32.mrb[24].mxu1  ;;  %v2715_v5 = vmul.f32 0.5, %v7097_v38 }
 0x402   : > { %2867 = vst [vmem:[#allocation2 + $0xf3] sm:$0xff] %v2835_v6  ;;  %v2805_v40 = vadd.f32 1.0, %v5271_v53  ;;  %5280 = verf.f32 %v2748_v9  ;;  %v7104_v62 = vadd.f32 %v4897_v61, %v7019_v0  ;;  %v2654_v7 = vpop.f32.mrb[25].mxu1 }
 0x403   : > { %v2838_v44 = vmul.f32 %v2806_v23, %v2710_v24  ;;  %5282 = verf.f32 %v2747_v30  ;;  %v7107_v8 = vadd.f32 %v2654_v7, %v7019_v0 }
 0x404   : > { %v5273_v14 = vpop.eup %5272  ;;  %v2837_v1 = vmul.f32 %v2805_v40, %v2709_v34  ;;  %v2750_v10 = vmul.f32 0.70710677, %v7104_v62  ;;  %v2718_v48 = vmul.f32 0.5, %v7104_v62 }
 0x405   : > { %v5275_v16 = vpop.eup %5274  ;;  %2870 = vst [vmem:[#allocation2 + $0x113] sm:$0xff] %v2838_v44  ;;  %v2808_v36 = vadd.f32 1.0, %v5273_v14  ;;  %v2749_v56 = vmul.f32 0.70710677, %v7107_v8  ;;  %v4900_v59 = vpop.f32.mrb[26].mxu1  ;;  %v2717_v38 = vmul.f32 0.5, %v7107_v8 }
 0x406   : > { %2869 = vst [vmem:[#allocation2 + $0x10b] sm:$0xff] %v2837_v1  ;;  %v2807_v33 = vadd.f32 1.0, %v5275_v16  ;;  %5284 = verf.f32 %v2750_v10  ;;  %v2670_v47 = vadd.f32 %v4900_v59, %v7019_v0  ;;  %v2664_v25 = vpop.f32.mrb[27].mxu1 }
 0x407   : > { %v2840_v29 = vmul.f32 %v2808_v36, %v2712_v3  ;;  %5286 = verf.f32 %v2749_v56  ;;  %v2665_v55 = vadd.f32 %v2664_v25, %v7019_v0 }
 0x408   : > { %v5277_v4 = vpop.eup %5276  ;;  %v2839_v12 = vmul.f32 %v2807_v33, %v2711_v26  ;;  %v2752_v32 = vmul.f32 0.70710677, %v2670_v47 }
 0x409   : > { %v5279_v63 = vpop.eup %5278  ;;  %2872 = vst [vmem:[#allocation2 + $0x12b] sm:$0xff] %v2840_v29  ;;  %v2810_v43 = vadd.f32 1.0, %v5277_v4  ;;  %v2751_v17 = vmul.f32 0.70710677, %v2665_v55  ;;  %v4903_v54 = vpop.f32.mrb[28].mxu1  ;;  %v2719_v61 = vmul.f32 0.5, %v2665_v55 }
 0x40a   : > { %2871 = vst [vmem:[#allocation2 + $0x123] sm:$0xff] %v2839_v12  ;;  %v2809_v35 = vadd.f32 1.0, %v5279_v63  ;;  %5288 = verf.f32 %v2752_v32  ;;  %v2680_v21 = vadd.f32 %v4903_v54, %v7019_v0  ;;  %v2674_v39 = vpop.f32.mrb[29].mxu1 }
 0x40b   : > { %v2842_v49 = vmul.f32 %v2810_v43, %v2714_v19  ;;  %5290 = verf.f32 %v2751_v17  ;;  %v2675_v41 = vadd.f32 %v2674_v39, %v7019_v0 }
 0x40c   : > { %v5281_v2 = vpop.eup %5280  ;;  %v2841_v15 = vmul.f32 %v2809_v35, %v2713_v60  ;;  %v2754_v42 = vmul.f32 0.70710677, %v2680_v21  ;;  %v2722_v14 = vmul.f32 0.5, %v2680_v21 }
 0x40d   : > { %v5283_v50 = vpop.eup %5282  ;;  %2874 = vst [vmem:[#allocation2 + $0x143] sm:$0xff] %v2842_v49  ;;  %v2812_v18 = vadd.f32 1.0, %v5281_v2  ;;  %v2753_v46 = vmul.f32 0.70710677, %v2675_v41  ;;  %v4906_v45 = vpop.f32.mrb[30].mxu1  ;;  %v2721_v1 = vmul.f32 0.5, %v2675_v41 }
 0x40e   : > { %2873 = vst [vmem:[#allocation2 + $0x13b] sm:$0xff] %v2841_v15  ;;  %v2811_v31 = vadd.f32 1.0, %v5283_v50  ;;  %5292 = verf.f32 %v2754_v42  ;;  %v2690_v51 = vadd.f32 %v4906_v45, %v7019_v0  ;;  %v2684_v37 = vpop.f32.mrb[31].mxu1 }
 0x40f   : > { %v2844_v58 = vmul.f32 %v2812_v18, %v2716_v11  ;;  %5294 = verf.f32 %v2753_v46  ;;  %v2685_v28 = vadd.f32 %v2684_v37, %v7019_v0  ;;  %v2720_v0 = vmul.f32 0.5, %v2670_v47 }
 0x410   : > { %v5285_v20 = vpop.eup %5284  ;;  %v2843_v57 = vmul.f32 %v2811_v31, %v2715_v5  ;;  %v2756_v27 = vmul.f32 0.70710677, %v2690_v51  ;;  %v2724_v59 = vmul.f32 0.5, %v2690_v51 }
 0x411   : > { %v5287_v13 = vpop.eup %5286  ;;  %2876 = vst [vmem:[#allocation2 + $0x15b] sm:$0xff] %v2844_v58  ;;  %v2814_v52 = vadd.f32 1.0, %v5285_v20  ;;  %v2755_v22 = vmul.f32 0.70710677, %v2685_v28  ;;  %v2723_v33 = vmul.f32 0.5, %v2685_v28 }
 0x412   : > { %2875 = vst [vmem:[#allocation2 + $0x153] sm:$0xff] %v2843_v57  ;;  %v2813_v6 = vadd.f32 1.0, %v5287_v13  ;;  %5296 = verf.f32 %v2756_v27 }
 0x413   : > { %v2846_v9 = vmul.f32 %v2814_v52, %v2718_v48  ;;  %5298 = verf.f32 %v2755_v22 }
 0x414   : > { %v5289_v53 = vpop.eup %5288  ;;  %v2845_v24 = vmul.f32 %v2813_v6, %v2717_v38 }
 0x415   : > { %v5291_v23 = vpop.eup %5290  ;;  %2878 = vst [vmem:[#allocation2 + $0x173] sm:$0xff] %v2846_v9  ;;  %v2816_v30 = vadd.f32 1.0, %v5289_v53 }
 0x416   : > { %2877 = vst [vmem:[#allocation2 + $0x16b] sm:$0xff] %v2845_v24  ;;  %v2815_v34 = vadd.f32 1.0, %v5291_v23 }
 0x417   : > { %v2848_v40 = vmul.f32 %v2816_v30, %v2720_v0 }
 0x418   : > { %v5293_v62 = vpop.eup %5292  ;;  %v2847_v7 = vmul.f32 %v2815_v34, %v2719_v61 }
 0x419   : > { %v5295_v44 = vpop.eup %5294  ;;  %2880 = vst [vmem:[#allocation2 + $0x18b] sm:$0xff] %v2848_v40  ;;  %v2818_v8 = vadd.f32 1.0, %v5293_v62 }
 0x41a   : > { %2879 = vst [vmem:[#allocation2 + $0x183] sm:$0xff] %v2847_v7  ;;  %v2817_v10 = vadd.f32 1.0, %v5295_v44 }
 0x41b   : > { %v2850_v16 = vmul.f32 %v2818_v8, %v2722_v14 }
 0x41c   : > { %v5297_v3 = vpop.eup %5296  ;;  %v2849_v36 = vmul.f32 %v2817_v10, %v2721_v1 }
 0x41d   : > { %v5299_v56 = vpop.eup %5298  ;;  %2882 = vst [vmem:[#allocation2 + $0x1a3] sm:$0xff] %v2850_v16  ;;  %v2820_v26 = vadd.f32 1.0, %v5297_v3 }
 0x41e   : > { %2881 = vst [vmem:[#allocation2 + $0x19b] sm:$0xff] %v2849_v36  ;;  %v2819_v47 = vadd.f32 1.0, %v5299_v56 }
 0x41f   : > { %v2852_v25 = vmul.f32 %v2820_v26, %v2724_v59 }
 0x420   : > { %v2851_v29 = vmul.f32 %v2819_v47, %v2723_v33 }
 0x421   : > { %2884 = vst [vmem:[#allocation2 + $0x1bb] sm:$0xff] %v2852_v25 }
 0x422   : > { %2883 = vst [vmem:[#allocation2 + $0x1b3] sm:$0xff] %v2851_v29 }
 0x423 LB: >> { %s4494_s21 = smul.u32 96, %s5386_s20  ;;  %v7847_v55 = vld [vmem:[#allocation15_spill] sm:$0xff]  ;;  %v7849_v32 = vld [vmem:[#allocation17_spill] sm:$0xff]  ;;  %v7850_v19 = vld [vmem:[#allocation18_spill] sm:$0xff]  ;;  %s4578_s23 = sshll.u32 %s5386_s20, 6  ;;  %s5386_s20 = sphi %s7125_s20, %s2890_s20  }
 0x424   : >> { %v7848_v4 = vld [vmem:[#allocation11_spill] sm:$0xff]  ;;  %v7851_v17 = vld [vmem:[#allocation12_spill] sm:$0xff]  ;;  %v7852_v21 = vld [vmem:[#allocation13_spill] sm:$0xff]  ;;  %s7267_s24 = scalar_lea.vmem [#allocation3], %s4578_s23  ;;  %s2890_s20 = sadd.s32 1, %s5386_s20  }
 0x425   : >> { %v7133_v12 = vrot.slane %v7848_v4, %v7847_v55  ;;  %v7137_v63 = vrot.slane %v7848_v4, %v7849_v32  ;;  %v7141_v43 = vrot.slane %v7848_v4, %v7850_v19  ;;  %v7145_v54 = vrot.slane %v7851_v17, %v7847_v55  ;;  %s7159_s22 = scalar_lea.vmem [#allocation2], %s4494_s21  ;;  %v7853_v58 = vld [vmem:[#allocation19_spill] sm:$0xff]  ;;  %v7854_v28 = vld [vmem:[#allocation16_spill] sm:$0xff]  ;;  %p2887_p5 = scmp.ge.s32.totalorder %s2890_s20, 4  }
 0x426   : >> { %v7149_v60 = vrot.slane %v7851_v17, %v7849_v32  ;;  %v7153_v35 = vrot.slane %v7851_v17, %v7850_v19  ;;  %v7157_v39 = vrot.slane %v7852_v21, %v7847_v55  ;;  %v7166_v15 = vrot.slane %v7852_v21, %v7849_v32  ;;  %v3227_v4 = vld [vmem:[%s7638_s5 + $0x20] sm:$0xff] (%p2887_p5)  ;;  %v3228_v17 = vld [vmem:[%s7638_s5 + $0x28] sm:$0xff] (%p2887_p5) }
 0x427   : >> { %v7175_v45 = vrot.slane %v7852_v21, %v7850_v19  ;;  %v7185_v20 = vrot.slane %v7854_v28, %v7853_v58  ;;  %v5123_v21 = vpack.c.bf16 (%p2887_p5), %v3228_v17, %v3227_v4  ;;  %v3638_v17 = vld [vmem:[%s7639_s6 + $0x50] sm:$0xff] (%p2887_p5) }
 0x429   : >> { %v4495_v49 = vld [vmem:[%s7159_s22 + $0x32] sm:$0xff]  ;;  %v4521_v18 = vld [vmem:[%s7159_s22 + $0x4a] sm:$0xff]  ;;  %v7181_v37 = vld [vmem:[%s7159_s22 + $0x62] sm:$0xff] }
 0x42a   : >> { %v4503_v41 = vld [vmem:[%s7159_s22 + $0x33] sm:$0xff]  ;;  %v2907_v42 = vmul.f32 %v4495_v49, %v7133_v12  ;;  %v4529_v46 = vld [vmem:[%s7159_s22 + $0x4b] sm:$0xff]  ;;  %v2994_v5 = vmul.f32 %v4521_v18, %v7145_v54  ;;  %v3081_v13 = vmul.f32 %v7181_v37, %v7157_v39  ;;  %v4504_v52 = vld [vmem:[%s7159_s22 + $0x3b] sm:$0xff]  ;;  %v2909_v38 = vmul.f32 %v4521_v18, %v7133_v12 }
 0x42b   : >> { %v4511_v2 = vld [vmem:[%s7159_s22 + $0x34] sm:$0xff]  ;;  %v2935_v50 = vmul.f32 %v4503_v41, %v7137_v63  ;;  %v3022_v31 = vmul.f32 %v4529_v46, %v7149_v60  ;;  %v4537_v51 = vld [vmem:[%s7159_s22 + $0x4c] sm:$0xff]  ;;  %v4512_v22 = vld [vmem:[%s7159_s22 + $0x3c] sm:$0xff]  ;;  %v2936_v24 = vmul.f32 %v4504_v52, %v7137_v63  ;;  %v2937_v30 = vmul.f32 %v4529_v46, %v7137_v63 }
 0x42c   : >> { %v2963_v11 = vmul.f32 %v4511_v2, %v7141_v43  ;;  %v3050_v27 = vmul.f32 %v4537_v51, %v7153_v35  ;;  %v4496_v48 = vld [vmem:[%s7159_s22 + $0x3a] sm:$0xff]  ;;  %v4555_v6 = vld [vmem:[%s7159_s22 + $0x63] sm:$0xff]  ;;  %v2964_v23 = vmul.f32 %v4512_v22, %v7141_v43  ;;  %v4522_v0 = vld [vmem:[%s7159_s22 + $0x52] sm:$0xff]  ;;  %v2965_v26 = vmul.f32 %v4537_v51, %v7141_v43 }
 0x42d   : >> { %v2943_v57 = vadd.f32 %v2935_v50, %v2907_v42  ;;  %v4563_v9 = vld [vmem:[%s7159_s22 + $0x64] sm:$0xff]  ;;  %v2908_v53 = vmul.f32 %v4496_v48, %v7133_v12  ;;  %v3109_v34 = vmul.f32 %v4555_v6, %v7166_v15  ;;  %v2995_v62 = vmul.f32 %v4522_v0, %v7145_v54  ;;  %v4530_v7 = vld [vmem:[%s7159_s22 + $0x53] sm:$0xff]  ;;  %v7235_v50 = vld [vmem:[%s7159_s22 + $0x7b] sm:$0xff] }
 0x42e   : >> { %v3137_v40 = vmul.f32 %v4563_v9, %v7175_v45  ;;  %v4538_v44 = vld [vmem:[%s7159_s22 + $0x54] sm:$0xff]  ;;  %v7207_v14 = vld [vmem:[%s7159_s22 + $0x6a] sm:$0xff]  ;;  %v3023_v1 = vmul.f32 %v4530_v7, %v7149_v60  ;;  %v2945_v59 = vadd.f32 %v2937_v30, %v2909_v38  ;;  %v2996_v33 = vmul.f32 %v7181_v37, %v7145_v54  ;;  %v7252_v38 = vld [vmem:[%s7159_s22 + $0x82] sm:$0xff] }
 0x42f   : >> { %v2971_v61 = vadd.f32 %v2963_v11, %v2943_v57  ;;  %v2944_v8 = vadd.f32 %v2936_v24, %v2908_v53  ;;  %v3051_v10 = vmul.f32 %v4538_v44, %v7153_v35  ;;  %v3082_v16 = vmul.f32 %v7207_v14, %v7157_v39  ;;  %v7214_v36 = vld [vmem:[%s7159_s22 + $0x6b] sm:$0xff]  ;;  %v7228_v32 = vld [vmem:[%s7159_s22 + $0x7a] sm:$0xff] }
 0x430   : >> { %v7217_v56 = vld [vmem:[%s7159_s22 + $0x6c] sm:$0xff]  ;;  %v3110_v25 = vmul.f32 %v7214_v36, %v7166_v15  ;;  %v3024_v55 = vmul.f32 %v4555_v6, %v7149_v60  ;;  %v2973_v49 = vadd.f32 %v2965_v26, %v2945_v59  ;;  %v3052_v41 = vmul.f32 %v4563_v9, %v7153_v35  ;;  %v7238_v11 = vld [vmem:[%s7159_s22 + $0x7c] sm:$0xff]  ;;  %v7271_v26 = vld [vmem:[%s7159_s22 + $0x84] sm:$0xff] }
 0x431   : >> { %v3002_v3 = vadd.f32 %v2994_v5, %v2971_v61  ;;  %v2972_v47 = vadd.f32 %v2964_v23, %v2944_v8  ;;  %v3138_v29 = vmul.f32 %v7217_v56, %v7175_v45  ;;  %v3083_v2 = vmul.f32 %v7228_v32, %v7157_v39  ;;  %v7259_v61 = vld [vmem:[%s7159_s22 + $0x83] sm:$0xff] }
 0x432   : >> { %v2910_v18 = vmul.f32 %v4522_v0, %v7133_v12  ;;  %v2938_v46 = vmul.f32 %v4530_v7, %v7137_v63  ;;  %v2966_v5 = vmul.f32 %v4538_v44, %v7141_v43  ;;  %v3004_v51 = vadd.f32 %v2996_v33, %v2973_v49 }
 0x433   : >> { %v3030_v19 = vadd.f32 %v3022_v31, %v3002_v3  ;;  %v3003_v42 = vadd.f32 %v2995_v62, %v2972_v47  ;;  %v3111_v58 = vmul.f32 %v7235_v50, %v7166_v15  ;;  %v3139_v28 = vmul.f32 %v7238_v11, %v7175_v45 }
 0x434   : >> { %v2946_v48 = vadd.f32 %v2938_v46, %v2910_v18  ;;  %v2997_v52 = vmul.f32 %v7207_v14, %v7145_v54  ;;  %v3025_v22 = vmul.f32 %v7214_v36, %v7149_v60  ;;  %v3032_v24 = vadd.f32 %v3024_v55, %v3004_v51  ;;  %v3156_v18 = vld [vmem:[%s7267_s24 + $0x8] sm:$0xff] }
 0x435   : >> { %v3058_v31 = vadd.f32 %v3050_v27, %v3030_v19  ;;  %v3031_v57 = vadd.f32 %v3023_v1, %v3003_v42  ;;  %v3053_v27 = vmul.f32 %v7217_v56, %v7153_v35  ;;  %v3084_v23 = vmul.f32 %v7252_v38, %v7157_v39 }
 0x436   : >> { %v2974_v30 = vadd.f32 %v2966_v5, %v2946_v48  ;;  %v2911_v62 = vmul.f32 %v7181_v37, %v7133_v12  ;;  %v2939_v7 = vmul.f32 %v4555_v6, %v7137_v63  ;;  %v3060_v8 = vadd.f32 %v3052_v41, %v3032_v24  ;;  %v4551_v41 = vld [vmem:[%s7159_s22 + $0x92] sm:$0xff] }
 0x437   : >> { %v3089_v53 = vadd.f32 %v3081_v13, %v3058_v31  ;;  %v3059_v0 = vadd.f32 %v3051_v10, %v3031_v57  ;;  %v3112_v13 = vmul.f32 %v7259_v61, %v7166_v15  ;;  %v2967_v1 = vmul.f32 %v4563_v9, %v7141_v43  ;;  %v3155_v10 = vld [vmem:[%s7267_s24] sm:$0xff]  ;;  %v3157_v31 = vld [vmem:[%s7267_s24 + $0x10] sm:$0xff] }
 0x438   : >> { %v3005_v59 = vadd.f32 %v2997_v52, %v2974_v30  ;;  %v2947_v37 = vadd.f32 %v2939_v7, %v2911_v62  ;;  %v2998_v6 = vmul.f32 %v7228_v32, %v7145_v54  ;;  %v3091_v33 = vadd.f32 %v3083_v2, %v3060_v8  ;;  %v4559_v24 = vld [vmem:[%s7159_s22 + $0x93] sm:$0xff] }
 0x439   : >> { %v3117_v44 = vadd.f32 %v3109_v34, %v3089_v53  ;;  %v3090_v3 = vadd.f32 %v3082_v16, %v3059_v0  ;;  %v3140_v9 = vmul.f32 %v7271_v26, %v7175_v45  ;;  %v3026_v47 = vmul.f32 %v7235_v50, %v7149_v60  ;;  %v4567_v7 = vld [vmem:[%s7159_s22 + $0x94] sm:$0xff] }
 0x43a   : >> { %v3033_v19 = vadd.f32 %v3025_v22, %v3005_v59  ;;  %v2975_v49 = vadd.f32 %v2967_v1, %v2947_v37  ;;  %v3054_v16 = vmul.f32 %v7238_v11, %v7153_v35  ;;  %v3119_v46 = vadd.f32 %v3111_v58, %v3091_v33  ;;  %v3158_v8 = vld [vmem:[%s7267_s24 + $0x18] sm:$0xff] }
 0x43b   : >> { %v3145_v34 = vadd.f32 %v3137_v40, %v3117_v44  ;;  %v3118_v55 = vadd.f32 %v3110_v25, %v3090_v3  ;;  %v3085_v40 = vmul.f32 %v4551_v41, %v7157_v39  ;;  %v2912_v2 = vmul.f32 %v7207_v14, %v7133_v12 }
 0x43c   : >> { %v3061_v51 = vadd.f32 %v3053_v27, %v3033_v19  ;;  %v3006_v25 = vadd.f32 %v2998_v6, %v2975_v49  ;;  %v2940_v57 = vmul.f32 %v7214_v36, %v7137_v63  ;;  %v3147_v52 = vadd.f32 %v3139_v28, %v3119_v46  ;;  %v4552_v6 = vld [vmem:[%s7159_s22 + $0x9a] sm:$0xff] }
 0x43d   : >> { %v3163_v42 = vadd.f32 %v3155_v10, %v3145_v34  ;;  %v3146_v5 = vadd.f32 %v3138_v29, %v3118_v55  ;;  %v2968_v58 = vmul.f32 %v7217_v56, %v7141_v43  ;;  %v2999_v22 = vmul.f32 %v7252_v38, %v7145_v54 }
 0x43e   : >> { %v3092_v14 = vadd.f32 %v3084_v23, %v3061_v51  ;;  %v3034_v29 = vadd.f32 %v3026_v47, %v3006_v25  ;;  %v2948_v27 = vadd.f32 %v2940_v57, %v2912_v2  ;;  %v3165_v0 = vadd.f32 %v3157_v31, %v3147_v52  ;;  %v4568_v2 = vld [vmem:[%s7159_s22 + $0x9c] sm:$0xff]  ;;  %v4553_v51 = vld [vmem:[%s7159_s22 + $0xaa] sm:$0xff] }
 0x43f   : >> { %v3175_v48 = vadd.f32 %v7185_v20, %v3163_v42  ;;  %v3164_v53 = vadd.f32 %v3156_v18, %v3146_v5  ;;  %v3113_v36 = vmul.f32 %v4559_v24, %v7166_v15  ;;  %v3027_v28 = vmul.f32 %v7259_v61, %v7149_v60  ;;  %v3159_v42 = vld [vmem:[%s7267_s24 + $0x20] sm:$0xff] }
 0x440   : >> { %v3120_v30 = vadd.f32 %v3112_v13, %v3092_v14  ;;  %v3062_v62 = vadd.f32 %v3054_v16, %v3034_v29  ;;  %v2976_v44 = vadd.f32 %v2968_v58, %v2948_v27  ;;  %v3177_v23 = vadd.f32 %v7185_v20, %v3165_v0  ;;  %v4561_v58 = vld [vmem:[%s7159_s22 + $0xab] sm:$0xff] }
 0x441   : >> { %3183 = vst [vmem:[%s7267_s24] sm:$0xff] %v3175_v48  ;;  %v3176_v56 = vadd.f32 %v7185_v20, %v3164_v53  ;;  %v3141_v1 = vmul.f32 %v4567_v7, %v7175_v45  ;;  %v3055_v10 = vmul.f32 %v7271_v26, %v7153_v35  ;;  %v2913_v3 = vmul.f32 %v7228_v32, %v7133_v12 }
 0x442   : >> { %v3148_v59 = vadd.f32 %v3140_v9, %v3120_v30  ;;  %v3093_v37 = vadd.f32 %v3085_v40, %v3062_v62  ;;  %v3007_v13 = vadd.f32 %v2999_v22, %v2976_v44  ;;  %v2941_v34 = vmul.f32 %v7235_v50, %v7137_v63  ;;  %3185 = vst [vmem:[%s7267_s24 + $0x10] sm:$0xff] %v3177_v23  ;;  %v4560_v9 = vld [vmem:[%s7159_s22 + $0x9b] sm:$0xff]  ;;  %v4562_v23 = vld [vmem:[%s7159_s22 + $0xb3] sm:$0xff] }
 0x443   : >> { %3184 = vst [vmem:[%s7267_s24 + $0x8] sm:$0xff] %v3176_v56  ;;  %v3086_v33 = vmul.f32 %v4552_v6, %v7157_v39  ;;  %v2969_v47 = vmul.f32 %v7238_v11, %v7141_v43  ;;  %v3000_v55 = vmul.f32 %v4551_v41, %v7145_v54  ;;  %v3114_v18 = vmul.f32 %v4560_v9, %v7166_v15 }
 0x444   : >> { %v3166_v32 = vadd.f32 %v3158_v8, %v3148_v59  ;;  %v3121_v19 = vadd.f32 %v3113_v36, %v3093_v37  ;;  %v3035_v49 = vadd.f32 %v3027_v28, %v3007_v13  ;;  %v2949_v16 = vadd.f32 %v2941_v34, %v2913_v3  ;;  %v4570_v3 = vld [vmem:[%s7159_s22 + $0xb4] sm:$0xff] }
 0x445   : >> { %v3028_v50 = vmul.f32 %v4559_v24, %v7149_v60  ;;  %v2914_v46 = vmul.f32 %v7252_v38, %v7133_v12  ;;  %v3142_v31 = vmul.f32 %v4568_v2, %v7175_v45  ;;  %v2942_v25 = vmul.f32 %v7259_v61, %v7137_v63  ;;  %v4569_v61 = vld [vmem:[%s7159_s22 + $0xac] sm:$0xff] }
 0x446   : >> { %v3178_v11 = vadd.f32 %v7185_v20, %v3166_v32  ;;  %v3149_v40 = vadd.f32 %v3141_v1, %v3121_v19  ;;  %v3063_v41 = vadd.f32 %v3055_v10, %v3035_v49  ;;  %v2977_v5 = vadd.f32 %v2969_v47, %v2949_v16  ;;  %v3161_v59 = vld [vmem:[%s7267_s24 + $0x30] sm:$0xff]  ;;  %v3226_v16 = vld [vmem:[%s7638_s5 + $0x18] sm:$0xff] (%p2887_p5) }
 0x447   : >> { %v2970_v57 = vmul.f32 %v7271_v26, %v7141_v43  ;;  %v3056_v52 = vmul.f32 %v4567_v7, %v7153_v35  ;;  %v2950_v22 = vadd.f32 %v2942_v25, %v2914_v46  ;;  %v3001_v53 = vmul.f32 %v4552_v6, %v7145_v54  ;;  %v3160_v43 = vld [vmem:[%s7267_s24 + $0x28] sm:$0xff]  ;;  %v4554_v54 = vld [vmem:[%s7159_s22 + $0xb2] sm:$0xff] }
 0x448   : >> { %3186 = vst [vmem:[%s7267_s24 + $0x18] sm:$0xff] %v3178_v11  ;;  %v3167_v12 = vadd.f32 %v3159_v42, %v3149_v40  ;;  %v3094_v38 = vadd.f32 %v3086_v33, %v3063_v41  ;;  %v3008_v48 = vadd.f32 %v3000_v55, %v2977_v5  ;;  %v3087_v63 = vmul.f32 %v4553_v51, %v7157_v39  ;;  %v3230_v46 = vld [vmem:[%s7638_s5 + $0x38] sm:$0xff] (%p2887_p5)  ;;  %v3231_v40 = vld [vmem:[%s7638_s5 + $0x40] sm:$0xff] (%p2887_p5)  ;;  %v3232_v41 = vld [vmem:[%s7638_s5 + $0x48] sm:$0xff] (%p2887_p5) }
 0x449   : >> { %v2978_v26 = vadd.f32 %v2970_v57, %v2950_v22  ;;  %v3029_v27 = vmul.f32 %v4560_v9, %v7149_v60  ;;  %v3115_v28 = vmul.f32 %v4561_v58, %v7166_v15  ;;  %v3057_v30 = vmul.f32 %v4568_v2, %v7153_v35  ;;  %v3225_v9 = vld [vmem:[%s7638_s5 + $0x10] sm:$0xff] (%p2887_p5)  ;;  %v3628_v51 = vld [vmem:[%s7639_s6] sm:$0xff] (%p2887_p5)  ;;  %v3629_v25 = vld [vmem:[%s7639_s6 + $0x8] sm:$0xff] (%p2887_p5) }
 0x44a   : >> { %v3179_v14 = vadd.f32 %v7185_v20, %v3167_v12  ;;  %v3122_v29 = vadd.f32 %v3114_v18, %v3094_v38  ;;  %v3036_v24 = vadd.f32 %v3028_v50, %v3008_v48  ;;  %v3143_v44 = vmul.f32 %v4569_v61, %v7175_v45  ;;  %v3229_v50 = vld [vmem:[%s7638_s5 + $0x30] sm:$0xff] (%p2887_p5)  ;;  %v3631_v48 = vld [vmem:[%s7639_s6 + $0x18] sm:$0xff] (%p2887_p5)  ;;  %v3236_v58 = vld [vmem:[%s7638_s5 + $0x68] sm:$0xff] (%p2887_p5) }
 0x44b   : >> { %v3009_v56 = vadd.f32 %v3001_v53, %v2978_v26  ;;  %v3088_v60 = vmul.f32 %v4554_v54, %v7157_v39  ;;  %v3116_v13 = vmul.f32 %v4562_v23, %v7166_v15  ;;  %v3144_v34 = vmul.f32 %v4570_v3, %v7175_v45  ;;  %v3162_v39 = vld [vmem:[%s7267_s24 + $0x38] sm:$0xff]  ;;  %v3223_v15 = vld [vmem:[%s7638_s5] sm:$0xff] (%p2887_p5)  ;;  %v3224_v45 = vld [vmem:[%s7638_s5 + $0x8] sm:$0xff] (%p2887_p5) }
 0x44c   : >> { %3187 = vst [vmem:[%s7267_s24 + $0x20] sm:$0xff] %v3179_v14  ;;  %v3150_v0 = vadd.f32 %v3142_v31, %v3122_v29  ;;  %v3064_v36 = vadd.f32 %v3056_v52, %v3036_v24  ;;  %v5119_v42 = vpack.c.bf16 (%p2887_p5), %v3226_v16, %v3225_v9  ;;  %v5127_v11 = vpack.c.bf16 (%p2887_p5), %v3230_v46, %v3229_v50  ;;  %v3233_v5 = vld [vmem:[%s7638_s5 + $0x50] sm:$0xff] (%p2887_p5)  ;;  %v3234_v31 = vld [vmem:[%s7638_s5 + $0x58] sm:$0xff] (%p2887_p5)  ;;  %v3235_v52 = vld [vmem:[%s7638_s5 + $0x60] sm:$0xff] (%p2887_p5) }
 0x44d   : >> { %v3037_v8 = vadd.f32 %v3029_v27, %v3009_v56  ;;  %v5131_v2 = vpack.c.bf16 (%p2887_p5), %v3232_v41, %v3231_v40  ;;  %v3630_v57 = vld [vmem:[%s7639_s6 + $0x10] sm:$0xff] (%p2887_p5)  ;;  %v5135_v12 = vpack.c.bf16 (%p2887_p5), %v3234_v31, %v3233_v5  ;;  %v5147_v38 = vpack.c.bf16 (%p2887_p5), %v3629_v25, %v3628_v51  ;;  %v3632_v53 = vld [vmem:[%s7639_s6 + $0x20] sm:$0xff] (%p2887_p5)  ;;  %v3633_v14 = vld [vmem:[%s7639_s6 + $0x28] sm:$0xff] (%p2887_p5) }
 0x44e   : >> { %v3168_v62 = vadd.f32 %v3160_v43, %v3150_v0  ;;  %v3095_v7 = vadd.f32 %v3087_v63, %v3064_v36  ;;  %v5151_v22 = vpack.c.bf16 (%p2887_p5), %v3631_v48, %v3630_v57  ;;  %v5139_v29 = vpack.c.bf16 (%p2887_p5), %v3236_v58, %v3235_v52  ;;  %v3237_v24 = vld [vmem:[%s7638_s5 + $0x70] sm:$0xff] (%p2887_p5)  ;;  %v3238_v63 = vld [vmem:[%s7638_s5 + $0x78] sm:$0xff] (%p2887_p5)  ;;  %v3636_v16 = vld [vmem:[%s7639_s6 + $0x40] sm:$0xff] (%p2887_p5) }
 0x44f   : >> { %v3065_v37 = vadd.f32 %v3057_v30, %v3037_v8  ;;  %5179 = vmatprep.subr.bf16.mxu1 (%p2887_p5), %v5147_v38  ;;  %v5155_v43 = vpack.c.bf16 (%p2887_p5), %v3633_v14, %v3632_v53  ;;  %v5143_v61 = vpack.c.bf16 (%p2887_p5), %v3238_v63, %v3237_v24  ;;  %v3635_v9 = vld [vmem:[%s7639_s6 + $0x38] sm:$0xff] (%p2887_p5)  ;;  %v3640_v50 = vld [vmem:[%s7639_s6 + $0x60] sm:$0xff] (%p2887_p5)  ;;  %v3641_v46 = vld [vmem:[%s7639_s6 + $0x68] sm:$0xff] (%p2887_p5) }
 0x450   : >> { %v3180_v1 = vadd.f32 %v7185_v20, %v3168_v62  ;;  %v3123_v10 = vadd.f32 %v3115_v28, %v3095_v7  ;;  %5187 = vmatpush3.bf16.msra.mxu1 (%p2887_p5), %v5147_v38  ;;  %v3642_v40 = vld [vmem:[%s7639_s6 + $0x70] sm:$0xff] (%p2887_p5)  ;;  %v3643_v41 = vld [vmem:[%s7639_s6 + $0x78] sm:$0xff] (%p2887_p5) }
 0x451   : >> { %v3096_v6 = vadd.f32 %v3088_v60, %v3065_v37  ;;  %5180 = vmatprep.subr.bf16.mxu1 (%p2887_p5), %v5151_v22  ;;  %v7855_v5 = vld [vmem:[#allocation20_spill] sm:$0xff] (%p2887_p5) }
 0x452   : >> { %3188 = vst [vmem:[%s7267_s24 + $0x28] sm:$0xff] %v3180_v1  ;;  %v3151_v35 = vadd.f32 %v3143_v44, %v3123_v10  ;;  %v7856_v31 = vld [vmem:[#allocation16_spill] sm:$0xff] (%p2887_p5) }
 0x453   : >> { %v3124_v47 = vadd.f32 %v3116_v13, %v3096_v6  ;;  %v7459_v51 = vrot.slane (%p2887_p5), %v7856_v31, %v7855_v5 }
 0x454   : >> { %v3169_v33 = vadd.f32 %v3161_v59, %v3151_v35  ;;  %5188 = vmatpush3.bf16.msra.mxu1 (%p2887_p5), %v5151_v22 }
 0x455   : >> { %v3152_v32 = vadd.f32 %v3144_v34, %v3124_v47  ;;  %2889 = sbr.rel (!%p2887_p5) target bundleno = 1059 (0x423), region = 125  ;;  %5181 = vmatprep.subr.bf16.mxu1 (%p2887_p5), %v5155_v43 }
 0x456   : >> { %v3181_v55 = vadd.f32 %v7185_v20, %v3169_v33 }
 0x457   : >> { %v3170_v19 = vadd.f32 %v3162_v39, %v3152_v32 }
 0x458   : >> { %3189 = vst [vmem:[%s7267_s24 + $0x30] sm:$0xff] %v3181_v55  ;;  %5189 = vmatpush3.bf16.msra.mxu1 (%p2887_p5), %v5155_v43 }
 0x459   : >> { %v3182_v49 = vadd.f32 %v7185_v20, %v3170_v19  ;;  %v5115_v20 = vpack.c.bf16 (%p2887_p5), %v3224_v45, %v3223_v15  ;;  %v3634_v45 = vld [vmem:[%s7639_s6 + $0x30] sm:$0xff] (%p2887_p5) }
 0x45b   : >> { %3190 = vst [vmem:[%s7267_s24 + $0x38] sm:$0xff] %v3182_v49  ;;  %5116 = vmatprep.subr.bf16.mxu0 (%p2887_p5), %v5115_v20 }
 0x45c   : > { %5118 = vmatpush3.bf16.msra.mxu0 %v5115_v20  ;;  %v5159_v20 = vpack.c.bf16 %v3635_v9, %v3634_v45 }
 0x45d   : > { %5120 = vmatprep.subr.bf16.mxu0 %v5119_v42 }
 0x45e   : > { %5182 = vmatprep.subr.bf16.mxu1 %v5159_v20 }
 0x45f   : > { %5190 = vmatpush3.bf16.msra.mxu1 %v5159_v20 }
 0x460   : > { %5122 = vmatpush3.bf16.msra.mxu0 %v5119_v42  ;;  %v3637_v42 = vld [vmem:[%s7639_s6 + $0x48] sm:$0xff] }
 0x461   : > { %5124 = vmatprep.subr.bf16.mxu0 %v5123_v21  ;;  %v5163_v4 = vpack.c.bf16 %v3637_v42, %v3636_v16 }
 0x462   : > { %v3191_v18 = vld [vmem:[#allocation3] sm:$0xff]  ;;  %v3192_v26 = vld [vmem:[#allocation3 + $0x8] sm:$0xff]  ;;  %v3193_v27 = vld [vmem:[#allocation3 + $0x10] sm:$0xff] }
 0x463   : > { %4939 = vmatprep.mubr.f32.mxu0 %v3191_v18  ;;  %v3194_v0 = vld [vmem:[#allocation3 + $0x18] sm:$0xff]  ;;  %v3195_v36 = vld [vmem:[#allocation3 + $0x20] sm:$0xff]  ;;  %v3196_v28 = vld [vmem:[#allocation3 + $0x28] sm:$0xff]  ;;  %5183 = vmatprep.subr.bf16.mxu1 %v5163_v4 }
 0x464   : > { %5126 = vmatpush3.bf16.msra.mxu0 %v5123_v21  ;;  %v3197_v54 = vld [vmem:[#allocation3 + $0x30] sm:$0xff]  ;;  %v3198_v56 = vld [vmem:[#allocation3 + $0x38] sm:$0xff]  ;;  %v3199_v30 = vld [vmem:[#allocation3 + $0x40] sm:$0xff]  ;;  %5191 = vmatpush3.bf16.msra.mxu1 %v5163_v4 }
 0x465   : > { %5128 = vmatprep.subr.bf16.mxu0 %v5127_v11  ;;  %v3200_v62 = vld [vmem:[#allocation3 + $0x48] sm:$0xff]  ;;  %v3201_v7 = vld [vmem:[#allocation3 + $0x50] sm:$0xff]  ;;  %v3202_v44 = vld [vmem:[#allocation3 + $0x58] sm:$0xff] }
 0x466   : > { %v3203_v23 = vld [vmem:[#allocation3 + $0x60] sm:$0xff]  ;;  %v3204_v8 = vld [vmem:[#allocation3 + $0x68] sm:$0xff]  ;;  %v3205_v60 = vld [vmem:[#allocation3 + $0x70] sm:$0xff] }
 0x467   : > { %v3206_v1 = vld [vmem:[#allocation3 + $0x78] sm:$0xff]  ;;  %v3207_v10 = vld [vmem:[#allocation3 + $0x80] sm:$0xff]  ;;  %v3208_v3 = vld [vmem:[#allocation3 + $0x88] sm:$0xff] }
 0x468   : > { %5130 = vmatpush3.bf16.msra.mxu0 %v5127_v11  ;;  %v3209_v59 = vld [vmem:[#allocation3 + $0x90] sm:$0xff]  ;;  %v3210_v37 = vld [vmem:[#allocation3 + $0x98] sm:$0xff]  ;;  %v3211_v13 = vld [vmem:[#allocation3 + $0xa0] sm:$0xff]  ;;  %v5171_v11 = vpack.c.bf16 %v3641_v46, %v3640_v50 }
 0x469   : > { %5132 = vmatprep.subr.bf16.mxu0 %v5131_v2  ;;  %v3212_v35 = vld [vmem:[#allocation3 + $0xa8] sm:$0xff]  ;;  %v3213_v6 = vld [vmem:[#allocation3 + $0xb0] sm:$0xff]  ;;  %v3214_v34 = vld [vmem:[#allocation3 + $0xb8] sm:$0xff] }
 0x46a   : > { %v3215_v33 = vld [vmem:[#allocation3 + $0xc0] sm:$0xff]  ;;  %v3216_v47 = vld [vmem:[#allocation3 + $0xc8] sm:$0xff]  ;;  %v3217_v55 = vld [vmem:[#allocation3 + $0xd0] sm:$0xff] }
 0x46b   : > { %v3218_v39 = vld [vmem:[#allocation3 + $0xd8] sm:$0xff]  ;;  %v3219_v32 = vld [vmem:[#allocation3 + $0xe0] sm:$0xff]  ;;  %v3220_v19 = vld [vmem:[#allocation3 + $0xe8] sm:$0xff] }
 0x46c   : > { %5134 = vmatpush3.bf16.msra.mxu0 %v5131_v2  ;;  %v3221_v49 = vld [vmem:[#allocation3 + $0xf0] sm:$0xff]  ;;  %v3222_v15 = vld [vmem:[#allocation3 + $0xf8] sm:$0xff]  ;;  %v3639_v21 = vld [vmem:[%s7639_s6 + $0x58] sm:$0xff]  ;;  %v5175_v2 = vpack.c.bf16 %v3643_v41, %v3642_v40 }
 0x46d   : > { %5136 = vmatprep.subr.bf16.mxu0 %v5135_v12  ;;  %v5167_v18 = vpack.c.bf16 %v3639_v21, %v3638_v17 }
 0x46f   : > { %5184 = vmatprep.subr.bf16.mxu1 %v5167_v18 }
 0x470   : > { %5138 = vmatpush3.bf16.msra.mxu0 %v5135_v12  ;;  %5192 = vmatpush3.bf16.msra.mxu1 %v5167_v18 }
 0x471   : > { %5140 = vmatprep.subr.bf16.mxu0 %v5139_v29  ;;  %5185 = vmatprep.subr.bf16.mxu1 %v5171_v11 }
 0x474   : > { %5142 = vmatpush3.bf16.msra.mxu0 %v5139_v29  ;;  %5193 = vmatpush3.bf16.msra.mxu1 %v5171_v11 }
 0x475   : > { %5144 = vmatprep.subr.bf16.mxu0 %v5143_v61  ;;  %5186 = vmatprep.subr.bf16.mxu1 %v5175_v2 }
 0x478   : > { %5146 = vmatpush3.bf16.msra.mxu0 %v5143_v61  ;;  %5194 = vmatpush3.bf16.msra.mxu1 %v5175_v2 }
 0x479   : > { %5148 = vmatprep.subr.bf16.mxu0 %v5147_v38 }
 0x47b   : > { %4940 = vmatmul.mubr.f32.vlgmr.msra.gmra.mrb[32].mxu0 %v3192_v26 }
 0x47c   : > { %4942 = vmatprep.mubr.f32.mxu0 %v3193_v27  ;;  %5150 = vmatpush3.bf16.msra.mxu0 %v5147_v38 }
 0x47d   : > { %5152 = vmatprep.subr.bf16.mxu0 %v5151_v22 }
 0x47f   : > { %4943 = vmatmul.mubr.f32.gmra.mrb[34].mxu0 %v3194_v0 }
 0x480   : > { %4945 = vmatprep.mubr.f32.mxu0 %v3195_v36  ;;  %5154 = vmatpush3.bf16.msra.mxu0 %v5151_v22 }
 0x481   : > { %5156 = vmatprep.subr.bf16.mxu0 %v5155_v43 }
 0x483   : > { %4946 = vmatmul.mubr.f32.gmra.mrb[36].mxu0 %v3196_v28 }
 0x484   : > { %4948 = vmatprep.mubr.f32.mxu0 %v3197_v54  ;;  %5158 = vmatpush3.bf16.msra.mxu0 %v5155_v43 }
 0x485   : > { %5160 = vmatprep.subr.bf16.mxu0 %v5159_v20 }
 0x487   : > { %4949 = vmatmul.mubr.f32.gmra.mrb[38].mxu0 %v3198_v56 }
 0x488   : > { %4951 = vmatprep.mubr.f32.mxu0 %v3199_v30  ;;  %5162 = vmatpush3.bf16.msra.mxu0 %v5159_v20 }
 0x489   : > { %5164 = vmatprep.subr.bf16.mxu0 %v5163_v4 }
 0x48b   : > { %4952 = vmatmul.mubr.f32.gmra.mrb[40].mxu0 %v3200_v62 }
 0x48c   : > { %4954 = vmatprep.mubr.f32.mxu0 %v3201_v7  ;;  %5166 = vmatpush3.bf16.msra.mxu0 %v5163_v4 }
 0x48d   : > { %5168 = vmatprep.subr.bf16.mxu0 %v5167_v18 }
 0x48f   : > { %4955 = vmatmul.mubr.f32.gmra.mrb[42].mxu0 %v3202_v44 }
 0x490   : > { %4957 = vmatprep.mubr.f32.mxu0 %v3203_v23  ;;  %5170 = vmatpush3.bf16.msra.mxu0 %v5167_v18 }
 0x491   : > { %5172 = vmatprep.subr.bf16.mxu0 %v5171_v11 }
 0x493   : > { %4958 = vmatmul.mubr.f32.gmra.mrb[44].mxu0 %v3204_v8 }
 0x494   : > { %4960 = vmatprep.mubr.f32.mxu0 %v3205_v60  ;;  %5174 = vmatpush3.bf16.msra.mxu0 %v5171_v11 }
 0x495   : > { %5176 = vmatprep.subr.bf16.mxu0 %v5175_v2 }
 0x497   : > { %4961 = vmatmul.mubr.f32.gmra.mrb[46].mxu0 %v3206_v1 }
 0x498   : > { %4963 = vmatprep.mubr.f32.mxu0 %v3207_v10  ;;  %5178 = vmatpush3.bf16.msra.mxu0 %v5175_v2 }
 0x49b   : > { %4964 = vmatmul.mubr.f32.gmra.mrb[48].mxu0 %v3208_v3 }
 0x49c   : > { %4966 = vmatprep.mubr.f32.mxu0 %v3209_v59 }
 0x49f   : > { %4967 = vmatmul.mubr.f32.gmra.mrb[50].mxu0 %v3210_v37 }
 0x4a0   : > { %4969 = vmatprep.mubr.f32.mxu0 %v3211_v13 }
 0x4a3   : > { %4970 = vmatmul.mubr.f32.gmra.mrb[52].mxu0 %v3212_v35 }
 0x4a4   : > { %4972 = vmatprep.mubr.f32.mxu0 %v3213_v6 }
 0x4a7   : > { %4973 = vmatmul.mubr.f32.gmra.mrb[54].mxu0 %v3214_v34 }
 0x4a8   : > { %4975 = vmatprep.mubr.f32.mxu0 %v3215_v33 }
 0x4ab   : > { %4976 = vmatmul.mubr.f32.gmra.mrb[56].mxu0 %v3216_v47 }
 0x4ac   : > { %4978 = vmatprep.mubr.f32.mxu0 %v3217_v55 }
 0x4af   : > { %4979 = vmatmul.mubr.f32.gmra.mrb[58].mxu0 %v3218_v39 }
 0x4b0   : > { %4981 = vmatprep.mubr.f32.mxu0 %v3219_v32 }
 0x4b3   : > { %4982 = vmatmul.mubr.f32.gmra.mrb[60].mxu0 %v3220_v19 }
 0x4b4   : > { %4984 = vmatprep.mubr.f32.mxu0 %v3221_v49 }
 0x4b7   : > { %4985 = vmatmul.mubr.f32.gmra.mrb[62].mxu0 %v3222_v15 }
 0x54e   : > { %v4941_v25 = vpop.f32.mrb[32].mxu0 }
 0x54f   : > { %v3315_v57 = vadd.f32 %v4941_v25, %v7459_v51  ;;  %v3309_v12 = vpop.f32.mrb[33].mxu0 }
 0x550   : > { %v3310_v38 = vadd.f32 %v3309_v12, %v7459_v51 }
 0x551   : > { %v3501_v48 = vmul.f32 0.70710677, %v3315_v57  ;;  %v3469_v59 = vmul.f32 0.5, %v3315_v57 }
 0x552   : > { %v3500_v52 = vmul.f32 0.70710677, %v3310_v38  ;;  %v4944_v58 = vpop.f32.mrb[34].mxu0  ;;  %v3468_v60 = vmul.f32 0.5, %v3310_v38 }
 0x553   : > { %5300 = verf.f32 %v3501_v48  ;;  %v3325_v22 = vadd.f32 %v4944_v58, %v7459_v51  ;;  %v3319_v53 = vpop.f32.mrb[35].mxu0 }
 0x554   : > { %5302 = verf.f32 %v3500_v52  ;;  %v3320_v14 = vadd.f32 %v3319_v53, %v7459_v51 }
 0x555   : > { %v3503_v29 = vmul.f32 0.70710677, %v3325_v22  ;;  %v3471_v45 = vmul.f32 0.5, %v3325_v22 }
 0x556   : > { %v3502_v24 = vmul.f32 0.70710677, %v3320_v14  ;;  %v4947_v63 = vpop.f32.mrb[36].mxu0  ;;  %v3470_v32 = vmul.f32 0.5, %v3320_v14 }
 0x557   : > { %5304 = verf.f32 %v3503_v29  ;;  %v3335_v43 = vadd.f32 %v4947_v63, %v7459_v51  ;;  %v3329_v61 = vpop.f32.mrb[37].mxu0 }
 0x558   : > { %5306 = verf.f32 %v3502_v24  ;;  %v3330_v26 = vadd.f32 %v3329_v61, %v7459_v51 }
 0x559   : > { %v3505_v27 = vmul.f32 0.70710677, %v3335_v43  ;;  %v3473_v2 = vmul.f32 0.5, %v3335_v43 }
 0x55a   : > { %v3504_v0 = vmul.f32 0.70710677, %v3330_v26  ;;  %v4950_v36 = vpop.f32.mrb[38].mxu0  ;;  %v3472_v40 = vmul.f32 0.5, %v3330_v26 }
 0x55b   : > { %5308 = verf.f32 %v3505_v27  ;;  %v7468_v28 = vadd.f32 %v4950_v36, %v7459_v51  ;;  %v3339_v54 = vpop.f32.mrb[39].mxu0 }
 0x55c   : > { %5310 = verf.f32 %v3504_v0  ;;  %v3340_v56 = vadd.f32 %v3339_v54, %v7459_v51 }
 0x55d   : > { %v5301_v30 = vpop.eup %5300  ;;  %v3507_v62 = vmul.f32 0.70710677, %v7468_v28  ;;  %v3475_v24 = vmul.f32 0.5, %v7468_v28 }
 0x55e   : > { %v5303_v7 = vpop.eup %5302  ;;  %v3565_v44 = vadd.f32 1.0, %v5301_v30  ;;  %v3506_v23 = vmul.f32 0.70710677, %v3340_v56  ;;  %v4953_v8 = vpop.f32.mrb[40].mxu0  ;;  %v3474_v22 = vmul.f32 0.5, %v3340_v56 }
 0x55f   : > { %v3564_v1 = vadd.f32 1.0, %v5303_v7  ;;  %5312 = verf.f32 %v3507_v62  ;;  %v7473_v10 = vadd.f32 %v4953_v8, %v7459_v51  ;;  %v3349_v3 = vpop.f32.mrb[41].mxu0 }
 0x560   : > { %5314 = verf.f32 %v3506_v23  ;;  %v7476_v37 = vadd.f32 %v3349_v3, %v7459_v51  ;;  %v3597_v33 = vmul.f32 %v3565_v44, %v3469_v59 }
 0x561   : > { %v5305_v13 = vpop.eup %5304  ;;  %v3509_v35 = vmul.f32 0.70710677, %v7473_v10  ;;  %v3596_v6 = vmul.f32 %v3564_v1, %v3468_v60  ;;  %v3477_v44 = vmul.f32 0.5, %v7473_v10 }
 0x562   : > { %v5307_v34 = vpop.eup %5306  ;;  %v3567_v47 = vadd.f32 1.0, %v5305_v13  ;;  %v3508_v55 = vmul.f32 0.70710677, %v7476_v37  ;;  %v4956_v39 = vpop.f32.mrb[42].mxu0  ;;  %v3476_v30 = vmul.f32 0.5, %v7476_v37 }
 0x563   : > { %v3566_v19 = vadd.f32 1.0, %v5307_v34  ;;  %5316 = verf.f32 %v3509_v35  ;;  %v7481_v49 = vadd.f32 %v4956_v39, %v7459_v51  ;;  %v3359_v15 = vpop.f32.mrb[43].mxu0  ;;  %5019 = vmatprep.mubr.f32.mxu0 %v3596_v6 }
 0x564   : > { %5318 = verf.f32 %v3508_v55  ;;  %v7484_v9 = vadd.f32 %v3359_v15, %v7459_v51  ;;  %5020 = vmatmul.mubr.f32.vlgmr.msra.gmra.mrb[64].mxu0 %v3597_v33  ;;  %v3599_v50 = vmul.f32 %v3567_v47, %v3471_v45 }
 0x565   : > { %v5309_v20 = vpop.eup %5308  ;;  %v3511_v16 = vmul.f32 0.70710677, %v7481_v49  ;;  %v3598_v42 = vmul.f32 %v3566_v19, %v3470_v32  ;;  %v3479_v47 = vmul.f32 0.5, %v7481_v49 }
 0x566   : > { %v5311_v4 = vpop.eup %5310  ;;  %v3569_v17 = vadd.f32 1.0, %v5309_v20  ;;  %v3510_v21 = vmul.f32 0.70710677, %v7484_v9  ;;  %v4959_v18 = vpop.f32.mrb[44].mxu0  ;;  %v3478_v6 = vmul.f32 0.5, %v7484_v9 }
 0x567   : > { %5320 = verf.f32 %v3511_v16  ;;  %v7489_v46 = vadd.f32 %v4959_v18, %v7459_v51  ;;  %v3369_v11 = vpop.f32.mrb[45].mxu0  ;;  %5022 = vmatprep.mubr.f32.mxu0 %v3598_v42  ;;  %v3568_v41 = vadd.f32 1.0, %v5311_v4 }
 0x568   : > { %5322 = verf.f32 %v3510_v21  ;;  %v7492_v5 = vadd.f32 %v3369_v11, %v7459_v51  ;;  %5023 = vmatmul.mubr.f32.gmra.mrb[66].mxu0 %v3599_v50  ;;  %v3601_v58 = vmul.f32 %v3569_v17, %v3473_v2 }
 0x569   : > { %v5313_v31 = vpop.eup %5312  ;;  %v3513_v25 = vmul.f32 0.70710677, %v7489_v46  ;;  %v3600_v57 = vmul.f32 %v3568_v41, %v3472_v40  ;;  %v3481_v21 = vmul.f32 0.5, %v7489_v46 }
 0x56a   : > { %v5315_v12 = vpop.eup %5314  ;;  %v3571_v38 = vadd.f32 1.0, %v5313_v31  ;;  %v3512_v48 = vmul.f32 0.70710677, %v7492_v5  ;;  %v4962_v52 = vpop.f32.mrb[46].mxu0  ;;  %v3480_v42 = vmul.f32 0.5, %v7492_v5 }
 0x56b   : > { %v3570_v53 = vadd.f32 1.0, %v5315_v12  ;;  %5324 = verf.f32 %v3513_v25  ;;  %v7497_v14 = vadd.f32 %v4962_v52, %v7459_v51  ;;  %v3379_v29 = vpop.f32.mrb[47].mxu0  ;;  %5025 = vmatprep.mubr.f32.mxu1 %v3600_v57 }
 0x56c   : > { %5326 = verf.f32 %v3512_v48  ;;  %v7501_v63 = vadd.f32 %v3379_v29, %v7459_v51  ;;  %5026 = vmatmul.mubr.f32.vlgmr.msra.gmra.mrb[32].mxu1 %v3601_v58  ;;  %v3603_v56 = vmul.f32 %v3571_v38, %v3475_v24 }
 0x56d   : > { %v5317_v43 = vpop.eup %5316  ;;  %v3515_v61 = vmul.f32 0.70710677, %v7497_v14  ;;  %v3602_v26 = vmul.f32 %v3570_v53, %v3474_v22  ;;  %v3483_v48 = vmul.f32 0.5, %v7497_v14 }
 0x56e   : > { %v5319_v27 = vpop.eup %5318  ;;  %v3573_v0 = vadd.f32 1.0, %v5317_v43  ;;  %v3514_v36 = vmul.f32 0.70710677, %v7501_v63  ;;  %v4965_v54 = vpop.f32.mrb[48].mxu0  ;;  %v3482_v57 = vmul.f32 0.5, %v7501_v63 }
 0x56f   : > { %v3572_v62 = vadd.f32 1.0, %v5319_v27  ;;  %5328 = verf.f32 %v3515_v61  ;;  %v7507_v28 = vadd.f32 %v4965_v54, %v7459_v51  ;;  %v3389_v7 = vpop.f32.mrb[49].mxu0  ;;  %5028 = vmatprep.mubr.f32.mxu1 %v3602_v26 }
 0x570   : > { %5330 = verf.f32 %v3514_v36  ;;  %v7511_v23 = vadd.f32 %v3389_v7, %v7459_v51  ;;  %5029 = vmatmul.mubr.f32.gmra.mrb[34].mxu1 %v3603_v56  ;;  %v3605_v35 = vmul.f32 %v3573_v0, %v3477_v44 }
 0x571   : > { %v5321_v8 = vpop.eup %5320  ;;  %v3517_v60 = vmul.f32 0.70710677, %v7507_v28  ;;  %v3604_v1 = vmul.f32 %v3572_v62, %v3476_v30  ;;  %v3485_v36 = vmul.f32 0.5, %v7507_v28 }
 0x572   : > { %v5323_v3 = vpop.eup %5322  ;;  %v3575_v59 = vadd.f32 1.0, %v5321_v8  ;;  %v3516_v37 = vmul.f32 0.70710677, %v7511_v23  ;;  %v4968_v13 = vpop.f32.mrb[50].mxu0  ;;  %v3484_v26 = vmul.f32 0.5, %v7511_v23 }
 0x573   : > { %v3574_v34 = vadd.f32 1.0, %v5323_v3  ;;  %5332 = verf.f32 %v3517_v60  ;;  %v7517_v10 = vadd.f32 %v4968_v13, %v7459_v51  ;;  %v3399_v33 = vpop.f32.mrb[51].mxu0  ;;  %5031 = vmatprep.mubr.f32.mxu1 %v3604_v1 }
 0x574   : > { %5334 = verf.f32 %v3516_v37  ;;  %v7521_v55 = vadd.f32 %v3399_v33, %v7459_v51  ;;  %5032 = vmatmul.mubr.f32.gmra.mrb[36].mxu1 %v3605_v35  ;;  %v3607_v16 = vmul.f32 %v3575_v59, %v3479_v47 }
 0x575   : > { %v5325_v39 = vpop.eup %5324  ;;  %v3519_v32 = vmul.f32 0.70710677, %v7517_v10  ;;  %v3606_v19 = vmul.f32 %v3574_v34, %v3478_v6  ;;  %v3487_v37 = vmul.f32 0.5, %v7517_v10 }
 0x576   : > { %v5327_v15 = vpop.eup %5326  ;;  %v3577_v45 = vadd.f32 1.0, %v5325_v39  ;;  %v3518_v9 = vmul.f32 0.70710677, %v7521_v55  ;;  %v4971_v20 = vpop.f32.mrb[52].mxu0  ;;  %v3486_v1 = vmul.f32 0.5, %v7521_v55 }
 0x577   : > { %v3576_v4 = vadd.f32 1.0, %v5327_v15  ;;  %5336 = verf.f32 %v3519_v32  ;;  %v7527_v49 = vadd.f32 %v4971_v20, %v7459_v51  ;;  %v3409_v17 = vpop.f32.mrb[53].mxu0  ;;  %5034 = vmatprep.mubr.f32.mxu1 %v3606_v19 }
 0x578   : > { %5338 = verf.f32 %v3518_v9  ;;  %v7531_v18 = vadd.f32 %v3409_v17, %v7459_v51  ;;  %5035 = vmatmul.mubr.f32.gmra.mrb[38].mxu1 %v3607_v16  ;;  %v3609_v25 = vmul.f32 %v3577_v45, %v3481_v21 }
 0x579   : > { %v5329_v50 = vpop.eup %5328  ;;  %v3521_v11 = vmul.f32 0.70710677, %v7527_v49  ;;  %v3608_v40 = vmul.f32 %v3576_v4, %v3480_v42  ;;  %v3489_v9 = vmul.f32 0.5, %v7527_v49 }
 0x57a   : > { %v5331_v41 = vpop.eup %5330  ;;  %v3579_v2 = vadd.f32 1.0, %v5329_v50  ;;  %v3520_v5 = vmul.f32 0.70710677, %v7531_v18  ;;  %v4974_v31 = vpop.f32.mrb[54].mxu0  ;;  %v3488_v19 = vmul.f32 0.5, %v7531_v18 }
 0x57b   : > { %v3578_v12 = vadd.f32 1.0, %v5331_v41  ;;  %5340 = verf.f32 %v3521_v11  ;;  %v7537_v46 = vadd.f32 %v4974_v31, %v7459_v51  ;;  %v3419_v38 = vpop.f32.mrb[55].mxu0  ;;  %5037 = vmatprep.mubr.f32.mxu1 %v3608_v40 }
 0x57c   : > { %5342 = verf.f32 %v3520_v5  ;;  %v7541_v52 = vadd.f32 %v3419_v38, %v7459_v51  ;;  %5038 = vmatmul.mubr.f32.gmra.mrb[40].mxu1 %v3609_v25  ;;  %v3611_v61 = vmul.f32 %v3579_v2, %v3483_v48 }
 0x57d   : > { %v5333_v58 = vpop.eup %5332  ;;  %v3523_v22 = vmul.f32 0.70710677, %v7537_v46  ;;  %v3610_v53 = vmul.f32 %v3578_v12, %v3482_v57  ;;  %v3491_v21 = vmul.f32 0.5, %v7537_v46 }
 0x57e   : > { %v5335_v29 = vpop.eup %5334  ;;  %v3581_v24 = vadd.f32 1.0, %v5333_v58  ;;  %v3522_v63 = vmul.f32 0.70710677, %v7541_v52  ;;  %v4977_v43 = vpop.f32.mrb[56].mxu0  ;;  %v3490_v41 = vmul.f32 0.5, %v7541_v52 }
 0x57f   : > { %v3580_v27 = vadd.f32 1.0, %v5335_v29  ;;  %5344 = verf.f32 %v3523_v22  ;;  %v3435_v14 = vadd.f32 %v4977_v43, %v7459_v51  ;;  %v3429_v0 = vpop.f32.mrb[57].mxu0  ;;  %5040 = vmatprep.mubr.f32.mxu1 %v3610_v53 }
 0x580   : > { %5346 = verf.f32 %v3522_v63  ;;  %v3430_v54 = vadd.f32 %v3429_v0, %v7459_v51  ;;  %5041 = vmatmul.mubr.f32.gmra.mrb[42].mxu1 %v3611_v61  ;;  %v3613_v60 = vmul.f32 %v3581_v24, %v3485_v36 }
 0x581   : > { %v5337_v56 = vpop.eup %5336  ;;  %v3525_v30 = vmul.f32 0.70710677, %v3435_v14  ;;  %v3612_v62 = vmul.f32 %v3580_v27, %v3484_v26  ;;  %v3493_v31 = vmul.f32 0.5, %v3435_v14 }
 0x582   : > { %v5339_v7 = vpop.eup %5338  ;;  %v3583_v44 = vadd.f32 1.0, %v5337_v56  ;;  %v3524_v8 = vmul.f32 0.70710677, %v3430_v54  ;;  %v4980_v23 = vpop.f32.mrb[58].mxu0  ;;  %v3492_v12 = vmul.f32 0.5, %v3430_v54 }
 0x583   : > { %v3582_v3 = vadd.f32 1.0, %v5339_v7  ;;  %5348 = verf.f32 %v3525_v30  ;;  %5043 = vmatprep.mubr.f32.mxu1 %v3612_v62  ;;  %v3445_v59 = vadd.f32 %v4980_v23, %v7459_v51  ;;  %v3439_v28 = vpop.f32.mrb[59].mxu0 }
 0x584   : > { %5350 = verf.f32 %v3524_v8  ;;  %5044 = vmatmul.mubr.f32.gmra.mrb[44].mxu1 %v3613_v60  ;;  %v3440_v13 = vadd.f32 %v3439_v28, %v7459_v51  ;;  %v3615_v32 = vmul.f32 %v3583_v44, %v3487_v37 }
 0x585   : > { %v5341_v35 = vpop.eup %5340  ;;  %v3527_v6 = vmul.f32 0.70710677, %v3445_v59  ;;  %v3614_v34 = vmul.f32 %v3582_v3, %v3486_v1  ;;  %v3495_v29 = vmul.f32 0.5, %v3445_v59 }
 0x586   : > { %v5343_v33 = vpop.eup %5342  ;;  %v3585_v47 = vadd.f32 1.0, %v5341_v35  ;;  %v3526_v39 = vmul.f32 0.70710677, %v3440_v13  ;;  %v4983_v55 = vpop.f32.mrb[60].mxu0  ;;  %v3494_v43 = vmul.f32 0.5, %v3440_v13 }
 0x587   : > { %v3584_v15 = vadd.f32 1.0, %v5343_v33  ;;  %5352 = verf.f32 %v3527_v6  ;;  %5046 = vmatprep.mubr.f32.mxu1 %v3614_v34  ;;  %v3455_v45 = vadd.f32 %v4983_v55, %v7459_v51  ;;  %v3449_v10 = vpop.f32.mrb[61].mxu0  ;;  %v7564_v35 = vld [vmem:[%s7641_s8] ss:$0 sm:$0xff] }
 0x588   : > { %5354 = verf.f32 %v3526_v39  ;;  %5047 = vmatmul.mubr.f32.gmra.mrb[46].mxu1 %v3615_v32  ;;  %v3450_v20 = vadd.f32 %v3449_v10, %v7459_v51  ;;  %v3617_v18 = vmul.f32 %v3585_v47, %v3489_v9 }
 0x589   : > { %v5345_v16 = vpop.eup %5344  ;;  %v3616_v42 = vmul.f32 %v3584_v15, %v3488_v19  ;;  %v3529_v4 = vmul.f32 0.70710677, %v3455_v45  ;;  %v3497_v14 = vmul.f32 0.5, %v3455_v45 }
 0x58a   : > { %v5347_v17 = vpop.eup %5346  ;;  %v3587_v50 = vadd.f32 1.0, %v5345_v16  ;;  %v3528_v11 = vmul.f32 0.70710677, %v3450_v20  ;;  %v4986_v40 = vpop.f32.mrb[62].mxu0  ;;  %v3496_v54 = vmul.f32 0.5, %v3450_v20 }
 0x58b   : > { %v3586_v2 = vadd.f32 1.0, %v5347_v17  ;;  %5049 = vmatprep.mubr.f32.mxu1 %v3616_v42  ;;  %5356 = verf.f32 %v3529_v4  ;;  %v3465_v49 = vadd.f32 %v4986_v40, %v7459_v51  ;;  %v3459_v5 = vpop.f32.mrb[63].mxu0 }
 0x58c   : > { %5050 = vmatmul.mubr.f32.gmra.mrb[48].mxu1 %v3617_v18  ;;  %5358 = verf.f32 %v3528_v11  ;;  %v3460_v25 = vadd.f32 %v3459_v5, %v7459_v51  ;;  %v3619_v22 = vmul.f32 %v3587_v50, %v3491_v21 }
 0x58d   : > { %v5349_v57 = vpop.eup %5348  ;;  %v3618_v46 = vmul.f32 %v3586_v2, %v3490_v41  ;;  %v3531_v38 = vmul.f32 0.70710677, %v3465_v49  ;;  %v3499_v44 = vmul.f32 0.5, %v3465_v49 }
 0x58e   : > { %v5351_v48 = vpop.eup %5350  ;;  %v3589_v58 = vadd.f32 1.0, %v5349_v57  ;;  %v3530_v53 = vmul.f32 0.70710677, %v3460_v25  ;;  %v3498_v23 = vmul.f32 0.5, %v3460_v25 }
 0x58f   : > { %v3588_v52 = vadd.f32 1.0, %v5351_v48  ;;  %5052 = vmatprep.mubr.f32.mxu1 %v3618_v46  ;;  %5360 = verf.f32 %v3531_v38 }
 0x590   : > { %5053 = vmatmul.mubr.f32.gmra.mrb[50].mxu1 %v3619_v22  ;;  %v3621_v24 = vmul.f32 %v3589_v58, %v3493_v31  ;;  %5362 = verf.f32 %v3530_v53 }
 0x591   : > { %v5353_v63 = vpop.eup %5352  ;;  %v3620_v61 = vmul.f32 %v3588_v52, %v3492_v12 }
 0x592   : > { %v5355_v26 = vpop.eup %5354  ;;  %v3591_v51 = vadd.f32 1.0, %v5353_v63 }
 0x593   : > { %v3590_v27 = vadd.f32 1.0, %v5355_v26  ;;  %5055 = vmatprep.mubr.f32.mxu1 %v3620_v61 }
 0x594   : > { %5056 = vmatmul.mubr.f32.gmra.mrb[52].mxu1 %v3621_v24  ;;  %v3623_v0 = vmul.f32 %v3591_v51, %v3495_v29 }
 0x595   : > { %v5357_v36 = vpop.eup %5356  ;;  %v3622_v56 = vmul.f32 %v3590_v27, %v3494_v43 }
 0x596   : > { %v5359_v30 = vpop.eup %5358  ;;  %v3593_v62 = vadd.f32 1.0, %v5357_v36 }
 0x597   : > { %v3592_v7 = vadd.f32 1.0, %v5359_v30  ;;  %5058 = vmatprep.mubr.f32.mxu1 %v3622_v56 }
 0x598   : > { %5059 = vmatmul.mubr.f32.gmra.mrb[54].mxu1 %v3623_v0  ;;  %v3625_v8 = vmul.f32 %v3593_v62, %v3497_v14 }
 0x599   : > { %v5361_v60 = vpop.eup %5360  ;;  %v3624_v1 = vmul.f32 %v3592_v7, %v3496_v54 }
 0x59a   : > { %v5363_v3 = vpop.eup %5362  ;;  %v3595_v59 = vadd.f32 1.0, %v5361_v60 }
 0x59b   : > { %v3594_v28 = vadd.f32 1.0, %v5363_v3  ;;  %5061 = vmatprep.mubr.f32.mxu1 %v3624_v1 }
 0x59c   : > { %5062 = vmatmul.mubr.f32.gmra.mrb[56].mxu1 %v3625_v8  ;;  %v3627_v37 = vmul.f32 %v3595_v59, %v3499_v44 }
 0x59d   : > { %v3626_v13 = vmul.f32 %v3594_v28, %v3498_v23 }
 0x59f   : > { %5064 = vmatprep.mubr.f32.mxu1 %v3626_v13 }
 0x5a0   : > { %5065 = vmatmul.mubr.f32.gmra.mrb[58].mxu1 %v3627_v37 }
 0x637   : > { %v5021_v6 = vpop.f32.mrb[64].mxu0 }
 0x638   : > { %v3717_v34 = vpop.f32.mrb[65].mxu0  ;;  %v3723_v32 = vadd.f32 %v5021_v6, %v7564_v35 }
 0x639   : > { %v3718_v33 = vadd.f32 %v7564_v35, %v3717_v34  ;;  %v3940_v34 = vld [vmem:[%s5474_s27] sm:$0xff] }
 0x63b   : > { %v5024_v47 = vpop.f32.mrb[66].mxu0  ;;  %3876 = vxpose.xlu0.b32.start [1/16] (narrow) %v3718_v33, 64 }
 0x63c   : > { %v3727_v39 = vpop.f32.mrb[67].mxu0  ;;  %v3733_v9 = vadd.f32 %v5024_v47, %v7564_v35 }
 0x63d   : > { %v3728_v15 = vadd.f32 %v7564_v35, %v3727_v39 }
 0x63f   : > { %v5027_v55 = vpop.f32.mrb[32].mxu1  ;;  %3877 = vxpose.xlu0.b32.cont [2/16] (narrow) %v3723_v32, 64 }
 0x640   : > { %v3737_v19 = vpop.f32.mrb[33].mxu1  ;;  %v3743_v21 = vadd.f32 %v5027_v55, %v7564_v35  ;;  %v3944_v55 = vld [vmem:[%s5474_s27 + $0x20] sm:$0xff] }
 0x641   : > { %v3738_v42 = vadd.f32 %v7564_v35, %v3737_v19 }
 0x643   : > { %v5030_v45 = vpop.f32.mrb[34].mxu1  ;;  %3878 = vxpose.xlu0.b32.cont [3/16] (narrow) %v3728_v15, 64 }
 0x644   : > { %v3747_v10 = vpop.f32.mrb[35].mxu1  ;;  %v3753_v2 = vadd.f32 %v5030_v45, %v7564_v35  ;;  %v3946_v45 = vld [vmem:[%s5474_s27 + $0x30] sm:$0xff] }
 0x645   : > { %v3748_v11 = vadd.f32 %v7564_v35, %v3747_v10 }
 0x647   : > { %v5033_v20 = vpop.f32.mrb[36].mxu1  ;;  %3879 = vxpose.xlu0.b32.cont [4/16] (narrow) %v3733_v9, 64 }
 0x648   : > { %v3757_v16 = vpop.f32.mrb[37].mxu1  ;;  %v3763_v46 = vadd.f32 %v5033_v20, %v7564_v35  ;;  %v3948_v20 = vld [vmem:[%s5474_s27 + $0x40] sm:$0xff] }
 0x649   : > { %v3758_v31 = vadd.f32 %v7564_v35, %v3757_v16 }
 0x64b   : > { %v5036_v4 = vpop.f32.mrb[38].mxu1  ;;  %3880 = vxpose.xlu0.b32.cont [5/16] (narrow) %v3738_v42, 64 }
 0x64c   : > { %v3767_v17 = vpop.f32.mrb[39].mxu1  ;;  %v3773_v24 = vadd.f32 %v5036_v4, %v7564_v35  ;;  %v3950_v4 = vld [vmem:[%s5474_s27 + $0x50] sm:$0xff] }
 0x64d   : > { %v3768_v22 = vadd.f32 %v7564_v35, %v3767_v17 }
 0x64f   : > { %v5039_v50 = vpop.f32.mrb[40].mxu1  ;;  %3881 = vxpose.xlu0.b32.cont [6/16] (narrow) %v3743_v21, 64 }
 0x650   : > { %v3777_v18 = vpop.f32.mrb[41].mxu1  ;;  %v3783_v56 = vadd.f32 %v5039_v50, %v7564_v35  ;;  %v3952_v50 = vld [vmem:[%s5474_s27 + $0x60] sm:$0xff] }
 0x651   : > { %v3778_v51 = vadd.f32 %v7564_v35, %v3777_v18 }
 0x653   : > { %v5042_v40 = vpop.f32.mrb[42].mxu1  ;;  %3882 = vxpose.xlu0.b32.cont [7/16] (narrow) %v3748_v11, 64 }
 0x654   : > { %v3787_v41 = vpop.f32.mrb[43].mxu1  ;;  %v3793_v37 = vadd.f32 %v5042_v40, %v7564_v35  ;;  %v3954_v40 = vld [vmem:[%s5474_s27 + $0x70] sm:$0xff] }
 0x655   : > { %v3788_v60 = vadd.f32 %v7564_v35, %v3787_v41 }
 0x657   : > { %v5045_v49 = vpop.f32.mrb[44].mxu1  ;;  %3883 = vxpose.xlu0.b32.cont [8/16] (narrow) %v3753_v2, 64 }
 0x658   : > { %v3797_v5 = vpop.f32.mrb[45].mxu1  ;;  %v3803_v38 = vadd.f32 %v5045_v49, %v7564_v35  ;;  %v3941_v49 = vld [vmem:[%s5474_s27 + $0x8] sm:$0xff] }
 0x659   : > { %v3798_v25 = vadd.f32 %v7564_v35, %v3797_v5 }
 0x65b   : > { %v5048_v57 = vpop.f32.mrb[46].mxu1  ;;  %3908 = vxpose.xlu1.b32.start [1/16] (narrow) %v3798_v25, 64  ;;  %3884 = vxpose.xlu0.b32.cont [9/16] (narrow) %v3758_v31, 64  ;;  %v3943_v25 = vld [vmem:[%s5474_s27 + $0x18] sm:$0xff] }
 0x65c   : > { %v3807_v12 = vpop.f32.mrb[47].mxu1  ;;  %v3813_v63 = vadd.f32 %v5048_v57, %v7564_v35 }
 0x65d   : > { %v3808_v53 = vadd.f32 %v7564_v35, %v3807_v12 }
 0x65f   : > { %v5051_v48 = vpop.f32.mrb[48].mxu1  ;;  %3909 = vxpose.xlu1.b32.cont [2/16] (narrow) %v3803_v38, 64  ;;  %3885 = vxpose.xlu0.b32.cont [10/16] (narrow) %v3763_v46, 64  ;;  %v3945_v46 = vld [vmem:[%s5474_s27 + $0x28] sm:$0xff] }
 0x660   : > { %v3817_v58 = vpop.f32.mrb[49].mxu1  ;;  %v3823_v30 = vadd.f32 %v5051_v48, %v7564_v35 }
 0x661   : > { %v3818_v27 = vadd.f32 %v7564_v35, %v3817_v58  ;;  %v3947_v58 = vld [vmem:[%s5474_s27 + $0x38] sm:$0xff] }
 0x663   : > { %v5054_v52 = vpop.f32.mrb[50].mxu1  ;;  %3910 = vxpose.xlu1.b32.cont [3/16] (narrow) %v3808_v53, 64  ;;  %3886 = vxpose.xlu0.b32.cont [11/16] (narrow) %v3768_v22, 64 }
 0x664   : > { %v3827_v29 = vpop.f32.mrb[51].mxu1  ;;  %v3833_v13 = vadd.f32 %v5054_v52, %v7564_v35  ;;  %v3949_v52 = vld [vmem:[%s5474_s27 + $0x48] sm:$0xff] }
 0x665   : > { %v3828_v23 = vadd.f32 %v7564_v35, %v3827_v29 }
 0x667   : > { %v5057_v43 = vpop.f32.mrb[52].mxu1  ;;  %3911 = vxpose.xlu1.b32.cont [4/16] (narrow) %v3813_v63, 64  ;;  %3887 = vxpose.xlu0.b32.cont [12/16] (narrow) %v3773_v24, 64  ;;  %v3951_v63 = vld [vmem:[%s5474_s27 + $0x58] sm:$0xff] }
 0x668   : > { %v3843_v61 = vadd.f32 %v5057_v43, %v7564_v35  ;;  %v3837_v26 = vpop.f32.mrb[53].mxu1 }
 0x669   : > { %v3838_v14 = vadd.f32 %v7564_v35, %v3837_v26  ;;  %v3953_v26 = vld [vmem:[%s5474_s27 + $0x68] sm:$0xff] }
 0x66b   : > { %3912 = vxpose.xlu1.b32.cont [5/16] (narrow) %v3818_v27, 64  ;;  %3888 = vxpose.xlu0.b32.cont [13/16] (narrow) %v3778_v51, 64  ;;  %v5060_v0 = vpop.f32.mrb[54].mxu1 }
 0x66c   : > { %v3853_v36 = vadd.f32 %v5060_v0, %v7564_v35  ;;  %v3847_v54 = vpop.f32.mrb[55].mxu1 }
 0x66d   : > { %v3848_v62 = vadd.f32 %v7564_v35, %v3847_v54 }
 0x66f   : > { %3913 = vxpose.xlu1.b32.cont [6/16] (narrow) %v3823_v30, 64  ;;  %3889 = vxpose.xlu0.b32.cont [14/16] (narrow) %v3783_v56, 64  ;;  %v5063_v7 = vpop.f32.mrb[56].mxu1 }
 0x670   : > { %v3863_v44 = vadd.f32 %v5063_v7, %v7564_v35  ;;  %v3857_v8 = vpop.f32.mrb[57].mxu1 }
 0x671   : > { %v3858_v1 = vadd.f32 %v7564_v35, %v3857_v8 }
 0x673   : > { %3914 = vxpose.xlu1.b32.cont [7/16] (narrow) %v3828_v23, 64  ;;  %3890 = vxpose.xlu0.b32.cont [15/16] (narrow) %v3788_v60, 64  ;;  %v5066_v3 = vpop.f32.mrb[58].mxu1 }
 0x674   : > { %v3873_v59 = vadd.f32 %v5066_v3, %v7564_v35  ;;  %v3867_v28 = vpop.f32.mrb[59].mxu1 }
 0x675   : > { %v3868_v6 = vadd.f32 %v7564_v35, %v3867_v28  ;;  %v3942_v35 = vld [vmem:[%s5474_s27 + $0x10] sm:$0xff] }
 0x677   : > { %3915 = vxpose.xlu1.b32.cont [8/16] (narrow) %v3833_v13, 64  ;;  %3891 = vxpose.xlu0.b32.end [16/16] (narrow) %v3793_v37, 64 }
 0x67b   : > { %3916 = vxpose.xlu1.b32.cont [9/16] (narrow) %v3838_v14, 64  ;;  %v3955_v14 = vld [vmem:[%s5474_s27 + $0x78] sm:$0xff] }
 0x67f   : > { %3917 = vxpose.xlu1.b32.cont [10/16] (narrow) %v3843_v61, 64 }
 0x683   : > { %3918 = vxpose.xlu1.b32.cont [11/16] (narrow) %v3848_v62, 64 }
 0x687   : > { %3919 = vxpose.xlu1.b32.cont [12/16] (narrow) %v3853_v36, 64 }
 0x68b   : > { %3920 = vxpose.xlu1.b32.cont [13/16] (narrow) %v3858_v1, 64 }
 0x68f   : > { %3921 = vxpose.xlu1.b32.cont [14/16] (narrow) %v3863_v44, 64 }
 0x693   : > { %3922 = vxpose.xlu1.b32.cont [15/16] (narrow) %v3868_v6, 64 }
 0x697   : > { %3923 = vxpose.xlu1.b32.end [16/16] (narrow) %v3873_v59, 64 }
 0x6bb   : > { %v3892_v33 = vpop.trf.xlu0 }
 0x6bc   : > { %v3956_v47 = vadd.f32 %v3940_v34, %v3892_v33 }
 0x6be   : > { %3972 = vst [vmem:[%s5479_s10] sm:$0xff] %v3956_v47 }
 0x6bf   : > { %v3893_v39 = vpop.trf.xlu0 }
 0x6c0   : > { %v3958_v32 = vadd.f32 %v3942_v35, %v3893_v39 }
 0x6c2   : > { %3974 = vst [vmem:[%s5479_s10 + $0x10] sm:$0xff] %v3958_v32 }
 0x6c3   : > { %v3894_v19 = vpop.trf.xlu0 }
 0x6c4   : > { %v3960_v15 = vadd.f32 %v3944_v55, %v3894_v19 }
 0x6c6   : > { %3976 = vst [vmem:[%s5479_s10 + $0x20] sm:$0xff] %v3960_v15 }
 0x6c7   : > { %v3895_v10 = vpop.trf.xlu0 }
 0x6c8   : > { %v3962_v9 = vadd.f32 %v3946_v45, %v3895_v10 }
 0x6ca   : > { %3978 = vst [vmem:[%s5479_s10 + $0x30] sm:$0xff] %v3962_v9 }
 0x6cb   : > { %v3896_v16 = vpop.trf.xlu0 }
 0x6cc   : > { %v3964_v42 = vadd.f32 %v3948_v20, %v3896_v16 }
 0x6ce   : > { %3980 = vst [vmem:[%s5479_s10 + $0x40] sm:$0xff] %v3964_v42 }
 0x6cf   : > { %v3897_v17 = vpop.trf.xlu0 }
 0x6d0   : > { %v3966_v21 = vadd.f32 %v3950_v4, %v3897_v17 }
 0x6d2   : > { %3982 = vst [vmem:[%s5479_s10 + $0x50] sm:$0xff] %v3966_v21 }
 0x6d3   : > { %v3898_v18 = vpop.trf.xlu0 }
 0x6d4   : > { %v3968_v11 = vadd.f32 %v3952_v50, %v3898_v18 }
 0x6d6   : > { %3984 = vst [vmem:[%s5479_s10 + $0x60] sm:$0xff] %v3968_v11 }
 0x6d7   : > { %v3899_v41 = vpop.trf.xlu0 }
 0x6d8   : > { %v3970_v2 = vadd.f32 %v3954_v40, %v3899_v41 }
 0x6da   : > { %3986 = vst [vmem:[%s5479_s10 + $0x70] sm:$0xff] %v3970_v2 }
 0x6db   : > { %v3924_v5 = vpop.trf.xlu1 }
 0x6dc   : > { %v3957_v31 = vadd.f32 %v3941_v49, %v3924_v5 }
 0x6de   : > { %3973 = vst [vmem:[%s5479_s10 + $0x8] sm:$0xff] %v3957_v31 }
 0x6df   : > { %v3925_v57 = vpop.trf.xlu1 }
 0x6e0   : > { %v3959_v12 = vadd.f32 %v3943_v25, %v3925_v57 }
 0x6e2   : > { %3975 = vst [vmem:[%s5479_s10 + $0x18] sm:$0xff] %v3959_v12 }
 0x6e3   : > { %v3926_v38 = vpop.trf.xlu1 }
 0x6e4   : > { %v3961_v48 = vadd.f32 %v3945_v46, %v3926_v38 }
 0x6e6   : > { %3977 = vst [vmem:[%s5479_s10 + $0x28] sm:$0xff] %v3961_v48 }
 0x6e7   : > { %v3927_v22 = vpop.trf.xlu1 }
 0x6e8   : > { %v3963_v53 = vadd.f32 %v3947_v58, %v3927_v22 }
 0x6ea   : > { %3979 = vst [vmem:[%s5479_s10 + $0x38] sm:$0xff] %v3963_v53 }
 0x6eb   : > { %v3928_v29 = vpop.trf.xlu1 }
 0x6ec   : > { %v3965_v24 = vadd.f32 %v3949_v52, %v3928_v29 }
 0x6ee   : > { %3981 = vst [vmem:[%s5479_s10 + $0x48] sm:$0xff] %v3965_v24 }
 0x6ef   : > { %v3929_v43 = vpop.trf.xlu1 }
 0x6f0   : > { %v3967_v61 = vadd.f32 %v3951_v63, %v3929_v43 }
 0x6f2   : > { %3983 = vst [vmem:[%s5479_s10 + $0x58] sm:$0xff] %v3967_v61 }
 0x6f3   : > { %v3930_v51 = vpop.trf.xlu1 }
 0x6f4   : > { %v3969_v27 = vadd.f32 %v3953_v26, %v3930_v51 }
 0x6f6   : > { %3985 = vst [vmem:[%s5479_s10 + $0x68] sm:$0xff] %v3969_v27 }
 0x6f7   : > { %v3931_v0 = vpop.trf.xlu1 }
 0x6f8   : > { %v3971_v36 = vadd.f32 %v3955_v14, %v3931_v0 }
 0x6fa   : > { %3987 = vst [vmem:[%s5479_s10 + $0x78] sm:$0xff] %v3971_v36 }
 0x6fb PF: > { %s19_s30 = sadd.s32 1, %s5378_s30  }
 0x6fc   : > { %p16_p6 = scmp.ge.s32.totalorder %s19_s30, 4  }
 0x6fe   :  { %18 = sbr.rel (!%p16_p6) target bundleno = 1 (0x1), region = 136 }

</bundles_post_ra>
